<compile_context>
chip_gen: v7x
topology: tpu7x:2x2x1
jax: 0.10.0
libtpu: 0.0.40
codegen_flags: <defaults>
</compile_context>

<pallas_src>
import functools
import math

import jax
import jax.numpy as jnp
import numpy as np
from jax import lax
from jax.experimental import pallas as pl
from jax.experimental.pallas import tpu as pltpu

W_DTYPE = jnp.bfloat16   # MXU operand dtype (accumulation stays f32); good on v5e/v6e/v7x

_AIR_KEYS = ("wh", "bh", "w12", "b12", "w22", "b22", "w23", "b23", "wf", "bf")
_NW = len(_AIR_KEYS)


# ------------------------------ in-kernel helpers ------------------------------ #

def _shift_cols(a, k):
    """s[:, c] = a[:, c + k] if 0 <= c + k < M else 0   (static integer k)."""
    if k == 0:
        return a
    c, m = a.shape
    pad = jnp.zeros((c, abs(k)), a.dtype)
    if k > 0:
        return jnp.concatenate([a[:, k:], pad], axis=1)
    return jnp.concatenate([pad, a[:, :m + k]], axis=1)


def _edge_masks(W, M):
    """Hoisted row-boundary masks, computed once per kernel invocation."""
    col = lax.broadcasted_iota(jnp.int32, (1, M), 1) % W
    mask_l = (col >= 1).astype(jnp.float32)       # source col-1 exists
    mask_r = (col <= W - 2).astype(jnp.float32)   # source col+1 exists
    return mask_l, mask_r


def _conv3x3(a, w_ref, b_ref, W, mask_l, mask_r):
    """3x3 / stride-1 / pad-1 conv, channel-major, as ONE stacked-tap matmul.

    a:     (Cin, M) f32 activation (column c is pixel (c // W, c % W)).
    w_ref: (Cout, 9*Cin) bf16 weight, tap-major (k = ky*3+kx outer, cin inner),
           BN scale pre-folded.  b_ref: (Cout, 1) f32 folded bias.
    returns (Cout, M) f32.
    """
    taps = []
    for k in range(9):
        dy, dx = k // 3 - 1, k % 3 - 1
        t = _shift_cols(a, dy * W + dx)           # vertical boundary handled by zero pad
        if dx == 1:
            t = t * mask_r                        # kill columns that crossed a row edge
        elif dx == -1:
            t = t * mask_l
        taps.append(t)
    stacked = jnp.concatenate(taps, axis=0).astype(W_DTYPE)     # (9*Cin, M), one cast
    return jnp.dot(w_ref[...], stacked, preferred_element_type=jnp.float32) + b_ref[...]


def _air_body(x, w, W, mask_l, mask_r):
    """One fused AIRBottleneck (stride=1, no downsample) on a (C, M) image slab."""
    (wh, bh, w12, b12, w22, b22, w23, b23, wf, bf) = w
    P = w12.shape[0]                              # planes
    xb = x.astype(W_DTYPE)

    # both branch heads (1x1 conv + bn + relu) in one matmul; slice rows per branch
    h = jnp.maximum(jnp.dot(wh[...], xb, preferred_element_type=jnp.float32) + bh[...],
                    0.0)
    # branch 1: 3x3 + bn_concat[:P] + relu
    b1 = jnp.maximum(_conv3x3(h[:P], w12, b12, W, mask_l, mask_r), 0.0)
    # branch 2: 3x3 + bn2_2 + relu ; 3x3 + bn_concat[P:] + relu
    b2 = jnp.maximum(_conv3x3(h[P:], w22, b22, W, mask_l, mask_r), 0.0)
    b2 = jnp.maximum(_conv3x3(b2, w23, b23, W, mask_l, mask_r), 0.0)

    # final 1x1 over the concat + bn + residual add + relu (one matmul)
    cat = jnp.concatenate([b1, b2], axis=0).astype(W_DTYPE)
    out = jnp.dot(wf[...], cat, preferred_element_type=jnp.float32) + bf[...] + x
    return jnp.maximum(out, 0.0)


# --------------------------------- kernels -------------------------------------- #

def _air_chain_kernel(x_ref, *args, H, W, n_blocks):
    """n_blocks AIRBottlenecks chained in one kernel; emits output of block 0 and last."""
    nw = n_blocks * _NW
    wrefs = args[:nw]
    o_first_ref, o_last_ref = args[nw], args[nw + 1]
    mask_l, mask_r = _edge_masks(W, H * W)
    x = x_ref[0]
    for b in range(n_blocks):
        x = _air_body(x, wrefs[b * _NW:(b + 1) * _NW], W, mask_l, mask_r)
        if b == 0:
            o_first_ref[0] = x
    o_last_ref[0] = x


def _air_up_kernel(a_ref, s_ref, up_ref, *args, H, W):
    """Fused x = relu(a + bilinear_upsample(s)) followed by one AIRBottleneck."""
    wrefs = args[:_NW]
    o_ref = args[_NW]
    mask_l, mask_r = _edge_masks(W, H * W)
    up = jnp.dot(s_ref[0].astype(W_DTYPE), up_ref[...],
                 preferred_element_type=jnp.float32)
    x = jnp.maximum(a_ref[0] + up, 0.0)
    o_ref[0] = _air_body(x, wrefs, W, mask_l, mask_r)


def _mask_kernel(u_ref, up_ref, w1_ref, b1_ref, w2_ref, b2_ref, o_ref):
    """Fused mask path: upsample -> 1x1 conv+bn+relu -> 1x1 conv+bn -> sigmoid."""
    up8 = jnp.dot(u_ref[0].astype(W_DTYPE), up_ref[...],
                  preferred_element_type=jnp.float32)
    h = jnp.dot(w1_ref[...], up8.astype(W_DTYPE),
                preferred_element_type=jnp.float32) + b1_ref[...]
    h = jnp.maximum(h, 0.0)
    m = jnp.dot(w2_ref[...], h.astype(W_DTYPE),
                preferred_element_type=jnp.float32) + b2_ref[...]
    o_ref[0] = 1.0 / (1.0 + jnp.exp(-m))


# ----------------------------- pallas_call wrappers ----------------------------- #

_PARALLEL = pltpu.CompilerParams(dimension_semantics=("parallel",))


def _pinned_spec(arr):
    nd = arr.ndim
    return pl.BlockSpec(arr.shape, lambda n, _nd=nd: (0,) * _nd)


def _img_spec(c, m):
    return pl.BlockSpec((1, c, m), lambda n: (n, 0, 0))


def _flatten_params(plist):
    out = []
    for p in plist:
        out += [p[k] for k in _AIR_KEYS]
    return out


def air_chain(x, plist):
    """Chain of AIRBottlenecks fused in one kernel. x: (N, C, H, W), C == 4*planes.

    Returns (output of first block, output of last block), both (N, C, H, W)."""
    N, C, H, W = x.shape
    M = H * W
    nb = len(plist)
    weights = _flatten_params(plist)
    o_first, o_last = pl.pallas_call(
        functools.partial(_air_chain_kernel, H=H, W=W, n_blocks=nb),
        out_shape=(jax.ShapeDtypeStruct((N, C, M), jnp.float32),
                   jax.ShapeDtypeStruct((N, C, M), jnp.float32)),
        grid=(N,),
        in_specs=[_img_spec(C, M)] + [_pinned_spec(w) for w in weights],
        out_specs=(_img_spec(C, M), _img_spec(C, M)),
        compiler_params=_PARALLEL,
    )(x.reshape(N, C, M), *weights)
    return o_first.reshape(N, C, H, W), o_last.reshape(N, C, H, W)


def air_block_up(a, small, p):
    """Fused relu(a + bilinear_upsample(small)) followed by one AIRBottleneck."""
    N, C, H, W = a.shape
    Hs, Ws = small.shape[2], small.shape[3]
    M, Ms = H * W, Hs * Ws
    up_t = _upsample_matrix(Hs, Ws, H, W)               # (Ms, M) bf16
    weights = _flatten_params([p])
    out = pl.pallas_call(
        functools.partial(_air_up_kernel, H=H, W=W),
        out_shape=jax.ShapeDtypeStruct((N, C, M), jnp.float32),
        grid=(N,),
        in_specs=[_img_spec(C, M), _img_spec(C, Ms), _pinned_spec(up_t)]
                 + [_pinned_spec(w) for w in weights],
        out_specs=_img_spec(C, M),
        compiler_params=_PARALLEL,
    )(a.reshape(N, C, M), small.reshape(N, C, Ms), up_t, *weights)
    return out.reshape(N, C, H, W)


def mask_branch(u, params, out_h, out_w):
    """Fused mask path on u: upsample -> conv+bn+relu -> conv+bn -> sigmoid."""
    N, C, Hs, Ws = u.shape
    M, Ms = out_h * out_w, Hs * Ws
    up_t = _upsample_matrix(Hs, Ws, out_h, out_w)
    ws = [params["mw1"], params["mb1"], params["mw2"], params["mb2"]]
    out = pl.pallas_call(
        _mask_kernel,
        out_shape=jax.ShapeDtypeStruct((N, C, M), jnp.float32),
        grid=(N,),
        in_specs=[_img_spec(C, Ms), _pinned_spec(up_t)]
                 + [_pinned_spec(w) for w in ws],
        out_specs=_img_spec(C, M),
        compiler_params=_PARALLEL,
    )(u.reshape(N, C, Ms), up_t, *ws)
    return out.reshape(N, C, out_h, out_w)


# -------------------------------- plain-JAX glue --------------------------------- #

def maxpool3x3s2(x):
    """nn.MaxPool2d(kernel_size=3, stride=2, padding=1), NCHW (XLA glue, not Pallas)."""
    return lax.reduce_window(
        x, jnp.array(-jnp.inf, x.dtype), lax.max,
        window_dimensions=(1, 1, 3, 3), window_strides=(1, 1, 2, 2),
        padding=((0, 0), (0, 0), (1, 1), (1, 1)))


def _bilinear_matrix_np(out_size, in_size):
    """1-D interpolation matrix for F.upsample_bilinear (align_corners=True)."""
    if in_size == 1:
        return np.ones((out_size, 1), np.float32)
    if out_size == 1:
        m = np.zeros((1, in_size), np.float32)
        m[0, 0] = 1.0
        return m
    pos = np.arange(out_size, dtype=np.float64) * (in_size - 1) / (out_size - 1)
    lo = np.floor(pos).astype(np.int64)
    hi = np.minimum(lo + 1, in_size - 1)
    frac = pos - lo
    m = np.zeros((out_size, in_size), np.float32)
    rows = np.arange(out_size)
    m[rows, lo] += 1.0 - frac
    m[rows, hi] += frac
    return m


def _upsample_matrix(h_in, w_in, h_out, w_out):
    """(h_in*w_in, h_out*w_out) bf16 matrix U with up_flat = small_flat @ U."""
    ry = _bilinear_matrix_np(h_out, h_in)
    rx = _bilinear_matrix_np(w_out, w_in)
    return jnp.asarray(np.kron(ry, rx).T).astype(W_DTYPE)


# ---------------------------------- parameters ----------------------------------- #

def _fold_bn(gamma, beta, mean, var, eps=1e-5):
    scale = gamma / jnp.sqrt(var + eps)
    return scale, beta - mean * scale


def _make_bn(key, c):
    k1, k2, k3, k4 = jax.random.split(key, 4)
    gamma = 1.0 + 0.1 * jax.random.normal(k1, (c,), jnp.float32)
    beta = 0.1 * jax.random.normal(k2, (c,), jnp.float32)
    mean = 0.1 * jax.random.normal(k3, (c,), jnp.float32)
    var = 1.0 + 0.1 * jax.random.uniform(k4, (c,), jnp.float32)
    return _fold_bn(gamma, beta, mean, var)


def _conv1x1(key, cin, cout):
    return jax.random.normal(key, (cout, cin), jnp.float32) / math.sqrt(cin)


def _conv3x3_init(key, cin, cout):
    return jax.random.normal(key, (cout, cin, 3, 3), jnp.float32) / math.sqrt(9 * cin)


def _fold1x1(w, scale, bias):
    # (Cout, Cin) weight with BN scale folded onto output rows; (Cout, 1) bias
    return (w * scale[:, None]).astype(W_DTYPE), bias[:, None].astype(jnp.float32)


def _fold3x3(w, scale, bias):
    # (Cout, Cin, 3, 3) -> (Cout, 9*Cin), tap-major (k=ky*3+kx outer, cin inner),
    # BN scale folded.  Matches the stacked-tap operand built in _conv3x3.
    cout, cin = w.shape[0], w.shape[1]
    wf = (w * scale[:, None, None, None])
    wf = jnp.transpose(wf, (0, 2, 3, 1)).reshape(cout, 9 * cin)
    return wf.astype(W_DTYPE), bias[:, None].astype(jnp.float32)


def make_air_params(key, inplanes, planes):
    P, Ph, Co = planes, int(planes * 0.5), 4 * planes
    ks = jax.random.split(key, 11)
    w11 = _conv1x1(ks[0], inplanes, P)
    s11, b11 = _make_bn(ks[1], P)
    w12 = _conv3x3_init(ks[2], P, P)
    w21 = _conv1x1(ks[3], inplanes, Ph)
    s21, b21 = _make_bn(ks[4], Ph)
    w22 = _conv3x3_init(ks[5], Ph, Ph)
    s22, b22 = _make_bn(ks[6], Ph)
    w23 = _conv3x3_init(ks[7], Ph, Ph)
    sc, bc = _make_bn(ks[8], P + Ph)                    # bn_concat
    wfc = _conv1x1(ks[9], P + Ph, Co)
    sf, bf = _make_bn(ks[10], Co)

    p = {}
    # fused branch heads: stacked [conv1_1*bn1_1 ; conv2_1*bn2_1]
    wh = jnp.concatenate([w11 * s11[:, None], w21 * s21[:, None]], axis=0)
    bh = jnp.concatenate([b11, b21], axis=0)
    p["wh"] = wh.astype(W_DTYPE)
    p["bh"] = bh[:, None].astype(jnp.float32)
    p["w12"], p["b12"] = _fold3x3(w12, sc[:P], bc[:P])  # bn_concat, branch-1 channels
    p["w22"], p["b22"] = _fold3x3(w22, s22, b22)
    p["w23"], p["b23"] = _fold3x3(w23, sc[P:], bc[P:])  # bn_concat, branch-2 channels
    p["wf"], p["bf"] = _fold1x1(wfc, sf, bf)            # final 1x1 with bn folded
    return p


def make_attention_block_params(key, inplanes, planes):
    names = ["pre", "down2_1", "down2_2", "down4_1", "down4_2", "down8_1",
             "down8_2", "up2_1", "up4_1", "block1", "block2", "pos"]
    keys = jax.random.split(key, len(names) + 4)
    params = {n: make_air_params(k, inplanes, planes)
              for n, k in zip(names, keys[:len(names)])}
    km1, km2, km3, km4 = keys[len(names):]
    mw1 = _conv1x1(km1, inplanes, inplanes)
    ms1, mb1 = _make_bn(km2, inplanes)
    mw2 = _conv1x1(km3, inplanes, inplanes)
    ms2, mb2 = _make_bn(km4, inplanes)
    params["mw1"], params["mb1"] = _fold1x1(mw1, ms1, mb1)
    params["mw2"], params["mb2"] = _fold1x1(mw2, ms2, mb2)
    return params


# --------------------------------- forward pass ---------------------------------- #

def attention_block_a(x, params):
    """AttentionBlock_A forward. x: (N, inplanes, H, W) NCHW, inplanes == 4 * planes."""
    # Full-resolution trunk pre -> block1 -> block2 -> pos fused in ONE kernel.
    # pre_x is also emitted because it feeds the mask pyramid below.
    pre_x, out = air_chain(
        x, [params["pre"], params["block1"], params["block2"], params["pos"]])

    # Attention-mask pyramid.  The reference computes `attention = x * mask;
    # out = relu(x + attention)` and then discards it (`out = self.pos_block(x)`),
    # so the pyramid does not influence the returned value and XLA may DCE it;
    # it is kept here only for structural fidelity with the module.
    d2in = maxpool3x3s2(pre_x)
    d2, d22 = air_chain(d2in, [params["down2_1"], params["down2_2"]])
    d4in = maxpool3x3s2(d2)
    d4, d42 = air_chain(d4in, [params["down4_1"], params["down4_2"]])
    d8in = maxpool3x3s2(d4)
    _d8, d82 = air_chain(d8in, [params["down8_1"], params["down8_2"]])

    up2 = air_block_up(d42, d82, params["up2_1"])       # relu(d42 + up(d82)); up2_block1
    up4 = air_block_up(d22, up2, params["up4_1"])       # relu(d22 + up(up2)); up4_block1
    mask = mask_branch(up4, params, x.shape[2], x.shape[3])
    del mask

    return out


# ------------------------------------- main -------------------------------------- #

if __name__ == "__main__":
    inplanes, planes = 16, 4          # residual add requires inplanes == 4 * planes
    N, H, W = 2, 16, 16

    key = jax.random.PRNGKey(0)
    kx, kp = jax.random.split(key)
    x = jax.random.normal(kx, (N, inplanes, H, W), jnp.float32)   # NCHW like PyTorch
    params = make_attention_block_params(kp, inplanes, planes)

    fwd = jax.jit(attention_block_a)
    out = jax.block_until_ready(fwd(x, params))

    assert out.shape == (N, 4 * planes, H, W), out.shape
    assert bool(jnp.all(jnp.isfinite(out)))
    print("KERNEL_OK")
</pallas_src>

<mosaic_0001>
module attributes {stable_mosaic.version = 11 : i64} {
  func.func @_air_chain_kernel(%arg0: i32, %arg1: memref<1x16x256xf32, #tpu.memory_space<vmem>>, %arg2: memref<6x16xbf16, #tpu.memory_space<vmem>>, %arg3: memref<6x1xf32, #tpu.memory_space<vmem>>, %arg4: memref<4x36xbf16, #tpu.memory_space<vmem>>, %arg5: memref<4x1xf32, #tpu.memory_space<vmem>>, %arg6: memref<2x18xbf16, #tpu.memory_space<vmem>>, %arg7: memref<2x1xf32, #tpu.memory_space<vmem>>, %arg8: memref<2x18xbf16, #tpu.memory_space<vmem>>, %arg9: memref<2x1xf32, #tpu.memory_space<vmem>>, %arg10: memref<16x6xbf16, #tpu.memory_space<vmem>>, %arg11: memref<16x1xf32, #tpu.memory_space<vmem>>, %arg12: memref<6x16xbf16, #tpu.memory_space<vmem>>, %arg13: memref<6x1xf32, #tpu.memory_space<vmem>>, %arg14: memref<4x36xbf16, #tpu.memory_space<vmem>>, %arg15: memref<4x1xf32, #tpu.memory_space<vmem>>, %arg16: memref<2x18xbf16, #tpu.memory_space<vmem>>, %arg17: memref<2x1xf32, #tpu.memory_space<vmem>>, %arg18: memref<2x18xbf16, #tpu.memory_space<vmem>>, %arg19: memref<2x1xf32, #tpu.memory_space<vmem>>, %arg20: memref<16x6xbf16, #tpu.memory_space<vmem>>, %arg21: memref<16x1xf32, #tpu.memory_space<vmem>>, %arg22: memref<6x16xbf16, #tpu.memory_space<vmem>>, %arg23: memref<6x1xf32, #tpu.memory_space<vmem>>, %arg24: memref<4x36xbf16, #tpu.memory_space<vmem>>, %arg25: memref<4x1xf32, #tpu.memory_space<vmem>>, %arg26: memref<2x18xbf16, #tpu.memory_space<vmem>>, %arg27: memref<2x1xf32, #tpu.memory_space<vmem>>, %arg28: memref<2x18xbf16, #tpu.memory_space<vmem>>, %arg29: memref<2x1xf32, #tpu.memory_space<vmem>>, %arg30: memref<16x6xbf16, #tpu.memory_space<vmem>>, %arg31: memref<16x1xf32, #tpu.memory_space<vmem>>, %arg32: memref<6x16xbf16, #tpu.memory_space<vmem>>, %arg33: memref<6x1xf32, #tpu.memory_space<vmem>>, %arg34: memref<4x36xbf16, #tpu.memory_space<vmem>>, %arg35: memref<4x1xf32, #tpu.memory_space<vmem>>, %arg36: memref<2x18xbf16, #tpu.memory_space<vmem>>, %arg37: memref<2x1xf32, #tpu.memory_space<vmem>>, %arg38: memref<2x18xbf16, #tpu.memory_space<vmem>>, %arg39: memref<2x1xf32, #tpu.memory_space<vmem>>, %arg40: memref<16x6xbf16, #tpu.memory_space<vmem>>, %arg41: memref<16x1xf32, #tpu.memory_space<vmem>>, %arg42: memref<1x16x256xf32, #tpu.memory_space<vmem>>, %arg43: memref<1x16x256xf32, #tpu.memory_space<vmem>>) attributes {dimension_semantics = [#tpu.dimension_semantics<parallel>], iteration_bounds = array<i64: 2>, scalar_prefetch = 0 : i64, scratch_operands = 0 : i64, tpu.core_type = #tpu.core_type<tc>, window_params = [{transform_indices = @transform_0, window_bounds = array<i64: 1, 16, 256>}, {pipeline_mode = #tpu.pipeline_mode<synchronous>, transform_indices = @transform_1, window_bounds = array<i64: 6, 16>}, {pipeline_mode = #tpu.pipeline_mode<synchronous>, transform_indices = @transform_2, window_bounds = array<i64: 6, 1>}, {pipeline_mode = #tpu.pipeline_mode<synchronous>, transform_indices = @transform_3, window_bounds = array<i64: 4, 36>}, {pipeline_mode = #tpu.pipeline_mode<synchronous>, transform_indices = @transform_4, window_bounds = array<i64: 4, 1>}, {pipeline_mode = #tpu.pipeline_mode<synchronous>, transform_indices = @transform_5, window_bounds = array<i64: 2, 18>}, {pipeline_mode = #tpu.pipeline_mode<synchronous>, transform_indices = @transform_6, window_bounds = array<i64: 2, 1>}, {pipeline_mode = #tpu.pipeline_mode<synchronous>, transform_indices = @transform_7, window_bounds = array<i64: 2, 18>}, {pipeline_mode = #tpu.pipeline_mode<synchronous>, transform_indices = @transform_8, window_bounds = array<i64: 2, 1>}, {pipeline_mode = #tpu.pipeline_mode<synchronous>, transform_indices = @transform_9, window_bounds = array<i64: 16, 6>}, {pipeline_mode = #tpu.pipeline_mode<synchronous>, transform_indices = @transform_10, window_bounds = array<i64: 16, 1>}, {pipeline_mode = #tpu.pipeline_mode<synchronous>, transform_indices = @transform_11, window_bounds = array<i64: 6, 16>}, {pipeline_mode = #tpu.pipeline_mode<synchronous>, transform_indices = @transform_12, window_bounds = array<i64: 6, 1>}, {pipeline_mode = #tpu.pipeline_mode<synchronous>, transform_indices = @transform_13, window_bounds = array<i64: 4, 36>}, {pipeline_mode = #tpu.pipeline_mode<synchronous>, transform_indices = @transform_14, window_bounds = array<i64: 4, 1>}, {pipeline_mode = #tpu.pipeline_mode<synchronous>, transform_indices = @transform_15, window_bounds = array<i64: 2, 18>}, {pipeline_mode = #tpu.pipeline_mode<synchronous>, transform_indices = @transform_16, window_bounds = array<i64: 2, 1>}, {pipeline_mode = #tpu.pipeline_mode<synchronous>, transform_indices = @transform_17, window_bounds = array<i64: 2, 18>}, {pipeline_mode = #tpu.pipeline_mode<synchronous>, transform_indices = @transform_18, window_bounds = array<i64: 2, 1>}, {pipeline_mode = #tpu.pipeline_mode<synchronous>, transform_indices = @transform_19, window_bounds = array<i64: 16, 6>}, {pipeline_mode = #tpu.pipeline_mode<synchronous>, transform_indices = @transform_20, window_bounds = array<i64: 16, 1>}, {pipeline_mode = #tpu.pipeline_mode<synchronous>, transform_indices = @transform_21, window_bounds = array<i64: 6, 16>}, {pipeline_mode = #tpu.pipeline_mode<synchronous>, transform_indices = @transform_22, window_bounds = array<i64: 6, 1>}, {pipeline_mode = #tpu.pipeline_mode<synchronous>, transform_indices = @transform_23, window_bounds = array<i64: 4, 36>}, {pipeline_mode = #tpu.pipeline_mode<synchronous>, transform_indices = @transform_24, window_bounds = array<i64: 4, 1>}, {pipeline_mode = #tpu.pipeline_mode<synchronous>, transform_indices = @transform_25, window_bounds = array<i64: 2, 18>}, {pipeline_mode = #tpu.pipeline_mode<synchronous>, transform_indices = @transform_26, window_bounds = array<i64: 2, 1>}, {pipeline_mode = #tpu.pipeline_mode<synchronous>, transform_indices = @transform_27, window_bounds = array<i64: 2, 18>}, {pipeline_mode = #tpu.pipeline_mode<synchronous>, transform_indices = @transform_28, window_bounds = array<i64: 2, 1>}, {pipeline_mode = #tpu.pipeline_mode<synchronous>, transform_indices = @transform_29, window_bounds = array<i64: 16, 6>}, {pipeline_mode = #tpu.pipeline_mode<synchronous>, transform_indices = @transform_30, window_bounds = array<i64: 16, 1>}, {pipeline_mode = #tpu.pipeline_mode<synchronous>, transform_indices = @transform_31, window_bounds = array<i64: 6, 16>}, {pipeline_mode = #tpu.pipeline_mode<synchronous>, transform_indices = @transform_32, window_bounds = array<i64: 6, 1>}, {pipeline_mode = #tpu.pipeline_mode<synchronous>, transform_indices = @transform_33, window_bounds = array<i64: 4, 36>}, {pipeline_mode = #tpu.pipeline_mode<synchronous>, transform_indices = @transform_34, window_bounds = array<i64: 4, 1>}, {pipeline_mode = #tpu.pipeline_mode<synchronous>, transform_indices = @transform_35, window_bounds = array<i64: 2, 18>}, {pipeline_mode = #tpu.pipeline_mode<synchronous>, transform_indices = @transform_36, window_bounds = array<i64: 2, 1>}, {pipeline_mode = #tpu.pipeline_mode<synchronous>, transform_indices = @transform_37, window_bounds = array<i64: 2, 18>}, {pipeline_mode = #tpu.pipeline_mode<synchronous>, transform_indices = @transform_38, window_bounds = array<i64: 2, 1>}, {pipeline_mode = #tpu.pipeline_mode<synchronous>, transform_indices = @transform_39, window_bounds = array<i64: 16, 6>}, {pipeline_mode = #tpu.pipeline_mode<synchronous>, transform_indices = @transform_40, window_bounds = array<i64: 16, 1>}, {transform_indices = @transform_41, window_bounds = array<i64: 1, 16, 256>}, {transform_indices = @transform_42, window_bounds = array<i64: 1, 16, 256>}]} {
    %0 = tpu.iota {dimensions = array<i32: 1>} : vector<1x256xi32>
    %c16_i32 = arith.constant 16 : i32
    %c0_i32 = arith.constant 0 : i32
    %1 = arith.cmpi eq, %c16_i32, %c0_i32 : i32
    %c1_i32 = arith.constant 1 : i32
    %2 = arith.select %1, %c1_i32, %c16_i32 : i32
    %3 = vector.broadcast %2 : i32 to vector<1x256xi32>
    %4 = arith.remsi %0, %3 : vector<1x256xi32>
    %c0_i32_0 = arith.constant 0 : i32
    %5 = vector.broadcast %c0_i32_0 : i32 to vector<1x256xi32>
    %6 = arith.cmpi ne, %4, %5 : vector<1x256xi32>
    %c0_i32_1 = arith.constant 0 : i32
    %7 = vector.broadcast %c0_i32_1 : i32 to vector<1x256xi32>
    %8 = arith.cmpi slt, %4, %7 : vector<1x256xi32>
    %c0_i32_2 = arith.constant 0 : i32
    %9 = arith.cmpi slt, %2, %c0_i32_2 : i32
    %10 = vector.broadcast %9 : i1 to vector<1x256xi1>
    %11 = vector.broadcast %10 : vector<1x256xi1> to vector<1x256xi1>
    %12 = arith.xori %8, %11 : vector<1x256xi1>
    %13 = arith.andi %12, %6 : vector<1x256xi1>
    %14 = vector.broadcast %2 : i32 to vector<1x256xi32>
    %15 = arith.addi %4, %14 : vector<1x256xi32>
    %16 = arith.select %13, %15, %4 : vector<1x256xi1>, vector<1x256xi32>
    %c1_i32_3 = arith.constant 1 : i32
    %17 = vector.broadcast %c1_i32_3 : i32 to vector<1x256xi32>
    %18 = arith.cmpi sge, %16, %17 : vector<1x256xi32>
    %19 = arith.extui %18 : vector<1x256xi1> to vector<1x256xi32>
    %20 = arith.sitofp %19 : vector<1x256xi32> to vector<1x256xf32>
    %c14_i32 = arith.constant 14 : i32
    %21 = vector.broadcast %c14_i32 : i32 to vector<1x256xi32>
    %22 = arith.cmpi sle, %16, %21 : vector<1x256xi32>
    %23 = arith.extui %22 : vector<1x256xi1> to vector<1x256xi32>
    %24 = arith.sitofp %23 : vector<1x256xi32> to vector<1x256xf32>
    %c0 = arith.constant 0 : index
    %c0_4 = arith.constant 0 : index
    %c0_5 = arith.constant 0 : index
    %25 = vector.load %arg1[%c0, %c0_4, %c0_5] : memref<1x16x256xf32, #tpu.memory_space<vmem>>, vector<1x16x256xf32>
    %26 = vector.shape_cast %25 : vector<1x16x256xf32> to vector<16x256xf32>
    %27 = arith.truncf %26 : vector<16x256xf32> to vector<16x256xbf16>
    %c0_6 = arith.constant 0 : index
    %c0_7 = arith.constant 0 : index
    %28 = vector.load %arg2[%c0_6, %c0_7] : memref<6x16xbf16, #tpu.memory_space<vmem>>, vector<6x16xbf16>
    %cst = arith.constant dense<0.000000e+00> : vector<6x256xf32>
    %29 = tpu.matmul %28, %27, %cst {dimension_numbers = #tpu.dot_dimension_numbers<[1], [0], [0], [1], [0, 0, 1, 1], [], []>} : vector<6x16xbf16>, vector<16x256xbf16>, vector<6x256xf32> -> vector<6x256xf32>
    %c0_8 = arith.constant 0 : index
    %c0_9 = arith.constant 0 : index
    %30 = vector.load %arg3[%c0_8, %c0_9] : memref<6x1xf32, #tpu.memory_space<vmem>>, vector<6x1xf32>
    %31 = vector.broadcast %30 : vector<6x1xf32> to vector<6x256xf32>
    %32 = arith.addf %29, %31 : vector<6x256xf32>
    %cst_10 = arith.constant 0.000000e+00 : f32
    %33 = vector.broadcast %cst_10 : f32 to vector<6x256xf32>
    %34 = arith.maximumf %32, %33 : vector<6x256xf32>
    %35 = vector.extract_strided_slice %34 {offsets = [0, 0], sizes = [4, 256], strides = [1, 1]} : vector<6x256xf32> to vector<4x256xf32>
    %cst_11 = arith.constant 0.000000e+00 : f32
    %36 = vector.broadcast %cst_11 : f32 to vector<4x17xf32>
    %37 = vector.extract_strided_slice %35 {offsets = [0, 0], sizes = [4, 239], strides = [1, 1]} : vector<4x256xf32> to vector<4x239xf32>
    %38 = tpu.concatenate %36, %37 in 1 : vector<4x17xf32>, vector<4x239xf32> -> vector<4x256xf32>
    %39 = vector.broadcast %20 : vector<1x256xf32> to vector<4x256xf32>
    %40 = arith.mulf %38, %39 : vector<4x256xf32>
    %cst_12 = arith.constant 0.000000e+00 : f32
    %41 = vector.broadcast %cst_12 : f32 to vector<4x16xf32>
    %42 = vector.extract_strided_slice %35 {offsets = [0, 0], sizes = [4, 240], strides = [1, 1]} : vector<4x256xf32> to vector<4x240xf32>
    %43 = tpu.concatenate %41, %42 in 1 : vector<4x16xf32>, vector<4x240xf32> -> vector<4x256xf32>
    %cst_13 = arith.constant 0.000000e+00 : f32
    %44 = vector.broadcast %cst_13 : f32 to vector<4x15xf32>
    %45 = vector.extract_strided_slice %35 {offsets = [0, 0], sizes = [4, 241], strides = [1, 1]} : vector<4x256xf32> to vector<4x241xf32>
    %46 = tpu.concatenate %44, %45 in 1 : vector<4x15xf32>, vector<4x241xf32> -> vector<4x256xf32>
    %47 = vector.broadcast %24 : vector<1x256xf32> to vector<4x256xf32>
    %48 = arith.mulf %46, %47 : vector<4x256xf32>
    %cst_14 = arith.constant 0.000000e+00 : f32
    %49 = vector.broadcast %cst_14 : f32 to vector<4x1xf32>
    %50 = vector.extract_strided_slice %35 {offsets = [0, 0], sizes = [4, 255], strides = [1, 1]} : vector<4x256xf32> to vector<4x255xf32>
    %51 = tpu.concatenate %49, %50 in 1 : vector<4x1xf32>, vector<4x255xf32> -> vector<4x256xf32>
    %52 = vector.broadcast %20 : vector<1x256xf32> to vector<4x256xf32>
    %53 = arith.mulf %51, %52 : vector<4x256xf32>
    %cst_15 = arith.constant 0.000000e+00 : f32
    %54 = vector.broadcast %cst_15 : f32 to vector<4x1xf32>
    %55 = vector.extract_strided_slice %35 {offsets = [0, 1], sizes = [4, 255], strides = [1, 1]} : vector<4x256xf32> to vector<4x255xf32>
    %56 = tpu.concatenate %55, %54 in 1 : vector<4x255xf32>, vector<4x1xf32> -> vector<4x256xf32>
    %57 = vector.broadcast %24 : vector<1x256xf32> to vector<4x256xf32>
    %58 = arith.mulf %56, %57 : vector<4x256xf32>
    %cst_16 = arith.constant 0.000000e+00 : f32
    %59 = vector.broadcast %cst_16 : f32 to vector<4x15xf32>
    %60 = vector.extract_strided_slice %35 {offsets = [0, 15], sizes = [4, 241], strides = [1, 1]} : vector<4x256xf32> to vector<4x241xf32>
    %61 = tpu.concatenate %60, %59 in 1 : vector<4x241xf32>, vector<4x15xf32> -> vector<4x256xf32>
    %62 = vector.broadcast %20 : vector<1x256xf32> to vector<4x256xf32>
    %63 = arith.mulf %61, %62 : vector<4x256xf32>
    %cst_17 = arith.constant 0.000000e+00 : f32
    %64 = vector.broadcast %cst_17 : f32 to vector<4x16xf32>
    %65 = vector.extract_strided_slice %35 {offsets = [0, 16], sizes = [4, 240], strides = [1, 1]} : vector<4x256xf32> to vector<4x240xf32>
    %66 = tpu.concatenate %65, %64 in 1 : vector<4x240xf32>, vector<4x16xf32> -> vector<4x256xf32>
    %cst_18 = arith.constant 0.000000e+00 : f32
    %67 = vector.broadcast %cst_18 : f32 to vector<4x17xf32>
    %68 = vector.extract_strided_slice %35 {offsets = [0, 17], sizes = [4, 239], strides = [1, 1]} : vector<4x256xf32> to vector<4x239xf32>
    %69 = tpu.concatenate %68, %67 in 1 : vector<4x239xf32>, vector<4x17xf32> -> vector<4x256xf32>
    %70 = vector.broadcast %24 : vector<1x256xf32> to vector<4x256xf32>
    %71 = arith.mulf %69, %70 : vector<4x256xf32>
    %72 = tpu.concatenate %40, %43, %48, %53, %35, %58, %63, %66, %71 in 0 : vector<4x256xf32>, vector<4x256xf32>, vector<4x256xf32>, vector<4x256xf32>, vector<4x256xf32>, vector<4x256xf32>, vector<4x256xf32>, vector<4x256xf32>, vector<4x256xf32> -> vector<36x256xf32>
    %73 = arith.truncf %72 : vector<36x256xf32> to vector<36x256xbf16>
    %c0_19 = arith.constant 0 : index
    %c0_20 = arith.constant 0 : index
    %74 = vector.load %arg4[%c0_19, %c0_20] : memref<4x36xbf16, #tpu.memory_space<vmem>>, vector<4x36xbf16>
    %cst_21 = arith.constant dense<0.000000e+00> : vector<4x256xf32>
    %75 = tpu.matmul %74, %73, %cst_21 {dimension_numbers = #tpu.dot_dimension_numbers<[1], [0], [0], [1], [0, 0, 1, 1], [], []>} : vector<4x36xbf16>, vector<36x256xbf16>, vector<4x256xf32> -> vector<4x256xf32>
    %c0_22 = arith.constant 0 : index
    %c0_23 = arith.constant 0 : index
    %76 = vector.load %arg5[%c0_22, %c0_23] : memref<4x1xf32, #tpu.memory_space<vmem>>, vector<4x1xf32>
    %77 = vector.broadcast %76 : vector<4x1xf32> to vector<4x256xf32>
    %78 = arith.addf %75, %77 : vector<4x256xf32>
    %cst_24 = arith.constant 0.000000e+00 : f32
    %79 = vector.broadcast %cst_24 : f32 to vector<4x256xf32>
    %80 = arith.maximumf %78, %79 : vector<4x256xf32>
    %81 = vector.extract_strided_slice %34 {offsets = [4, 0], sizes = [2, 256], strides = [1, 1]} : vector<6x256xf32> to vector<2x256xf32>
    %cst_25 = arith.constant 0.000000e+00 : f32
    %82 = vector.broadcast %cst_25 : f32 to vector<2x17xf32>
    %83 = vector.extract_strided_slice %81 {offsets = [0, 0], sizes = [2, 239], strides = [1, 1]} : vector<2x256xf32> to vector<2x239xf32>
    %84 = tpu.concatenate %82, %83 in 1 : vector<2x17xf32>, vector<2x239xf32> -> vector<2x256xf32>
    %85 = vector.broadcast %20 : vector<1x256xf32> to vector<2x256xf32>
    %86 = arith.mulf %84, %85 : vector<2x256xf32>
    %cst_26 = arith.constant 0.000000e+00 : f32
    %87 = vector.broadcast %cst_26 : f32 to vector<2x16xf32>
    %88 = vector.extract_strided_slice %81 {offsets = [0, 0], sizes = [2, 240], strides = [1, 1]} : vector<2x256xf32> to vector<2x240xf32>
    %89 = tpu.concatenate %87, %88 in 1 : vector<2x16xf32>, vector<2x240xf32> -> vector<2x256xf32>
    %cst_27 = arith.constant 0.000000e+00 : f32
    %90 = vector.broadcast %cst_27 : f32 to vector<2x15xf32>
    %91 = vector.extract_strided_slice %81 {offsets = [0, 0], sizes = [2, 241], strides = [1, 1]} : vector<2x256xf32> to vector<2x241xf32>
    %92 = tpu.concatenate %90, %91 in 1 : vector<2x15xf32>, vector<2x241xf32> -> vector<2x256xf32>
    %93 = vector.broadcast %24 : vector<1x256xf32> to vector<2x256xf32>
    %94 = arith.mulf %92, %93 : vector<2x256xf32>
    %cst_28 = arith.constant 0.000000e+00 : f32
    %95 = vector.broadcast %cst_28 : f32 to vector<2x1xf32>
    %96 = vector.extract_strided_slice %81 {offsets = [0, 0], sizes = [2, 255], strides = [1, 1]} : vector<2x256xf32> to vector<2x255xf32>
    %97 = tpu.concatenate %95, %96 in 1 : vector<2x1xf32>, vector<2x255xf32> -> vector<2x256xf32>
    %98 = vector.broadcast %20 : vector<1x256xf32> to vector<2x256xf32>
    %99 = arith.mulf %97, %98 : vector<2x256xf32>
    %cst_29 = arith.constant 0.000000e+00 : f32
    %100 = vector.broadcast %cst_29 : f32 to vector<2x1xf32>
    %101 = vector.extract_strided_slice %81 {offsets = [0, 1], sizes = [2, 255], strides = [1, 1]} : vector<2x256xf32> to vector<2x255xf32>
    %102 = tpu.concatenate %101, %100 in 1 : vector<2x255xf32>, vector<2x1xf32> -> vector<2x256xf32>
    %103 = vector.broadcast %24 : vector<1x256xf32> to vector<2x256xf32>
    %104 = arith.mulf %102, %103 : vector<2x256xf32>
    %cst_30 = arith.constant 0.000000e+00 : f32
    %105 = vector.broadcast %cst_30 : f32 to vector<2x15xf32>
    %106 = vector.extract_strided_slice %81 {offsets = [0, 15], sizes = [2, 241], strides = [1, 1]} : vector<2x256xf32> to vector<2x241xf32>
    %107 = tpu.concatenate %106, %105 in 1 : vector<2x241xf32>, vector<2x15xf32> -> vector<2x256xf32>
    %108 = vector.broadcast %20 : vector<1x256xf32> to vector<2x256xf32>
    %109 = arith.mulf %107, %108 : vector<2x256xf32>
    %cst_31 = arith.constant 0.000000e+00 : f32
    %110 = vector.broadcast %cst_31 : f32 to vector<2x16xf32>
    %111 = vector.extract_strided_slice %81 {offsets = [0, 16], sizes = [2, 240], strides = [1, 1]} : vector<2x256xf32> to vector<2x240xf32>
    %112 = tpu.concatenate %111, %110 in 1 : vector<2x240xf32>, vector<2x16xf32> -> vector<2x256xf32>
    %cst_32 = arith.constant 0.000000e+00 : f32
    %113 = vector.broadcast %cst_32 : f32 to vector<2x17xf32>
    %114 = vector.extract_strided_slice %81 {offsets = [0, 17], sizes = [2, 239], strides = [1, 1]} : vector<2x256xf32> to vector<2x239xf32>
    %115 = tpu.concatenate %114, %113 in 1 : vector<2x239xf32>, vector<2x17xf32> -> vector<2x256xf32>
    %116 = vector.broadcast %24 : vector<1x256xf32> to vector<2x256xf32>
    %117 = arith.mulf %115, %116 : vector<2x256xf32>
    %118 = tpu.concatenate %86, %89, %94, %99, %81, %104, %109, %112, %117 in 0 : vector<2x256xf32>, vector<2x256xf32>, vector<2x256xf32>, vector<2x256xf32>, vector<2x256xf32>, vector<2x256xf32>, vector<2x256xf32>, vector<2x256xf32>, vector<2x256xf32> -> vector<18x256xf32>
    %119 = arith.truncf %118 : vector<18x256xf32> to vector<18x256xbf16>
    %c0_33 = arith.constant 0 : index
    %c0_34 = arith.constant 0 : index
    %120 = vector.load %arg6[%c0_33, %c0_34] : memref<2x18xbf16, #tpu.memory_space<vmem>>, vector<2x18xbf16>
    %cst_35 = arith.constant dense<0.000000e+00> : vector<2x256xf32>
    %121 = tpu.matmul %120, %119, %cst_35 {dimension_numbers = #tpu.dot_dimension_numbers<[1], [0], [0], [1], [0, 0, 1, 1], [], []>} : vector<2x18xbf16>, vector<18x256xbf16>, vector<2x256xf32> -> vector<2x256xf32>
    %c0_36 = arith.constant 0 : index
    %c0_37 = arith.constant 0 : index
    %122 = vector.load %arg7[%c0_36, %c0_37] : memref<2x1xf32, #tpu.memory_space<vmem>>, vector<2x1xf32>
    %123 = vector.broadcast %122 : vector<2x1xf32> to vector<2x256xf32>
    %124 = arith.addf %121, %123 : vector<2x256xf32>
    %cst_38 = arith.constant 0.000000e+00 : f32
    %125 = vector.broadcast %cst_38 : f32 to vector<2x256xf32>
    %126 = arith.maximumf %124, %125 : vector<2x256xf32>
    %cst_39 = arith.constant 0.000000e+00 : f32
    %127 = vector.broadcast %cst_39 : f32 to vector<2x17xf32>
    %128 = vector.extract_strided_slice %126 {offsets = [0, 0], sizes = [2, 239], strides = [1, 1]} : vector<2x256xf32> to vector<2x239xf32>
    %129 = tpu.concatenate %127, %128 in 1 : vector<2x17xf32>, vector<2x239xf32> -> vector<2x256xf32>
    %130 = vector.broadcast %20 : vector<1x256xf32> to vector<2x256xf32>
    %131 = arith.mulf %129, %130 : vector<2x256xf32>
    %cst_40 = arith.constant 0.000000e+00 : f32
    %132 = vector.broadcast %cst_40 : f32 to vector<2x16xf32>
    %133 = vector.extract_strided_slice %126 {offsets = [0, 0], sizes = [2, 240], strides = [1, 1]} : vector<2x256xf32> to vector<2x240xf32>
    %134 = tpu.concatenate %132, %133 in 1 : vector<2x16xf32>, vector<2x240xf32> -> vector<2x256xf32>
    %cst_41 = arith.constant 0.000000e+00 : f32
    %135 = vector.broadcast %cst_41 : f32 to vector<2x15xf32>
    %136 = vector.extract_strided_slice %126 {offsets = [0, 0], sizes = [2, 241], strides = [1, 1]} : vector<2x256xf32> to vector<2x241xf32>
    %137 = tpu.concatenate %135, %136 in 1 : vector<2x15xf32>, vector<2x241xf32> -> vector<2x256xf32>
    %138 = vector.broadcast %24 : vector<1x256xf32> to vector<2x256xf32>
    %139 = arith.mulf %137, %138 : vector<2x256xf32>
    %cst_42 = arith.constant 0.000000e+00 : f32
    %140 = vector.broadcast %cst_42 : f32 to vector<2x1xf32>
    %141 = vector.extract_strided_slice %126 {offsets = [0, 0], sizes = [2, 255], strides = [1, 1]} : vector<2x256xf32> to vector<2x255xf32>
    %142 = tpu.concatenate %140, %141 in 1 : vector<2x1xf32>, vector<2x255xf32> -> vector<2x256xf32>
    %143 = vector.broadcast %20 : vector<1x256xf32> to vector<2x256xf32>
    %144 = arith.mulf %142, %143 : vector<2x256xf32>
    %cst_43 = arith.constant 0.000000e+00 : f32
    %145 = vector.broadcast %cst_43 : f32 to vector<2x1xf32>
    %146 = vector.extract_strided_slice %126 {offsets = [0, 1], sizes = [2, 255], strides = [1, 1]} : vector<2x256xf32> to vector<2x255xf32>
    %147 = tpu.concatenate %146, %145 in 1 : vector<2x255xf32>, vector<2x1xf32> -> vector<2x256xf32>
    %148 = vector.broadcast %24 : vector<1x256xf32> to vector<2x256xf32>
    %149 = arith.mulf %147, %148 : vector<2x256xf32>
    %cst_44 = arith.constant 0.000000e+00 : f32
    %150 = vector.broadcast %cst_44 : f32 to vector<2x15xf32>
    %151 = vector.extract_strided_slice %126 {offsets = [0, 15], sizes = [2, 241], strides = [1, 1]} : vector<2x256xf32> to vector<2x241xf32>
    %152 = tpu.concatenate %151, %150 in 1 : vector<2x241xf32>, vector<2x15xf32> -> vector<2x256xf32>
    %153 = vector.broadcast %20 : vector<1x256xf32> to vector<2x256xf32>
    %154 = arith.mulf %152, %153 : vector<2x256xf32>
    %cst_45 = arith.constant 0.000000e+00 : f32
    %155 = vector.broadcast %cst_45 : f32 to vector<2x16xf32>
    %156 = vector.extract_strided_slice %126 {offsets = [0, 16], sizes = [2, 240], strides = [1, 1]} : vector<2x256xf32> to vector<2x240xf32>
    %157 = tpu.concatenate %156, %155 in 1 : vector<2x240xf32>, vector<2x16xf32> -> vector<2x256xf32>
    %cst_46 = arith.constant 0.000000e+00 : f32
    %158 = vector.broadcast %cst_46 : f32 to vector<2x17xf32>
    %159 = vector.extract_strided_slice %126 {offsets = [0, 17], sizes = [2, 239], strides = [1, 1]} : vector<2x256xf32> to vector<2x239xf32>
    %160 = tpu.concatenate %159, %158 in 1 : vector<2x239xf32>, vector<2x17xf32> -> vector<2x256xf32>
    %161 = vector.broadcast %24 : vector<1x256xf32> to vector<2x256xf32>
    %162 = arith.mulf %160, %161 : vector<2x256xf32>
    %163 = tpu.concatenate %131, %134, %139, %144, %126, %149, %154, %157, %162 in 0 : vector<2x256xf32>, vector<2x256xf32>, vector<2x256xf32>, vector<2x256xf32>, vector<2x256xf32>, vector<2x256xf32>, vector<2x256xf32>, vector<2x256xf32>, vector<2x256xf32> -> vector<18x256xf32>
    %164 = arith.truncf %163 : vector<18x256xf32> to vector<18x256xbf16>
    %c0_47 = arith.constant 0 : index
    %c0_48 = arith.constant 0 : index
    %165 = vector.load %arg8[%c0_47, %c0_48] : memref<2x18xbf16, #tpu.memory_space<vmem>>, vector<2x18xbf16>
    %cst_49 = arith.constant dense<0.000000e+00> : vector<2x256xf32>
    %166 = tpu.matmul %165, %164, %cst_49 {dimension_numbers = #tpu.dot_dimension_numbers<[1], [0], [0], [1], [0, 0, 1, 1], [], []>} : vector<2x18xbf16>, vector<18x256xbf16>, vector<2x256xf32> -> vector<2x256xf32>
    %c0_50 = arith.constant 0 : index
    %c0_51 = arith.constant 0 : index
    %167 = vector.load %arg9[%c0_50, %c0_51] : memref<2x1xf32, #tpu.memory_space<vmem>>, vector<2x1xf32>
    %168 = vector.broadcast %167 : vector<2x1xf32> to vector<2x256xf32>
    %169 = arith.addf %166, %168 : vector<2x256xf32>
    %cst_52 = arith.constant 0.000000e+00 : f32
    %170 = vector.broadcast %cst_52 : f32 to vector<2x256xf32>
    %171 = arith.maximumf %169, %170 : vector<2x256xf32>
    %172 = tpu.concatenate %80, %171 in 0 : vector<4x256xf32>, vector<2x256xf32> -> vector<6x256xf32>
    %173 = arith.truncf %172 : vector<6x256xf32> to vector<6x256xbf16>
    %c0_53 = arith.constant 0 : index
    %c0_54 = arith.constant 0 : index
    %174 = vector.load %arg10[%c0_53, %c0_54] : memref<16x6xbf16, #tpu.memory_space<vmem>>, vector<16x6xbf16>
    %cst_55 = arith.constant dense<0.000000e+00> : vector<16x256xf32>
    %175 = tpu.matmul %174, %173, %cst_55 {dimension_numbers = #tpu.dot_dimension_numbers<[1], [0], [0], [1], [0, 0, 1, 1], [], []>} : vector<16x6xbf16>, vector<6x256xbf16>, vector<16x256xf32> -> vector<16x256xf32>
    %c0_56 = arith.constant 0 : index
    %c0_57 = arith.constant 0 : index
    %176 = vector.load %arg11[%c0_56, %c0_57] : memref<16x1xf32, #tpu.memory_space<vmem>>, vector<16x1xf32>
    %177 = vector.broadcast %176 : vector<16x1xf32> to vector<16x256xf32>
    %178 = arith.addf %175, %177 : vector<16x256xf32>
    %179 = arith.addf %178, %26 : vector<16x256xf32>
    %cst_58 = arith.constant 0.000000e+00 : f32
    %180 = vector.broadcast %cst_58 : f32 to vector<16x256xf32>
    %181 = arith.maximumf %179, %180 : vector<16x256xf32>
    %c0_59 = arith.constant 0 : index
    %c0_60 = arith.constant 0 : index
    %c0_61 = arith.constant 0 : index
    %182 = vector.load %arg42[%c0_59, %c0_60, %c0_61] : memref<1x16x256xf32, #tpu.memory_space<vmem>>, vector<1x16x256xf32>
    %183 = vector.shape_cast %182 : vector<1x16x256xf32> to vector<16x256xf32>
    %184 = vector.shape_cast %181 : vector<16x256xf32> to vector<1x16x256xf32>
    tpu.vector_store %arg42[%c0_59, %c0_60, %c0_61], %184 {strides = array<i32>} : memref<1x16x256xf32, #tpu.memory_space<vmem>>, vector<1x16x256xf32>,
    %185 = arith.truncf %181 : vector<16x256xf32> to vector<16x256xbf16>
    %c0_62 = arith.constant 0 : index
    %c0_63 = arith.constant 0 : index
    %186 = vector.load %arg12[%c0_62, %c0_63] : memref<6x16xbf16, #tpu.memory_space<vmem>>, vector<6x16xbf16>
    %cst_64 = arith.constant dense<0.000000e+00> : vector<6x256xf32>
    %187 = tpu.matmul %186, %185, %cst_64 {dimension_numbers = #tpu.dot_dimension_numbers<[1], [0], [0], [1], [0, 0, 1, 1], [], []>} : vector<6x16xbf16>, vector<16x256xbf16>, vector<6x256xf32> -> vector<6x256xf32>
    %c0_65 = arith.constant 0 : index
    %c0_66 = arith.constant 0 : index
    %188 = vector.load %arg13[%c0_65, %c0_66] : memref<6x1xf32, #tpu.memory_space<vmem>>, vector<6x1xf32>
    %189 = vector.broadcast %188 : vector<6x1xf32> to vector<6x256xf32>
    %190 = arith.addf %187, %189 : vector<6x256xf32>
    %cst_67 = arith.constant 0.000000e+00 : f32
    %191 = vector.broadcast %cst_67 : f32 to vector<6x256xf32>
    %192 = arith.maximumf %190, %191 : vector<6x256xf32>
    %193 = vector.extract_strided_slice %192 {offsets = [0, 0], sizes = [4, 256], strides = [1, 1]} : vector<6x256xf32> to vector<4x256xf32>
    %cst_68 = arith.constant 0.000000e+00 : f32
    %194 = vector.broadcast %cst_68 : f32 to vector<4x17xf32>
    %195 = vector.extract_strided_slice %193 {offsets = [0, 0], sizes = [4, 239], strides = [1, 1]} : vector<4x256xf32> to vector<4x239xf32>
    %196 = tpu.concatenate %194, %195 in 1 : vector<4x17xf32>, vector<4x239xf32> -> vector<4x256xf32>
    %197 = vector.broadcast %20 : vector<1x256xf32> to vector<4x256xf32>
    %198 = arith.mulf %196, %197 : vector<4x256xf32>
    %cst_69 = arith.constant 0.000000e+00 : f32
    %199 = vector.broadcast %cst_69 : f32 to vector<4x16xf32>
    %200 = vector.extract_strided_slice %193 {offsets = [0, 0], sizes = [4, 240], strides = [1, 1]} : vector<4x256xf32> to vector<4x240xf32>
    %201 = tpu.concatenate %199, %200 in 1 : vector<4x16xf32>, vector<4x240xf32> -> vector<4x256xf32>
    %cst_70 = arith.constant 0.000000e+00 : f32
    %202 = vector.broadcast %cst_70 : f32 to vector<4x15xf32>
    %203 = vector.extract_strided_slice %193 {offsets = [0, 0], sizes = [4, 241], strides = [1, 1]} : vector<4x256xf32> to vector<4x241xf32>
    %204 = tpu.concatenate %202, %203 in 1 : vector<4x15xf32>, vector<4x241xf32> -> vector<4x256xf32>
    %205 = vector.broadcast %24 : vector<1x256xf32> to vector<4x256xf32>
    %206 = arith.mulf %204, %205 : vector<4x256xf32>
    %cst_71 = arith.constant 0.000000e+00 : f32
    %207 = vector.broadcast %cst_71 : f32 to vector<4x1xf32>
    %208 = vector.extract_strided_slice %193 {offsets = [0, 0], sizes = [4, 255], strides = [1, 1]} : vector<4x256xf32> to vector<4x255xf32>
    %209 = tpu.concatenate %207, %208 in 1 : vector<4x1xf32>, vector<4x255xf32> -> vector<4x256xf32>
    %210 = vector.broadcast %20 : vector<1x256xf32> to vector<4x256xf32>
    %211 = arith.mulf %209, %210 : vector<4x256xf32>
    %cst_72 = arith.constant 0.000000e+00 : f32
    %212 = vector.broadcast %cst_72 : f32 to vector<4x1xf32>
    %213 = vector.extract_strided_slice %193 {offsets = [0, 1], sizes = [4, 255], strides = [1, 1]} : vector<4x256xf32> to vector<4x255xf32>
    %214 = tpu.concatenate %213, %212 in 1 : vector<4x255xf32>, vector<4x1xf32> -> vector<4x256xf32>
    %215 = vector.broadcast %24 : vector<1x256xf32> to vector<4x256xf32>
    %216 = arith.mulf %214, %215 : vector<4x256xf32>
    %cst_73 = arith.constant 0.000000e+00 : f32
    %217 = vector.broadcast %cst_73 : f32 to vector<4x15xf32>
    %218 = vector.extract_strided_slice %193 {offsets = [0, 15], sizes = [4, 241], strides = [1, 1]} : vector<4x256xf32> to vector<4x241xf32>
    %219 = tpu.concatenate %218, %217 in 1 : vector<4x241xf32>, vector<4x15xf32> -> vector<4x256xf32>
    %220 = vector.broadcast %20 : vector<1x256xf32> to vector<4x256xf32>
    %221 = arith.mulf %219, %220 : vector<4x256xf32>
    %cst_74 = arith.constant 0.000000e+00 : f32
    %222 = vector.broadcast %cst_74 : f32 to vector<4x16xf32>
    %223 = vector.extract_strided_slice %193 {offsets = [0, 16], sizes = [4, 240], strides = [1, 1]} : vector<4x256xf32> to vector<4x240xf32>
    %224 = tpu.concatenate %223, %222 in 1 : vector<4x240xf32>, vector<4x16xf32> -> vector<4x256xf32>
    %cst_75 = arith.constant 0.000000e+00 : f32
    %225 = vector.broadcast %cst_75 : f32 to vector<4x17xf32>
    %226 = vector.extract_strided_slice %193 {offsets = [0, 17], sizes = [4, 239], strides = [1, 1]} : vector<4x256xf32> to vector<4x239xf32>
    %227 = tpu.concatenate %226, %225 in 1 : vector<4x239xf32>, vector<4x17xf32> -> vector<4x256xf32>
    %228 = vector.broadcast %24 : vector<1x256xf32> to vector<4x256xf32>
    %229 = arith.mulf %227, %228 : vector<4x256xf32>
    %230 = tpu.concatenate %198, %201, %206, %211, %193, %216, %221, %224, %229 in 0 : vector<4x256xf32>, vector<4x256xf32>, vector<4x256xf32>, vector<4x256xf32>, vector<4x256xf32>, vector<4x256xf32>, vector<4x256xf32>, vector<4x256xf32>, vector<4x256xf32> -> vector<36x256xf32>
    %231 = arith.truncf %230 : vector<36x256xf32> to vector<36x256xbf16>
    %c0_76 = arith.constant 0 : index
    %c0_77 = arith.constant 0 : index
    %232 = vector.load %arg14[%c0_76, %c0_77] : memref<4x36xbf16, #tpu.memory_space<vmem>>, vector<4x36xbf16>
    %cst_78 = arith.constant dense<0.000000e+00> : vector<4x256xf32>
    %233 = tpu.matmul %232, %231, %cst_78 {dimension_numbers = #tpu.dot_dimension_numbers<[1], [0], [0], [1], [0, 0, 1, 1], [], []>} : vector<4x36xbf16>, vector<36x256xbf16>, vector<4x256xf32> -> vector<4x256xf32>
    %c0_79 = arith.constant 0 : index
    %c0_80 = arith.constant 0 : index
    %234 = vector.load %arg15[%c0_79, %c0_80] : memref<4x1xf32, #tpu.memory_space<vmem>>, vector<4x1xf32>
    %235 = vector.broadcast %234 : vector<4x1xf32> to vector<4x256xf32>
    %236 = arith.addf %233, %235 : vector<4x256xf32>
    %cst_81 = arith.constant 0.000000e+00 : f32
    %237 = vector.broadcast %cst_81 : f32 to vector<4x256xf32>
    %238 = arith.maximumf %236, %237 : vector<4x256xf32>
    %239 = vector.extract_strided_slice %192 {offsets = [4, 0], sizes = [2, 256], strides = [1, 1]} : vector<6x256xf32> to vector<2x256xf32>
    %cst_82 = arith.constant 0.000000e+00 : f32
    %240 = vector.broadcast %cst_82 : f32 to vector<2x17xf32>
    %241 = vector.extract_strided_slice %239 {offsets = [0, 0], sizes = [2, 239], strides = [1, 1]} : vector<2x256xf32> to vector<2x239xf32>
    %242 = tpu.concatenate %240, %241 in 1 : vector<2x17xf32>, vector<2x239xf32> -> vector<2x256xf32>
    %243 = vector.broadcast %20 : vector<1x256xf32> to vector<2x256xf32>
    %244 = arith.mulf %242, %243 : vector<2x256xf32>
    %cst_83 = arith.constant 0.000000e+00 : f32
    %245 = vector.broadcast %cst_83 : f32 to vector<2x16xf32>
    %246 = vector.extract_strided_slice %239 {offsets = [0, 0], sizes = [2, 240], strides = [1, 1]} : vector<2x256xf32> to vector<2x240xf32>
    %247 = tpu.concatenate %245, %246 in 1 : vector<2x16xf32>, vector<2x240xf32> -> vector<2x256xf32>
    %cst_84 = arith.constant 0.000000e+00 : f32
    %248 = vector.broadcast %cst_84 : f32 to vector<2x15xf32>
    %249 = vector.extract_strided_slice %239 {offsets = [0, 0], sizes = [2, 241], strides = [1, 1]} : vector<2x256xf32> to vector<2x241xf32>
    %250 = tpu.concatenate %248, %249 in 1 : vector<2x15xf32>, vector<2x241xf32> -> vector<2x256xf32>
    %251 = vector.broadcast %24 : vector<1x256xf32> to vector<2x256xf32>
    %252 = arith.mulf %250, %251 : vector<2x256xf32>
    %cst_85 = arith.constant 0.000000e+00 : f32
    %253 = vector.broadcast %cst_85 : f32 to vector<2x1xf32>
    %254 = vector.extract_strided_slice %239 {offsets = [0, 0], sizes = [2, 255], strides = [1, 1]} : vector<2x256xf32> to vector<2x255xf32>
    %255 = tpu.concatenate %253, %254 in 1 : vector<2x1xf32>, vector<2x255xf32> -> vector<2x256xf32>
    %256 = vector.broadcast %20 : vector<1x256xf32> to vector<2x256xf32>
    %257 = arith.mulf %255, %256 : vector<2x256xf32>
    %cst_86 = arith.constant 0.000000e+00 : f32
    %258 = vector.broadcast %cst_86 : f32 to vector<2x1xf32>
    %259 = vector.extract_strided_slice %239 {offsets = [0, 1], sizes = [2, 255], strides = [1, 1]} : vector<2x256xf32> to vector<2x255xf32>
    %260 = tpu.concatenate %259, %258 in 1 : vector<2x255xf32>, vector<2x1xf32> -> vector<2x256xf32>
    %261 = vector.broadcast %24 : vector<1x256xf32> to vector<2x256xf32>
    %262 = arith.mulf %260, %261 : vector<2x256xf32>
    %cst_87 = arith.constant 0.000000e+00 : f32
    %263 = vector.broadcast %cst_87 : f32 to vector<2x15xf32>
    %264 = vector.extract_strided_slice %239 {offsets = [0, 15], sizes = [2, 241], strides = [1, 1]} : vector<2x256xf32> to vector<2x241xf32>
    %265 = tpu.concatenate %264, %263 in 1 : vector<2x241xf32>, vector<2x15xf32> -> vector<2x256xf32>
    %266 = vector.broadcast %20 : vector<1x256xf32> to vector<2x256xf32>
    %267 = arith.mulf %265, %266 : vector<2x256xf32>
    %cst_88 = arith.constant 0.000000e+00 : f32
    %268 = vector.broadcast %cst_88 : f32 to vector<2x16xf32>
    %269 = vector.extract_strided_slice %239 {offsets = [0, 16], sizes = [2, 240], strides = [1, 1]} : vector<2x256xf32> to vector<2x240xf32>
    %270 = tpu.concatenate %269, %268 in 1 : vector<2x240xf32>, vector<2x16xf32> -> vector<2x256xf32>
    %cst_89 = arith.constant 0.000000e+00 : f32
    %271 = vector.broadcast %cst_89 : f32 to vector<2x17xf32>
    %272 = vector.extract_strided_slice %239 {offsets = [0, 17], sizes = [2, 239], strides = [1, 1]} : vector<2x256xf32> to vector<2x239xf32>
    %273 = tpu.concatenate %272, %271 in 1 : vector<2x239xf32>, vector<2x17xf32> -> vector<2x256xf32>
    %274 = vector.broadcast %24 : vector<1x256xf32> to vector<2x256xf32>
    %275 = arith.mulf %273, %274 : vector<2x256xf32>
    %276 = tpu.concatenate %244, %247, %252, %257, %239, %262, %267, %270, %275 in 0 : vector<2x256xf32>, vector<2x256xf32>, vector<2x256xf32>, vector<2x256xf32>, vector<2x256xf32>, vector<2x256xf32>, vector<2x256xf32>, vector<2x256xf32>, vector<2x256xf32> -> vector<18x256xf32>
    %277 = arith.truncf %276 : vector<18x256xf32> to vector<18x256xbf16>
    %c0_90 = arith.constant 0 : index
    %c0_91 = arith.constant 0 : index
    %278 = vector.load %arg16[%c0_90, %c0_91] : memref<2x18xbf16, #tpu.memory_space<vmem>>, vector<2x18xbf16>
    %cst_92 = arith.constant dense<0.000000e+00> : vector<2x256xf32>
    %279 = tpu.matmul %278, %277, %cst_92 {dimension_numbers = #tpu.dot_dimension_numbers<[1], [0], [0], [1], [0, 0, 1, 1], [], []>} : vector<2x18xbf16>, vector<18x256xbf16>, vector<2x256xf32> -> vector<2x256xf32>
    %c0_93 = arith.constant 0 : index
    %c0_94 = arith.constant 0 : index
    %280 = vector.load %arg17[%c0_93, %c0_94] : memref<2x1xf32, #tpu.memory_space<vmem>>, vector<2x1xf32>
    %281 = vector.broadcast %280 : vector<2x1xf32> to vector<2x256xf32>
    %282 = arith.addf %279, %281 : vector<2x256xf32>
    %cst_95 = arith.constant 0.000000e+00 : f32
    %283 = vector.broadcast %cst_95 : f32 to vector<2x256xf32>
    %284 = arith.maximumf %282, %283 : vector<2x256xf32>
    %cst_96 = arith.constant 0.000000e+00 : f32
    %285 = vector.broadcast %cst_96 : f32 to vector<2x17xf32>
    %286 = vector.extract_strided_slice %284 {offsets = [0, 0], sizes = [2, 239], strides = [1, 1]} : vector<2x256xf32> to vector<2x239xf32>
    %287 = tpu.concatenate %285, %286 in 1 : vector<2x17xf32>, vector<2x239xf32> -> vector<2x256xf32>
    %288 = vector.broadcast %20 : vector<1x256xf32> to vector<2x256xf32>
    %289 = arith.mulf %287, %288 : vector<2x256xf32>
    %cst_97 = arith.constant 0.000000e+00 : f32
    %290 = vector.broadcast %cst_97 : f32 to vector<2x16xf32>
    %291 = vector.extract_strided_slice %284 {offsets = [0, 0], sizes = [2, 240], strides = [1, 1]} : vector<2x256xf32> to vector<2x240xf32>
    %292 = tpu.concatenate %290, %291 in 1 : vector<2x16xf32>, vector<2x240xf32> -> vector<2x256xf32>
    %cst_98 = arith.constant 0.000000e+00 : f32
    %293 = vector.broadcast %cst_98 : f32 to vector<2x15xf32>
    %294 = vector.extract_strided_slice %284 {offsets = [0, 0], sizes = [2, 241], strides = [1, 1]} : vector<2x256xf32> to vector<2x241xf32>
    %295 = tpu.concatenate %293, %294 in 1 : vector<2x15xf32>, vector<2x241xf32> -> vector<2x256xf32>
    %296 = vector.broadcast %24 : vector<1x256xf32> to vector<2x256xf32>
    %297 = arith.mulf %295, %296 : vector<2x256xf32>
    %cst_99 = arith.constant 0.000000e+00 : f32
    %298 = vector.broadcast %cst_99 : f32 to vector<2x1xf32>
    %299 = vector.extract_strided_slice %284 {offsets = [0, 0], sizes = [2, 255], strides = [1, 1]} : vector<2x256xf32> to vector<2x255xf32>
    %300 = tpu.concatenate %298, %299 in 1 : vector<2x1xf32>, vector<2x255xf32> -> vector<2x256xf32>
    %301 = vector.broadcast %20 : vector<1x256xf32> to vector<2x256xf32>
    %302 = arith.mulf %300, %301 : vector<2x256xf32>
    %cst_100 = arith.constant 0.000000e+00 : f32
    %303 = vector.broadcast %cst_100 : f32 to vector<2x1xf32>
    %304 = vector.extract_strided_slice %284 {offsets = [0, 1], sizes = [2, 255], strides = [1, 1]} : vector<2x256xf32> to vector<2x255xf32>
    %305 = tpu.concatenate %304, %303 in 1 : vector<2x255xf32>, vector<2x1xf32> -> vector<2x256xf32>
    %306 = vector.broadcast %24 : vector<1x256xf32> to vector<2x256xf32>
    %307 = arith.mulf %305, %306 : vector<2x256xf32>
    %cst_101 = arith.constant 0.000000e+00 : f32
    %308 = vector.broadcast %cst_101 : f32 to vector<2x15xf32>
    %309 = vector.extract_strided_slice %284 {offsets = [0, 15], sizes = [2, 241], strides = [1, 1]} : vector<2x256xf32> to vector<2x241xf32>
    %310 = tpu.concatenate %309, %308 in 1 : vector<2x241xf32>, vector<2x15xf32> -> vector<2x256xf32>
    %311 = vector.broadcast %20 : vector<1x256xf32> to vector<2x256xf32>
    %312 = arith.mulf %310, %311 : vector<2x256xf32>
    %cst_102 = arith.constant 0.000000e+00 : f32
    %313 = vector.broadcast %cst_102 : f32 to vector<2x16xf32>
    %314 = vector.extract_strided_slice %284 {offsets = [0, 16], sizes = [2, 240], strides = [1, 1]} : vector<2x256xf32> to vector<2x240xf32>
    %315 = tpu.concatenate %314, %313 in 1 : vector<2x240xf32>, vector<2x16xf32> -> vector<2x256xf32>
    %cst_103 = arith.constant 0.000000e+00 : f32
    %316 = vector.broadcast %cst_103 : f32 to vector<2x17xf32>
    %317 = vector.extract_strided_slice %284 {offsets = [0, 17], sizes = [2, 239], strides = [1, 1]} : vector<2x256xf32> to vector<2x239xf32>
    %318 = tpu.concatenate %317, %316 in 1 : vector<2x239xf32>, vector<2x17xf32> -> vector<2x256xf32>
    %319 = vector.broadcast %24 : vector<1x256xf32> to vector<2x256xf32>
    %320 = arith.mulf %318, %319 : vector<2x256xf32>
    %321 = tpu.concatenate %289, %292, %297, %302, %284, %307, %312, %315, %320 in 0 : vector<2x256xf32>, vector<2x256xf32>, vector<2x256xf32>, vector<2x256xf32>, vector<2x256xf32>, vector<2x256xf32>, vector<2x256xf32>, vector<2x256xf32>, vector<2x256xf32> -> vector<18x256xf32>
    %322 = arith.truncf %321 : vector<18x256xf32> to vector<18x256xbf16>
    %c0_104 = arith.constant 0 : index
    %c0_105 = arith.constant 0 : index
    %323 = vector.load %arg18[%c0_104, %c0_105] : memref<2x18xbf16, #tpu.memory_space<vmem>>, vector<2x18xbf16>
    %cst_106 = arith.constant dense<0.000000e+00> : vector<2x256xf32>
    %324 = tpu.matmul %323, %322, %cst_106 {dimension_numbers = #tpu.dot_dimension_numbers<[1], [0], [0], [1], [0, 0, 1, 1], [], []>} : vector<2x18xbf16>, vector<18x256xbf16>, vector<2x256xf32> -> vector<2x256xf32>
    %c0_107 = arith.constant 0 : index
    %c0_108 = arith.constant 0 : index
    %325 = vector.load %arg19[%c0_107, %c0_108] : memref<2x1xf32, #tpu.memory_space<vmem>>, vector<2x1xf32>
    %326 = vector.broadcast %325 : vector<2x1xf32> to vector<2x256xf32>
    %327 = arith.addf %324, %326 : vector<2x256xf32>
    %cst_109 = arith.constant 0.000000e+00 : f32
    %328 = vector.broadcast %cst_109 : f32 to vector<2x256xf32>
    %329 = arith.maximumf %327, %328 : vector<2x256xf32>
    %330 = tpu.concatenate %238, %329 in 0 : vector<4x256xf32>, vector<2x256xf32> -> vector<6x256xf32>
    %331 = arith.truncf %330 : vector<6x256xf32> to vector<6x256xbf16>
    %c0_110 = arith.constant 0 : index
    %c0_111 = arith.constant 0 : index
    %332 = vector.load %arg20[%c0_110, %c0_111] : memref<16x6xbf16, #tpu.memory_space<vmem>>, vector<16x6xbf16>
    %cst_112 = arith.constant dense<0.000000e+00> : vector<16x256xf32>
    %333 = tpu.matmul %332, %331, %cst_112 {dimension_numbers = #tpu.dot_dimension_numbers<[1], [0], [0], [1], [0, 0, 1, 1], [], []>} : vector<16x6xbf16>, vector<6x256xbf16>, vector<16x256xf32> -> vector<16x256xf32>
    %c0_113 = arith.constant 0 : index
    %c0_114 = arith.constant 0 : index
    %334 = vector.load %arg21[%c0_113, %c0_114] : memref<16x1xf32, #tpu.memory_space<vmem>>, vector<16x1xf32>
    %335 = vector.broadcast %334 : vector<16x1xf32> to vector<16x256xf32>
    %336 = arith.addf %333, %335 : vector<16x256xf32>
    %337 = arith.addf %336, %181 : vector<16x256xf32>
    %cst_115 = arith.constant 0.000000e+00 : f32
    %338 = vector.broadcast %cst_115 : f32 to vector<16x256xf32>
    %339 = arith.maximumf %337, %338 : vector<16x256xf32>
    %340 = arith.truncf %339 : vector<16x256xf32> to vector<16x256xbf16>
    %c0_116 = arith.constant 0 : index
    %c0_117 = arith.constant 0 : index
    %341 = vector.load %arg22[%c0_116, %c0_117] : memref<6x16xbf16, #tpu.memory_space<vmem>>, vector<6x16xbf16>
    %cst_118 = arith.constant dense<0.000000e+00> : vector<6x256xf32>
    %342 = tpu.matmul %341, %340, %cst_118 {dimension_numbers = #tpu.dot_dimension_numbers<[1], [0], [0], [1], [0, 0, 1, 1], [], []>} : vector<6x16xbf16>, vector<16x256xbf16>, vector<6x256xf32> -> vector<6x256xf32>
    %c0_119 = arith.constant 0 : index
    %c0_120 = arith.constant 0 : index
    %343 = vector.load %arg23[%c0_119, %c0_120] : memref<6x1xf32, #tpu.memory_space<vmem>>, vector<6x1xf32>
    %344 = vector.broadcast %343 : vector<6x1xf32> to vector<6x256xf32>
    %345 = arith.addf %342, %344 : vector<6x256xf32>
    %cst_121 = arith.constant 0.000000e+00 : f32
    %346 = vector.broadcast %cst_121 : f32 to vector<6x256xf32>
    %347 = arith.maximumf %345, %346 : vector<6x256xf32>
    %348 = vector.extract_strided_slice %347 {offsets = [0, 0], sizes = [4, 256], strides = [1, 1]} : vector<6x256xf32> to vector<4x256xf32>
    %cst_122 = arith.constant 0.000000e+00 : f32
    %349 = vector.broadcast %cst_122 : f32 to vector<4x17xf32>
    %350 = vector.extract_strided_slice %348 {offsets = [0, 0], sizes = [4, 239], strides = [1, 1]} : vector<4x256xf32> to vector<4x239xf32>
    %351 = tpu.concatenate %349, %350 in 1 : vector<4x17xf32>, vector<4x239xf32> -> vector<4x256xf32>
    %352 = vector.broadcast %20 : vector<1x256xf32> to vector<4x256xf32>
    %353 = arith.mulf %351, %352 : vector<4x256xf32>
    %cst_123 = arith.constant 0.000000e+00 : f32
    %354 = vector.broadcast %cst_123 : f32 to vector<4x16xf32>
    %355 = vector.extract_strided_slice %348 {offsets = [0, 0], sizes = [4, 240], strides = [1, 1]} : vector<4x256xf32> to vector<4x240xf32>
    %356 = tpu.concatenate %354, %355 in 1 : vector<4x16xf32>, vector<4x240xf32> -> vector<4x256xf32>
    %cst_124 = arith.constant 0.000000e+00 : f32
    %357 = vector.broadcast %cst_124 : f32 to vector<4x15xf32>
    %358 = vector.extract_strided_slice %348 {offsets = [0, 0], sizes = [4, 241], strides = [1, 1]} : vector<4x256xf32> to vector<4x241xf32>
    %359 = tpu.concatenate %357, %358 in 1 : vector<4x15xf32>, vector<4x241xf32> -> vector<4x256xf32>
    %360 = vector.broadcast %24 : vector<1x256xf32> to vector<4x256xf32>
    %361 = arith.mulf %359, %360 : vector<4x256xf32>
    %cst_125 = arith.constant 0.000000e+00 : f32
    %362 = vector.broadcast %cst_125 : f32 to vector<4x1xf32>
    %363 = vector.extract_strided_slice %348 {offsets = [0, 0], sizes = [4, 255], strides = [1, 1]} : vector<4x256xf32> to vector<4x255xf32>
    %364 = tpu.concatenate %362, %363 in 1 : vector<4x1xf32>, vector<4x255xf32> -> vector<4x256xf32>
    %365 = vector.broadcast %20 : vector<1x256xf32> to vector<4x256xf32>
    %366 = arith.mulf %364, %365 : vector<4x256xf32>
    %cst_126 = arith.constant 0.000000e+00 : f32
    %367 = vector.broadcast %cst_126 : f32 to vector<4x1xf32>
    %368 = vector.extract_strided_slice %348 {offsets = [0, 1], sizes = [4, 255], strides = [1, 1]} : vector<4x256xf32> to vector<4x255xf32>
    %369 = tpu.concatenate %368, %367 in 1 : vector<4x255xf32>, vector<4x1xf32> -> vector<4x256xf32>
    %370 = vector.broadcast %24 : vector<1x256xf32> to vector<4x256xf32>
    %371 = arith.mulf %369, %370 : vector<4x256xf32>
    %cst_127 = arith.constant 0.000000e+00 : f32
    %372 = vector.broadcast %cst_127 : f32 to vector<4x15xf32>
    %373 = vector.extract_strided_slice %348 {offsets = [0, 15], sizes = [4, 241], strides = [1, 1]} : vector<4x256xf32> to vector<4x241xf32>
    %374 = tpu.concatenate %373, %372 in 1 : vector<4x241xf32>, vector<4x15xf32> -> vector<4x256xf32>
    %375 = vector.broadcast %20 : vector<1x256xf32> to vector<4x256xf32>
    %376 = arith.mulf %374, %375 : vector<4x256xf32>
    %cst_128 = arith.constant 0.000000e+00 : f32
    %377 = vector.broadcast %cst_128 : f32 to vector<4x16xf32>
    %378 = vector.extract_strided_slice %348 {offsets = [0, 16], sizes = [4, 240], strides = [1, 1]} : vector<4x256xf32> to vector<4x240xf32>
    %379 = tpu.concatenate %378, %377 in 1 : vector<4x240xf32>, vector<4x16xf32> -> vector<4x256xf32>
    %cst_129 = arith.constant 0.000000e+00 : f32
    %380 = vector.broadcast %cst_129 : f32 to vector<4x17xf32>
    %381 = vector.extract_strided_slice %348 {offsets = [0, 17], sizes = [4, 239], strides = [1, 1]} : vector<4x256xf32> to vector<4x239xf32>
    %382 = tpu.concatenate %381, %380 in 1 : vector<4x239xf32>, vector<4x17xf32> -> vector<4x256xf32>
    %383 = vector.broadcast %24 : vector<1x256xf32> to vector<4x256xf32>
    %384 = arith.mulf %382, %383 : vector<4x256xf32>
    %385 = tpu.concatenate %353, %356, %361, %366, %348, %371, %376, %379, %384 in 0 : vector<4x256xf32>, vector<4x256xf32>, vector<4x256xf32>, vector<4x256xf32>, vector<4x256xf32>, vector<4x256xf32>, vector<4x256xf32>, vector<4x256xf32>, vector<4x256xf32> -> vector<36x256xf32>
    %386 = arith.truncf %385 : vector<36x256xf32> to vector<36x256xbf16>
    %c0_130 = arith.constant 0 : index
    %c0_131 = arith.constant 0 : index
    %387 = vector.load %arg24[%c0_130, %c0_131] : memref<4x36xbf16, #tpu.memory_space<vmem>>, vector<4x36xbf16>
    %cst_132 = arith.constant dense<0.000000e+00> : vector<4x256xf32>
    %388 = tpu.matmul %387, %386, %cst_132 {dimension_numbers = #tpu.dot_dimension_numbers<[1], [0], [0], [1], [0, 0, 1, 1], [], []>} : vector<4x36xbf16>, vector<36x256xbf16>, vector<4x256xf32> -> vector<4x256xf32>
    %c0_133 = arith.constant 0 : index
    %c0_134 = arith.constant 0 : index
    %389 = vector.load %arg25[%c0_133, %c0_134] : memref<4x1xf32, #tpu.memory_space<vmem>>, vector<4x1xf32>
    %390 = vector.broadcast %389 : vector<4x1xf32> to vector<4x256xf32>
    %391 = arith.addf %388, %390 : vector<4x256xf32>
    %cst_135 = arith.constant 0.000000e+00 : f32
    %392 = vector.broadcast %cst_135 : f32 to vector<4x256xf32>
    %393 = arith.maximumf %391, %392 : vector<4x256xf32>
    %394 = vector.extract_strided_slice %347 {offsets = [4, 0], sizes = [2, 256], strides = [1, 1]} : vector<6x256xf32> to vector<2x256xf32>
    %cst_136 = arith.constant 0.000000e+00 : f32
    %395 = vector.broadcast %cst_136 : f32 to vector<2x17xf32>
    %396 = vector.extract_strided_slice %394 {offsets = [0, 0], sizes = [2, 239], strides = [1, 1]} : vector<2x256xf32> to vector<2x239xf32>
    %397 = tpu.concatenate %395, %396 in 1 : vector<2x17xf32>, vector<2x239xf32> -> vector<2x256xf32>
    %398 = vector.broadcast %20 : vector<1x256xf32> to vector<2x256xf32>
    %399 = arith.mulf %397, %398 : vector<2x256xf32>
    %cst_137 = arith.constant 0.000000e+00 : f32
    %400 = vector.broadcast %cst_137 : f32 to vector<2x16xf32>
    %401 = vector.extract_strided_slice %394 {offsets = [0, 0], sizes = [2, 240], strides = [1, 1]} : vector<2x256xf32> to vector<2x240xf32>
    %402 = tpu.concatenate %400, %401 in 1 : vector<2x16xf32>, vector<2x240xf32> -> vector<2x256xf32>
    %cst_138 = arith.constant 0.000000e+00 : f32
    %403 = vector.broadcast %cst_138 : f32 to vector<2x15xf32>
    %404 = vector.extract_strided_slice %394 {offsets = [0, 0], sizes = [2, 241], strides = [1, 1]} : vector<2x256xf32> to vector<2x241xf32>
    %405 = tpu.concatenate %403, %404 in 1 : vector<2x15xf32>, vector<2x241xf32> -> vector<2x256xf32>
    %406 = vector.broadcast %24 : vector<1x256xf32> to vector<2x256xf32>
    %407 = arith.mulf %405, %406 : vector<2x256xf32>
    %cst_139 = arith.constant 0.000000e+00 : f32
    %408 = vector.broadcast %cst_139 : f32 to vector<2x1xf32>
    %409 = vector.extract_strided_slice %394 {offsets = [0, 0], sizes = [2, 255], strides = [1, 1]} : vector<2x256xf32> to vector<2x255xf32>
    %410 = tpu.concatenate %408, %409 in 1 : vector<2x1xf32>, vector<2x255xf32> -> vector<2x256xf32>
    %411 = vector.broadcast %20 : vector<1x256xf32> to vector<2x256xf32>
    %412 = arith.mulf %410, %411 : vector<2x256xf32>
    %cst_140 = arith.constant 0.000000e+00 : f32
    %413 = vector.broadcast %cst_140 : f32 to vector<2x1xf32>
    %414 = vector.extract_strided_slice %394 {offsets = [0, 1], sizes = [2, 255], strides = [1, 1]} : vector<2x256xf32> to vector<2x255xf32>
    %415 = tpu.concatenate %414, %413 in 1 : vector<2x255xf32>, vector<2x1xf32> -> vector<2x256xf32>
    %416 = vector.broadcast %24 : vector<1x256xf32> to vector<2x256xf32>
    %417 = arith.mulf %415, %416 : vector<2x256xf32>
    %cst_141 = arith.constant 0.000000e+00 : f32
    %418 = vector.broadcast %cst_141 : f32 to vector<2x15xf32>
    %419 = vector.extract_strided_slice %394 {offsets = [0, 15], sizes = [2, 241], strides = [1, 1]} : vector<2x256xf32> to vector<2x241xf32>
    %420 = tpu.concatenate %419, %418 in 1 : vector<2x241xf32>, vector<2x15xf32> -> vector<2x256xf32>
    %421 = vector.broadcast %20 : vector<1x256xf32> to vector<2x256xf32>
    %422 = arith.mulf %420, %421 : vector<2x256xf32>
    %cst_142 = arith.constant 0.000000e+00 : f32
    %423 = vector.broadcast %cst_142 : f32 to vector<2x16xf32>
    %424 = vector.extract_strided_slice %394 {offsets = [0, 16], sizes = [2, 240], strides = [1, 1]} : vector<2x256xf32> to vector<2x240xf32>
    %425 = tpu.concatenate %424, %423 in 1 : vector<2x240xf32>, vector<2x16xf32> -> vector<2x256xf32>
    %cst_143 = arith.constant 0.000000e+00 : f32
    %426 = vector.broadcast %cst_143 : f32 to vector<2x17xf32>
    %427 = vector.extract_strided_slice %394 {offsets = [0, 17], sizes = [2, 239], strides = [1, 1]} : vector<2x256xf32> to vector<2x239xf32>
    %428 = tpu.concatenate %427, %426 in 1 : vector<2x239xf32>, vector<2x17xf32> -> vector<2x256xf32>
    %429 = vector.broadcast %24 : vector<1x256xf32> to vector<2x256xf32>
    %430 = arith.mulf %428, %429 : vector<2x256xf32>
    %431 = tpu.concatenate %399, %402, %407, %412, %394, %417, %422, %425, %430 in 0 : vector<2x256xf32>, vector<2x256xf32>, vector<2x256xf32>, vector<2x256xf32>, vector<2x256xf32>, vector<2x256xf32>, vector<2x256xf32>, vector<2x256xf32>, vector<2x256xf32> -> vector<18x256xf32>
    %432 = arith.truncf %431 : vector<18x256xf32> to vector<18x256xbf16>
    %c0_144 = arith.constant 0 : index
    %c0_145 = arith.constant 0 : index
    %433 = vector.load %arg26[%c0_144, %c0_145] : memref<2x18xbf16, #tpu.memory_space<vmem>>, vector<2x18xbf16>
    %cst_146 = arith.constant dense<0.000000e+00> : vector<2x256xf32>
    %434 = tpu.matmul %433, %432, %cst_146 {dimension_numbers = #tpu.dot_dimension_numbers<[1], [0], [0], [1], [0, 0, 1, 1], [], []>} : vector<2x18xbf16>, vector<18x256xbf16>, vector<2x256xf32> -> vector<2x256xf32>
    %c0_147 = arith.constant 0 : index
    %c0_148 = arith.constant 0 : index
    %435 = vector.load %arg27[%c0_147, %c0_148] : memref<2x1xf32, #tpu.memory_space<vmem>>, vector<2x1xf32>
    %436 = vector.broadcast %435 : vector<2x1xf32> to vector<2x256xf32>
    %437 = arith.addf %434, %436 : vector<2x256xf32>
    %cst_149 = arith.constant 0.000000e+00 : f32
    %438 = vector.broadcast %cst_149 : f32 to vector<2x256xf32>
    %439 = arith.maximumf %437, %438 : vector<2x256xf32>
    %cst_150 = arith.constant 0.000000e+00 : f32
    %440 = vector.broadcast %cst_150 : f32 to vector<2x17xf32>
    %441 = vector.extract_strided_slice %439 {offsets = [0, 0], sizes = [2, 239], strides = [1, 1]} : vector<2x256xf32> to vector<2x239xf32>
    %442 = tpu.concatenate %440, %441 in 1 : vector<2x17xf32>, vector<2x239xf32> -> vector<2x256xf32>
    %443 = vector.broadcast %20 : vector<1x256xf32> to vector<2x256xf32>
    %444 = arith.mulf %442, %443 : vector<2x256xf32>
    %cst_151 = arith.constant 0.000000e+00 : f32
    %445 = vector.broadcast %cst_151 : f32 to vector<2x16xf32>
    %446 = vector.extract_strided_slice %439 {offsets = [0, 0], sizes = [2, 240], strides = [1, 1]} : vector<2x256xf32> to vector<2x240xf32>
    %447 = tpu.concatenate %445, %446 in 1 : vector<2x16xf32>, vector<2x240xf32> -> vector<2x256xf32>
    %cst_152 = arith.constant 0.000000e+00 : f32
    %448 = vector.broadcast %cst_152 : f32 to vector<2x15xf32>
    %449 = vector.extract_strided_slice %439 {offsets = [0, 0], sizes = [2, 241], strides = [1, 1]} : vector<2x256xf32> to vector<2x241xf32>
    %450 = tpu.concatenate %448, %449 in 1 : vector<2x15xf32>, vector<2x241xf32> -> vector<2x256xf32>
    %451 = vector.broadcast %24 : vector<1x256xf32> to vector<2x256xf32>
    %452 = arith.mulf %450, %451 : vector<2x256xf32>
    %cst_153 = arith.constant 0.000000e+00 : f32
    %453 = vector.broadcast %cst_153 : f32 to vector<2x1xf32>
    %454 = vector.extract_strided_slice %439 {offsets = [0, 0], sizes = [2, 255], strides = [1, 1]} : vector<2x256xf32> to vector<2x255xf32>
    %455 = tpu.concatenate %453, %454 in 1 : vector<2x1xf32>, vector<2x255xf32> -> vector<2x256xf32>
    %456 = vector.broadcast %20 : vector<1x256xf32> to vector<2x256xf32>
    %457 = arith.mulf %455, %456 : vector<2x256xf32>
    %cst_154 = arith.constant 0.000000e+00 : f32
    %458 = vector.broadcast %cst_154 : f32 to vector<2x1xf32>
    %459 = vector.extract_strided_slice %439 {offsets = [0, 1], sizes = [2, 255], strides = [1, 1]} : vector<2x256xf32> to vector<2x255xf32>
    %460 = tpu.concatenate %459, %458 in 1 : vector<2x255xf32>, vector<2x1xf32> -> vector<2x256xf32>
    %461 = vector.broadcast %24 : vector<1x256xf32> to vector<2x256xf32>
    %462 = arith.mulf %460, %461 : vector<2x256xf32>
    %cst_155 = arith.constant 0.000000e+00 : f32
    %463 = vector.broadcast %cst_155 : f32 to vector<2x15xf32>
    %464 = vector.extract_strided_slice %439 {offsets = [0, 15], sizes = [2, 241], strides = [1, 1]} : vector<2x256xf32> to vector<2x241xf32>
    %465 = tpu.concatenate %464, %463 in 1 : vector<2x241xf32>, vector<2x15xf32> -> vector<2x256xf32>
    %466 = vector.broadcast %20 : vector<1x256xf32> to vector<2x256xf32>
    %467 = arith.mulf %465, %466 : vector<2x256xf32>
    %cst_156 = arith.constant 0.000000e+00 : f32
    %468 = vector.broadcast %cst_156 : f32 to vector<2x16xf32>
    %469 = vector.extract_strided_slice %439 {offsets = [0, 16], sizes = [2, 240], strides = [1, 1]} : vector<2x256xf32> to vector<2x240xf32>
    %470 = tpu.concatenate %469, %468 in 1 : vector<2x240xf32>, vector<2x16xf32> -> vector<2x256xf32>
    %cst_157 = arith.constant 0.000000e+00 : f32
    %471 = vector.broadcast %cst_157 : f32 to vector<2x17xf32>
    %472 = vector.extract_strided_slice %439 {offsets = [0, 17], sizes = [2, 239], strides = [1, 1]} : vector<2x256xf32> to vector<2x239xf32>
    %473 = tpu.concatenate %472, %471 in 1 : vector<2x239xf32>, vector<2x17xf32> -> vector<2x256xf32>
    %474 = vector.broadcast %24 : vector<1x256xf32> to vector<2x256xf32>
    %475 = arith.mulf %473, %474 : vector<2x256xf32>
    %476 = tpu.concatenate %444, %447, %452, %457, %439, %462, %467, %470, %475 in 0 : vector<2x256xf32>, vector<2x256xf32>, vector<2x256xf32>, vector<2x256xf32>, vector<2x256xf32>, vector<2x256xf32>, vector<2x256xf32>, vector<2x256xf32>, vector<2x256xf32> -> vector<18x256xf32>
    %477 = arith.truncf %476 : vector<18x256xf32> to vector<18x256xbf16>
    %c0_158 = arith.constant 0 : index
    %c0_159 = arith.constant 0 : index
    %478 = vector.load %arg28[%c0_158, %c0_159] : memref<2x18xbf16, #tpu.memory_space<vmem>>, vector<2x18xbf16>
    %cst_160 = arith.constant dense<0.000000e+00> : vector<2x256xf32>
    %479 = tpu.matmul %478, %477, %cst_160 {dimension_numbers = #tpu.dot_dimension_numbers<[1], [0], [0], [1], [0, 0, 1, 1], [], []>} : vector<2x18xbf16>, vector<18x256xbf16>, vector<2x256xf32> -> vector<2x256xf32>
    %c0_161 = arith.constant 0 : index
    %c0_162 = arith.constant 0 : index
    %480 = vector.load %arg29[%c0_161, %c0_162] : memref<2x1xf32, #tpu.memory_space<vmem>>, vector<2x1xf32>
    %481 = vector.broadcast %480 : vector<2x1xf32> to vector<2x256xf32>
    %482 = arith.addf %479, %481 : vector<2x256xf32>
    %cst_163 = arith.constant 0.000000e+00 : f32
    %483 = vector.broadcast %cst_163 : f32 to vector<2x256xf32>
    %484 = arith.maximumf %482, %483 : vector<2x256xf32>
    %485 = tpu.concatenate %393, %484 in 0 : vector<4x256xf32>, vector<2x256xf32> -> vector<6x256xf32>
    %486 = arith.truncf %485 : vector<6x256xf32> to vector<6x256xbf16>
    %c0_164 = arith.constant 0 : index
    %c0_165 = arith.constant 0 : index
    %487 = vector.load %arg30[%c0_164, %c0_165] : memref<16x6xbf16, #tpu.memory_space<vmem>>, vector<16x6xbf16>
    %cst_166 = arith.constant dense<0.000000e+00> : vector<16x256xf32>
    %488 = tpu.matmul %487, %486, %cst_166 {dimension_numbers = #tpu.dot_dimension_numbers<[1], [0], [0], [1], [0, 0, 1, 1], [], []>} : vector<16x6xbf16>, vector<6x256xbf16>, vector<16x256xf32> -> vector<16x256xf32>
    %c0_167 = arith.constant 0 : index
    %c0_168 = arith.constant 0 : index
    %489 = vector.load %arg31[%c0_167, %c0_168] : memref<16x1xf32, #tpu.memory_space<vmem>>, vector<16x1xf32>
    %490 = vector.broadcast %489 : vector<16x1xf32> to vector<16x256xf32>
    %491 = arith.addf %488, %490 : vector<16x256xf32>
    %492 = arith.addf %491, %339 : vector<16x256xf32>
    %cst_169 = arith.constant 0.000000e+00 : f32
    %493 = vector.broadcast %cst_169 : f32 to vector<16x256xf32>
    %494 = arith.maximumf %492, %493 : vector<16x256xf32>
    %495 = arith.truncf %494 : vector<16x256xf32> to vector<16x256xbf16>
    %c0_170 = arith.constant 0 : index
    %c0_171 = arith.constant 0 : index
    %496 = vector.load %arg32[%c0_170, %c0_171] : memref<6x16xbf16, #tpu.memory_space<vmem>>, vector<6x16xbf16>
    %cst_172 = arith.constant dense<0.000000e+00> : vector<6x256xf32>
    %497 = tpu.matmul %496, %495, %cst_172 {dimension_numbers = #tpu.dot_dimension_numbers<[1], [0], [0], [1], [0, 0, 1, 1], [], []>} : vector<6x16xbf16>, vector<16x256xbf16>, vector<6x256xf32> -> vector<6x256xf32>
    %c0_173 = arith.constant 0 : index
    %c0_174 = arith.constant 0 : index
    %498 = vector.load %arg33[%c0_173, %c0_174] : memref<6x1xf32, #tpu.memory_space<vmem>>, vector<6x1xf32>
    %499 = vector.broadcast %498 : vector<6x1xf32> to vector<6x256xf32>
    %500 = arith.addf %497, %499 : vector<6x256xf32>
    %cst_175 = arith.constant 0.000000e+00 : f32
    %501 = vector.broadcast %cst_175 : f32 to vector<6x256xf32>
    %502 = arith.maximumf %500, %501 : vector<6x256xf32>
    %503 = vector.extract_strided_slice %502 {offsets = [0, 0], sizes = [4, 256], strides = [1, 1]} : vector<6x256xf32> to vector<4x256xf32>
    %cst_176 = arith.constant 0.000000e+00 : f32
    %504 = vector.broadcast %cst_176 : f32 to vector<4x17xf32>
    %505 = vector.extract_strided_slice %503 {offsets = [0, 0], sizes = [4, 239], strides = [1, 1]} : vector<4x256xf32> to vector<4x239xf32>
    %506 = tpu.concatenate %504, %505 in 1 : vector<4x17xf32>, vector<4x239xf32> -> vector<4x256xf32>
    %507 = vector.broadcast %20 : vector<1x256xf32> to vector<4x256xf32>
    %508 = arith.mulf %506, %507 : vector<4x256xf32>
    %cst_177 = arith.constant 0.000000e+00 : f32
    %509 = vector.broadcast %cst_177 : f32 to vector<4x16xf32>
    %510 = vector.extract_strided_slice %503 {offsets = [0, 0], sizes = [4, 240], strides = [1, 1]} : vector<4x256xf32> to vector<4x240xf32>
    %511 = tpu.concatenate %509, %510 in 1 : vector<4x16xf32>, vector<4x240xf32> -> vector<4x256xf32>
    %cst_178 = arith.constant 0.000000e+00 : f32
    %512 = vector.broadcast %cst_178 : f32 to vector<4x15xf32>
    %513 = vector.extract_strided_slice %503 {offsets = [0, 0], sizes = [4, 241], strides = [1, 1]} : vector<4x256xf32> to vector<4x241xf32>
    %514 = tpu.concatenate %512, %513 in 1 : vector<4x15xf32>, vector<4x241xf32> -> vector<4x256xf32>
    %515 = vector.broadcast %24 : vector<1x256xf32> to vector<4x256xf32>
    %516 = arith.mulf %514, %515 : vector<4x256xf32>
    %cst_179 = arith.constant 0.000000e+00 : f32
    %517 = vector.broadcast %cst_179 : f32 to vector<4x1xf32>
    %518 = vector.extract_strided_slice %503 {offsets = [0, 0], sizes = [4, 255], strides = [1, 1]} : vector<4x256xf32> to vector<4x255xf32>
    %519 = tpu.concatenate %517, %518 in 1 : vector<4x1xf32>, vector<4x255xf32> -> vector<4x256xf32>
    %520 = vector.broadcast %20 : vector<1x256xf32> to vector<4x256xf32>
    %521 = arith.mulf %519, %520 : vector<4x256xf32>
    %cst_180 = arith.constant 0.000000e+00 : f32
    %522 = vector.broadcast %cst_180 : f32 to vector<4x1xf32>
    %523 = vector.extract_strided_slice %503 {offsets = [0, 1], sizes = [4, 255], strides = [1, 1]} : vector<4x256xf32> to vector<4x255xf32>
    %524 = tpu.concatenate %523, %522 in 1 : vector<4x255xf32>, vector<4x1xf32> -> vector<4x256xf32>
    %525 = vector.broadcast %24 : vector<1x256xf32> to vector<4x256xf32>
    %526 = arith.mulf %524, %525 : vector<4x256xf32>
    %cst_181 = arith.constant 0.000000e+00 : f32
    %527 = vector.broadcast %cst_181 : f32 to vector<4x15xf32>
    %528 = vector.extract_strided_slice %503 {offsets = [0, 15], sizes = [4, 241], strides = [1, 1]} : vector<4x256xf32> to vector<4x241xf32>
    %529 = tpu.concatenate %528, %527 in 1 : vector<4x241xf32>, vector<4x15xf32> -> vector<4x256xf32>
    %530 = vector.broadcast %20 : vector<1x256xf32> to vector<4x256xf32>
    %531 = arith.mulf %529, %530 : vector<4x256xf32>
    %cst_182 = arith.constant 0.000000e+00 : f32
    %532 = vector.broadcast %cst_182 : f32 to vector<4x16xf32>
    %533 = vector.extract_strided_slice %503 {offsets = [0, 16], sizes = [4, 240], strides = [1, 1]} : vector<4x256xf32> to vector<4x240xf32>
    %534 = tpu.concatenate %533, %532 in 1 : vector<4x240xf32>, vector<4x16xf32> -> vector<4x256xf32>
    %cst_183 = arith.constant 0.000000e+00 : f32
    %535 = vector.broadcast %cst_183 : f32 to vector<4x17xf32>
    %536 = vector.extract_strided_slice %503 {offsets = [0, 17], sizes = [4, 239], strides = [1, 1]} : vector<4x256xf32> to vector<4x239xf32>
    %537 = tpu.concatenate %536, %535 in 1 : vector<4x239xf32>, vector<4x17xf32> -> vector<4x256xf32>
    %538 = vector.broadcast %24 : vector<1x256xf32> to vector<4x256xf32>
    %539 = arith.mulf %537, %538 : vector<4x256xf32>
    %540 = tpu.concatenate %508, %511, %516, %521, %503, %526, %531, %534, %539 in 0 : vector<4x256xf32>, vector<4x256xf32>, vector<4x256xf32>, vector<4x256xf32>, vector<4x256xf32>, vector<4x256xf32>, vector<4x256xf32>, vector<4x256xf32>, vector<4x256xf32> -> vector<36x256xf32>
    %541 = arith.truncf %540 : vector<36x256xf32> to vector<36x256xbf16>
    %c0_184 = arith.constant 0 : index
    %c0_185 = arith.constant 0 : index
    %542 = vector.load %arg34[%c0_184, %c0_185] : memref<4x36xbf16, #tpu.memory_space<vmem>>, vector<4x36xbf16>
    %cst_186 = arith.constant dense<0.000000e+00> : vector<4x256xf32>
    %543 = tpu.matmul %542, %541, %cst_186 {dimension_numbers = #tpu.dot_dimension_numbers<[1], [0], [0], [1], [0, 0, 1, 1], [], []>} : vector<4x36xbf16>, vector<36x256xbf16>, vector<4x256xf32> -> vector<4x256xf32>
    %c0_187 = arith.constant 0 : index
    %c0_188 = arith.constant 0 : index
    %544 = vector.load %arg35[%c0_187, %c0_188] : memref<4x1xf32, #tpu.memory_space<vmem>>, vector<4x1xf32>
    %545 = vector.broadcast %544 : vector<4x1xf32> to vector<4x256xf32>
    %546 = arith.addf %543, %545 : vector<4x256xf32>
    %cst_189 = arith.constant 0.000000e+00 : f32
    %547 = vector.broadcast %cst_189 : f32 to vector<4x256xf32>
    %548 = arith.maximumf %546, %547 : vector<4x256xf32>
    %549 = vector.extract_strided_slice %502 {offsets = [4, 0], sizes = [2, 256], strides = [1, 1]} : vector<6x256xf32> to vector<2x256xf32>
    %cst_190 = arith.constant 0.000000e+00 : f32
    %550 = vector.broadcast %cst_190 : f32 to vector<2x17xf32>
    %551 = vector.extract_strided_slice %549 {offsets = [0, 0], sizes = [2, 239], strides = [1, 1]} : vector<2x256xf32> to vector<2x239xf32>
    %552 = tpu.concatenate %550, %551 in 1 : vector<2x17xf32>, vector<2x239xf32> -> vector<2x256xf32>
    %553 = vector.broadcast %20 : vector<1x256xf32> to vector<2x256xf32>
    %554 = arith.mulf %552, %553 : vector<2x256xf32>
    %cst_191 = arith.constant 0.000000e+00 : f32
    %555 = vector.broadcast %cst_191 : f32 to vector<2x16xf32>
    %556 = vector.extract_strided_slice %549 {offsets = [0, 0], sizes = [2, 240], strides = [1, 1]} : vector<2x256xf32> to vector<2x240xf32>
    %557 = tpu.concatenate %555, %556 in 1 : vector<2x16xf32>, vector<2x240xf32> -> vector<2x256xf32>
    %cst_192 = arith.constant 0.000000e+00 : f32
    %558 = vector.broadcast %cst_192 : f32 to vector<2x15xf32>
    %559 = vector.extract_strided_slice %549 {offsets = [0, 0], sizes = [2, 241], strides = [1, 1]} : vector<2x256xf32> to vector<2x241xf32>
    %560 = tpu.concatenate %558, %559 in 1 : vector<2x15xf32>, vector<2x241xf32> -> vector<2x256xf32>
    %561 = vector.broadcast %24 : vector<1x256xf32> to vector<2x256xf32>
    %562 = arith.mulf %560, %561 : vector<2x256xf32>
    %cst_193 = arith.constant 0.000000e+00 : f32
    %563 = vector.broadcast %cst_193 : f32 to vector<2x1xf32>
    %564 = vector.extract_strided_slice %549 {offsets = [0, 0], sizes = [2, 255], strides = [1, 1]} : vector<2x256xf32> to vector<2x255xf32>
    %565 = tpu.concatenate %563, %564 in 1 : vector<2x1xf32>, vector<2x255xf32> -> vector<2x256xf32>
    %566 = vector.broadcast %20 : vector<1x256xf32> to vector<2x256xf32>
    %567 = arith.mulf %565, %566 : vector<2x256xf32>
    %cst_194 = arith.constant 0.000000e+00 : f32
    %568 = vector.broadcast %cst_194 : f32 to vector<2x1xf32>
    %569 = vector.extract_strided_slice %549 {offsets = [0, 1], sizes = [2, 255], strides = [1, 1]} : vector<2x256xf32> to vector<2x255xf32>
    %570 = tpu.concatenate %569, %568 in 1 : vector<2x255xf32>, vector<2x1xf32> -> vector<2x256xf32>
    %571 = vector.broadcast %24 : vector<1x256xf32> to vector<2x256xf32>
    %572 = arith.mulf %570, %571 : vector<2x256xf32>
    %cst_195 = arith.constant 0.000000e+00 : f32
    %573 = vector.broadcast %cst_195 : f32 to vector<2x15xf32>
    %574 = vector.extract_strided_slice %549 {offsets = [0, 15], sizes = [2, 241], strides = [1, 1]} : vector<2x256xf32> to vector<2x241xf32>
    %575 = tpu.concatenate %574, %573 in 1 : vector<2x241xf32>, vector<2x15xf32> -> vector<2x256xf32>
    %576 = vector.broadcast %20 : vector<1x256xf32> to vector<2x256xf32>
    %577 = arith.mulf %575, %576 : vector<2x256xf32>
    %cst_196 = arith.constant 0.000000e+00 : f32
    %578 = vector.broadcast %cst_196 : f32 to vector<2x16xf32>
    %579 = vector.extract_strided_slice %549 {offsets = [0, 16], sizes = [2, 240], strides = [1, 1]} : vector<2x256xf32> to vector<2x240xf32>
    %580 = tpu.concatenate %579, %578 in 1 : vector<2x240xf32>, vector<2x16xf32> -> vector<2x256xf32>
    %cst_197 = arith.constant 0.000000e+00 : f32
    %581 = vector.broadcast %cst_197 : f32 to vector<2x17xf32>
    %582 = vector.extract_strided_slice %549 {offsets = [0, 17], sizes = [2, 239], strides = [1, 1]} : vector<2x256xf32> to vector<2x239xf32>
    %583 = tpu.concatenate %582, %581 in 1 : vector<2x239xf32>, vector<2x17xf32> -> vector<2x256xf32>
    %584 = vector.broadcast %24 : vector<1x256xf32> to vector<2x256xf32>
    %585 = arith.mulf %583, %584 : vector<2x256xf32>
    %586 = tpu.concatenate %554, %557, %562, %567, %549, %572, %577, %580, %585 in 0 : vector<2x256xf32>, vector<2x256xf32>, vector<2x256xf32>, vector<2x256xf32>, vector<2x256xf32>, vector<2x256xf32>, vector<2x256xf32>, vector<2x256xf32>, vector<2x256xf32> -> vector<18x256xf32>
    %587 = arith.truncf %586 : vector<18x256xf32> to vector<18x256xbf16>
    %c0_198 = arith.constant 0 : index
    %c0_199 = arith.constant 0 : index
    %588 = vector.load %arg36[%c0_198, %c0_199] : memref<2x18xbf16, #tpu.memory_space<vmem>>, vector<2x18xbf16>
    %cst_200 = arith.constant dense<0.000000e+00> : vector<2x256xf32>
    %589 = tpu.matmul %588, %587, %cst_200 {dimension_numbers = #tpu.dot_dimension_numbers<[1], [0], [0], [1], [0, 0, 1, 1], [], []>} : vector<2x18xbf16>, vector<18x256xbf16>, vector<2x256xf32> -> vector<2x256xf32>
    %c0_201 = arith.constant 0 : index
    %c0_202 = arith.constant 0 : index
    %590 = vector.load %arg37[%c0_201, %c0_202] : memref<2x1xf32, #tpu.memory_space<vmem>>, vector<2x1xf32>
    %591 = vector.broadcast %590 : vector<2x1xf32> to vector<2x256xf32>
    %592 = arith.addf %589, %591 : vector<2x256xf32>
    %cst_203 = arith.constant 0.000000e+00 : f32
    %593 = vector.broadcast %cst_203 : f32 to vector<2x256xf32>
    %594 = arith.maximumf %592, %593 : vector<2x256xf32>
    %cst_204 = arith.constant 0.000000e+00 : f32
    %595 = vector.broadcast %cst_204 : f32 to vector<2x17xf32>
    %596 = vector.extract_strided_slice %594 {offsets = [0, 0], sizes = [2, 239], strides = [1, 1]} : vector<2x256xf32> to vector<2x239xf32>
    %597 = tpu.concatenate %595, %596 in 1 : vector<2x17xf32>, vector<2x239xf32> -> vector<2x256xf32>
    %598 = vector.broadcast %20 : vector<1x256xf32> to vector<2x256xf32>
    %599 = arith.mulf %597, %598 : vector<2x256xf32>
    %cst_205 = arith.constant 0.000000e+00 : f32
    %600 = vector.broadcast %cst_205 : f32 to vector<2x16xf32>
    %601 = vector.extract_strided_slice %594 {offsets = [0, 0], sizes = [2, 240], strides = [1, 1]} : vector<2x256xf32> to vector<2x240xf32>
    %602 = tpu.concatenate %600, %601 in 1 : vector<2x16xf32>, vector<2x240xf32> -> vector<2x256xf32>
    %cst_206 = arith.constant 0.000000e+00 : f32
    %603 = vector.broadcast %cst_206 : f32 to vector<2x15xf32>
    %604 = vector.extract_strided_slice %594 {offsets = [0, 0], sizes = [2, 241], strides = [1, 1]} : vector<2x256xf32> to vector<2x241xf32>
    %605 = tpu.concatenate %603, %604 in 1 : vector<2x15xf32>, vector<2x241xf32> -> vector<2x256xf32>
    %606 = vector.broadcast %24 : vector<1x256xf32> to vector<2x256xf32>
    %607 = arith.mulf %605, %606 : vector<2x256xf32>
    %cst_207 = arith.constant 0.000000e+00 : f32
    %608 = vector.broadcast %cst_207 : f32 to vector<2x1xf32>
    %609 = vector.extract_strided_slice %594 {offsets = [0, 0], sizes = [2, 255], strides = [1, 1]} : vector<2x256xf32> to vector<2x255xf32>
    %610 = tpu.concatenate %608, %609 in 1 : vector<2x1xf32>, vector<2x255xf32> -> vector<2x256xf32>
    %611 = vector.broadcast %20 : vector<1x256xf32> to vector<2x256xf32>
    %612 = arith.mulf %610, %611 : vector<2x256xf32>
    %cst_208 = arith.constant 0.000000e+00 : f32
    %613 = vector.broadcast %cst_208 : f32 to vector<2x1xf32>
    %614 = vector.extract_strided_slice %594 {offsets = [0, 1], sizes = [2, 255], strides = [1, 1]} : vector<2x256xf32> to vector<2x255xf32>
    %615 = tpu.concatenate %614, %613 in 1 : vector<2x255xf32>, vector<2x1xf32> -> vector<2x256xf32>
    %616 = vector.broadcast %24 : vector<1x256xf32> to vector<2x256xf32>
    %617 = arith.mulf %615, %616 : vector<2x256xf32>
    %cst_209 = arith.constant 0.000000e+00 : f32
    %618 = vector.broadcast %cst_209 : f32 to vector<2x15xf32>
    %619 = vector.extract_strided_slice %594 {offsets = [0, 15], sizes = [2, 241], strides = [1, 1]} : vector<2x256xf32> to vector<2x241xf32>
    %620 = tpu.concatenate %619, %618 in 1 : vector<2x241xf32>, vector<2x15xf32> -> vector<2x256xf32>
    %621 = vector.broadcast %20 : vector<1x256xf32> to vector<2x256xf32>
    %622 = arith.mulf %620, %621 : vector<2x256xf32>
    %cst_210 = arith.constant 0.000000e+00 : f32
    %623 = vector.broadcast %cst_210 : f32 to vector<2x16xf32>
    %624 = vector.extract_strided_slice %594 {offsets = [0, 16], sizes = [2, 240], strides = [1, 1]} : vector<2x256xf32> to vector<2x240xf32>
    %625 = tpu.concatenate %624, %623 in 1 : vector<2x240xf32>, vector<2x16xf32> -> vector<2x256xf32>
    %cst_211 = arith.constant 0.000000e+00 : f32
    %626 = vector.broadcast %cst_211 : f32 to vector<2x17xf32>
    %627 = vector.extract_strided_slice %594 {offsets = [0, 17], sizes = [2, 239], strides = [1, 1]} : vector<2x256xf32> to vector<2x239xf32>
    %628 = tpu.concatenate %627, %626 in 1 : vector<2x239xf32>, vector<2x17xf32> -> vector<2x256xf32>
    %629 = vector.broadcast %24 : vector<1x256xf32> to vector<2x256xf32>
    %630 = arith.mulf %628, %629 : vector<2x256xf32>
    %631 = tpu.concatenate %599, %602, %607, %612, %594, %617, %622, %625, %630 in 0 : vector<2x256xf32>, vector<2x256xf32>, vector<2x256xf32>, vector<2x256xf32>, vector<2x256xf32>, vector<2x256xf32>, vector<2x256xf32>, vector<2x256xf32>, vector<2x256xf32> -> vector<18x256xf32>
    %632 = arith.truncf %631 : vector<18x256xf32> to vector<18x256xbf16>
    %c0_212 = arith.constant 0 : index
    %c0_213 = arith.constant 0 : index
    %633 = vector.load %arg38[%c0_212, %c0_213] : memref<2x18xbf16, #tpu.memory_space<vmem>>, vector<2x18xbf16>
    %cst_214 = arith.constant dense<0.000000e+00> : vector<2x256xf32>
    %634 = tpu.matmul %633, %632, %cst_214 {dimension_numbers = #tpu.dot_dimension_numbers<[1], [0], [0], [1], [0, 0, 1, 1], [], []>} : vector<2x18xbf16>, vector<18x256xbf16>, vector<2x256xf32> -> vector<2x256xf32>
    %c0_215 = arith.constant 0 : index
    %c0_216 = arith.constant 0 : index
    %635 = vector.load %arg39[%c0_215, %c0_216] : memref<2x1xf32, #tpu.memory_space<vmem>>, vector<2x1xf32>
    %636 = vector.broadcast %635 : vector<2x1xf32> to vector<2x256xf32>
    %637 = arith.addf %634, %636 : vector<2x256xf32>
    %cst_217 = arith.constant 0.000000e+00 : f32
    %638 = vector.broadcast %cst_217 : f32 to vector<2x256xf32>
    %639 = arith.maximumf %637, %638 : vector<2x256xf32>
    %640 = tpu.concatenate %548, %639 in 0 : vector<4x256xf32>, vector<2x256xf32> -> vector<6x256xf32>
    %641 = arith.truncf %640 : vector<6x256xf32> to vector<6x256xbf16>
    %c0_218 = arith.constant 0 : index
    %c0_219 = arith.constant 0 : index
    %642 = vector.load %arg40[%c0_218, %c0_219] : memref<16x6xbf16, #tpu.memory_space<vmem>>, vector<16x6xbf16>
    %cst_220 = arith.constant dense<0.000000e+00> : vector<16x256xf32>
    %643 = tpu.matmul %642, %641, %cst_220 {dimension_numbers = #tpu.dot_dimension_numbers<[1], [0], [0], [1], [0, 0, 1, 1], [], []>} : vector<16x6xbf16>, vector<6x256xbf16>, vector<16x256xf32> -> vector<16x256xf32>
    %c0_221 = arith.constant 0 : index
    %c0_222 = arith.constant 0 : index
    %644 = vector.load %arg41[%c0_221, %c0_222] : memref<16x1xf32, #tpu.memory_space<vmem>>, vector<16x1xf32>
    %645 = vector.broadcast %644 : vector<16x1xf32> to vector<16x256xf32>
    %646 = arith.addf %643, %645 : vector<16x256xf32>
    %647 = arith.addf %646, %494 : vector<16x256xf32>
    %cst_223 = arith.constant 0.000000e+00 : f32
    %648 = vector.broadcast %cst_223 : f32 to vector<16x256xf32>
    %649 = arith.maximumf %647, %648 : vector<16x256xf32>
    %c0_224 = arith.constant 0 : index
    %c0_225 = arith.constant 0 : index
    %c0_226 = arith.constant 0 : index
    %650 = vector.load %arg43[%c0_224, %c0_225, %c0_226] : memref<1x16x256xf32, #tpu.memory_space<vmem>>, vector<1x16x256xf32>
    %651 = vector.shape_cast %650 : vector<1x16x256xf32> to vector<16x256xf32>
    %652 = vector.shape_cast %649 : vector<16x256xf32> to vector<1x16x256xf32>
    tpu.vector_store %arg43[%c0_224, %c0_225, %c0_226], %652 {strides = array<i32>} : memref<1x16x256xf32, #tpu.memory_space<vmem>>, vector<1x16x256xf32>,
    return
  }
  func.func @transform_0(%arg0: i32) -> (i32, i32, i32) {
    %c0_i32 = arith.constant 0 : i32
    %c0_i32_0 = arith.constant 0 : i32
    %c0_i32_1 = arith.constant 0 : i32
    return %arg0, %c0_i32, %c0_i32_0 : i32, i32, i32
  }
  func.func @transform_1(%arg0: i32) -> (i32, i32) {
    %c0_i32 = arith.constant 0 : i32
    %c0_i32_0 = arith.constant 0 : i32
    %c0_i32_1 = arith.constant 0 : i32
    return %c0_i32, %c0_i32_0 : i32, i32
  }
  func.func @transform_2(%arg0: i32) -> (i32, i32) {
    %c0_i32 = arith.constant 0 : i32
    %c0_i32_0 = arith.constant 0 : i32
    %c0_i32_1 = arith.constant 0 : i32
    return %c0_i32, %c0_i32_0 : i32, i32
  }
  func.func @transform_3(%arg0: i32) -> (i32, i32) {
    %c0_i32 = arith.constant 0 : i32
    %c0_i32_0 = arith.constant 0 : i32
    %c0_i32_1 = arith.constant 0 : i32
    return %c0_i32, %c0_i32_0 : i32, i32
  }
  func.func @transform_4(%arg0: i32) -> (i32, i32) {
    %c0_i32 = arith.constant 0 : i32
    %c0_i32_0 = arith.constant 0 : i32
    %c0_i32_1 = arith.constant 0 : i32
    return %c0_i32, %c0_i32_0 : i32, i32
  }
  func.func @transform_5(%arg0: i32) -> (i32, i32) {
    %c0_i32 = arith.constant 0 : i32
    %c0_i32_0 = arith.constant 0 : i32
    %c0_i32_1 = arith.constant 0 : i32
    return %c0_i32, %c0_i32_0 : i32, i32
  }
  func.func @transform_6(%arg0: i32) -> (i32, i32) {
    %c0_i32 = arith.constant 0 : i32
    %c0_i32_0 = arith.constant 0 : i32
    %c0_i32_1 = arith.constant 0 : i32
    return %c0_i32, %c0_i32_0 : i32, i32
  }
  func.func @transform_7(%arg0: i32) -> (i32, i32) {
    %c0_i32 = arith.constant 0 : i32
    %c0_i32_0 = arith.constant 0 : i32
    %c0_i32_1 = arith.constant 0 : i32
    return %c0_i32, %c0_i32_0 : i32, i32
  }
  func.func @transform_8(%arg0: i32) -> (i32, i32) {
    %c0_i32 = arith.constant 0 : i32
    %c0_i32_0 = arith.constant 0 : i32
    %c0_i32_1 = arith.constant 0 : i32
    return %c0_i32, %c0_i32_0 : i32, i32
  }
  func.func @transform_9(%arg0: i32) -> (i32, i32) {
    %c0_i32 = arith.constant 0 : i32
    %c0_i32_0 = arith.constant 0 : i32
    %c0_i32_1 = arith.constant 0 : i32
    return %c0_i32, %c0_i32_0 : i32, i32
  }
  func.func @transform_10(%arg0: i32) -> (i32, i32) {
    %c0_i32 = arith.constant 0 : i32
    %c0_i32_0 = arith.constant 0 : i32
    %c0_i32_1 = arith.constant 0 : i32
    return %c0_i32, %c0_i32_0 : i32, i32
  }
  func.func @transform_11(%arg0: i32) -> (i32, i32) {
    %c0_i32 = arith.constant 0 : i32
    %c0_i32_0 = arith.constant 0 : i32
    %c0_i32_1 = arith.constant 0 : i32
    return %c0_i32, %c0_i32_0 : i32, i32
  }
  func.func @transform_12(%arg0: i32) -> (i32, i32) {
    %c0_i32 = arith.constant 0 : i32
    %c0_i32_0 = arith.constant 0 : i32
    %c0_i32_1 = arith.constant 0 : i32
    return %c0_i32, %c0_i32_0 : i32, i32
  }
  func.func @transform_13(%arg0: i32) -> (i32, i32) {
    %c0_i32 = arith.constant 0 : i32
    %c0_i32_0 = arith.constant 0 : i32
    %c0_i32_1 = arith.constant 0 : i32
    return %c0_i32, %c0_i32_0 : i32, i32
  }
  func.func @transform_14(%arg0: i32) -> (i32, i32) {
    %c0_i32 = arith.constant 0 : i32
    %c0_i32_0 = arith.constant 0 : i32
    %c0_i32_1 = arith.constant 0 : i32
    return %c0_i32, %c0_i32_0 : i32, i32
  }
  func.func @transform_15(%arg0: i32) -> (i32, i32) {
    %c0_i32 = arith.constant 0 : i32
    %c0_i32_0 = arith.constant 0 : i32
    %c0_i32_1 = arith.constant 0 : i32
    return %c0_i32, %c0_i32_0 : i32, i32
  }
  func.func @transform_16(%arg0: i32) -> (i32, i32) {
    %c0_i32 = arith.constant 0 : i32
    %c0_i32_0 = arith.constant 0 : i32
    %c0_i32_1 = arith.constant 0 : i32
    return %c0_i32, %c0_i32_0 : i32, i32
  }
  func.func @transform_17(%arg0: i32) -> (i32, i32) {
    %c0_i32 = arith.constant 0 : i32
    %c0_i32_0 = arith.constant 0 : i32
    %c0_i32_1 = arith.constant 0 : i32
    return %c0_i32, %c0_i32_0 : i32, i32
  }
  func.func @transform_18(%arg0: i32) -> (i32, i32) {
    %c0_i32 = arith.constant 0 : i32
    %c0_i32_0 = arith.constant 0 : i32
    %c0_i32_1 = arith.constant 0 : i32
    return %c0_i32, %c0_i32_0 : i32, i32
  }
  func.func @transform_19(%arg0: i32) -> (i32, i32) {
    %c0_i32 = arith.constant 0 : i32
    %c0_i32_0 = arith.constant 0 : i32
    %c0_i32_1 = arith.constant 0 : i32
    return %c0_i32, %c0_i32_0 : i32, i32
  }
  func.func @transform_20(%arg0: i32) -> (i32, i32) {
    %c0_i32 = arith.constant 0 : i32
    %c0_i32_0 = arith.constant 0 : i32
    %c0_i32_1 = arith.constant 0 : i32
    return %c0_i32, %c0_i32_0 : i32, i32
  }
  func.func @transform_21(%arg0: i32) -> (i32, i32) {
    %c0_i32 = arith.constant 0 : i32
    %c0_i32_0 = arith.constant 0 : i32
    %c0_i32_1 = arith.constant 0 : i32
    return %c0_i32, %c0_i32_0 : i32, i32
  }
  func.func @transform_22(%arg0: i32) -> (i32, i32) {
    %c0_i32 = arith.constant 0 : i32
    %c0_i32_0 = arith.constant 0 : i32
    %c0_i32_1 = arith.constant 0 : i32
    return %c0_i32, %c0_i32_0 : i32, i32
  }
  func.func @transform_23(%arg0: i32) -> (i32, i32) {
    %c0_i32 = arith.constant 0 : i32
    %c0_i32_0 = arith.constant 0 : i32
    %c0_i32_1 = arith.constant 0 : i32
    return %c0_i32, %c0_i32_0 : i32, i32
  }
  func.func @transform_24(%arg0: i32) -> (i32, i32) {
    %c0_i32 = arith.constant 0 : i32
    %c0_i32_0 = arith.constant 0 : i32
    %c0_i32_1 = arith.constant 0 : i32
    return %c0_i32, %c0_i32_0 : i32, i32
  }
  func.func @transform_25(%arg0: i32) -> (i32, i32) {
    %c0_i32 = arith.constant 0 : i32
    %c0_i32_0 = arith.constant 0 : i32
    %c0_i32_1 = arith.constant 0 : i32
    return %c0_i32, %c0_i32_0 : i32, i32
  }
  func.func @transform_26(%arg0: i32) -> (i32, i32) {
    %c0_i32 = arith.constant 0 : i32
    %c0_i32_0 = arith.constant 0 : i32
    %c0_i32_1 = arith.constant 0 : i32
    return %c0_i32, %c0_i32_0 : i32, i32
  }
  func.func @transform_27(%arg0: i32) -> (i32, i32) {
    %c0_i32 = arith.constant 0 : i32
    %c0_i32_0 = arith.constant 0 : i32
    %c0_i32_1 = arith.constant 0 : i32
    return %c0_i32, %c0_i32_0 : i32, i32
  }
  func.func @transform_28(%arg0: i32) -> (i32, i32) {
    %c0_i32 = arith.constant 0 : i32
    %c0_i32_0 = arith.constant 0 : i32
    %c0_i32_1 = arith.constant 0 : i32
    return %c0_i32, %c0_i32_0 : i32, i32
  }
  func.func @transform_29(%arg0: i32) -> (i32, i32) {
    %c0_i32 = arith.constant 0 : i32
    %c0_i32_0 = arith.constant 0 : i32
    %c0_i32_1 = arith.constant 0 : i32
    return %c0_i32, %c0_i32_0 : i32, i32
  }
  func.func @transform_30(%arg0: i32) -> (i32, i32) {
    %c0_i32 = arith.constant 0 : i32
    %c0_i32_0 = arith.constant 0 : i32
    %c0_i32_1 = arith.constant 0 : i32
    return %c0_i32, %c0_i32_0 : i32, i32
  }
  func.func @transform_31(%arg0: i32) -> (i32, i32) {
    %c0_i32 = arith.constant 0 : i32
    %c0_i32_0 = arith.constant 0 : i32
    %c0_i32_1 = arith.constant 0 : i32
    return %c0_i32, %c0_i32_0 : i32, i32
  }
  func.func @transform_32(%arg0: i32) -> (i32, i32) {
    %c0_i32 = arith.constant 0 : i32
    %c0_i32_0 = arith.constant 0 : i32
    %c0_i32_1 = arith.constant 0 : i32
    return %c0_i32, %c0_i32_0 : i32, i32
  }
  func.func @transform_33(%arg0: i32) -> (i32, i32) {
    %c0_i32 = arith.constant 0 : i32
    %c0_i32_0 = arith.constant 0 : i32
    %c0_i32_1 = arith.constant 0 : i32
    return %c0_i32, %c0_i32_0 : i32, i32
  }
  func.func @transform_34(%arg0: i32) -> (i32, i32) {
    %c0_i32 = arith.constant 0 : i32
    %c0_i32_0 = arith.constant 0 : i32
    %c0_i32_1 = arith.constant 0 : i32
    return %c0_i32, %c0_i32_0 : i32, i32
  }
  func.func @transform_35(%arg0: i32) -> (i32, i32) {
    %c0_i32 = arith.constant 0 : i32
    %c0_i32_0 = arith.constant 0 : i32
    %c0_i32_1 = arith.constant 0 : i32
    return %c0_i32, %c0_i32_0 : i32, i32
  }
  func.func @transform_36(%arg0: i32) -> (i32, i32) {
    %c0_i32 = arith.constant 0 : i32
    %c0_i32_0 = arith.constant 0 : i32
    %c0_i32_1 = arith.constant 0 : i32
    return %c0_i32, %c0_i32_0 : i32, i32
  }
  func.func @transform_37(%arg0: i32) -> (i32, i32) {
    %c0_i32 = arith.constant 0 : i32
    %c0_i32_0 = arith.constant 0 : i32
    %c0_i32_1 = arith.constant 0 : i32
    return %c0_i32, %c0_i32_0 : i32, i32
  }
  func.func @transform_38(%arg0: i32) -> (i32, i32) {
    %c0_i32 = arith.constant 0 : i32
    %c0_i32_0 = arith.constant 0 : i32
    %c0_i32_1 = arith.constant 0 : i32
    return %c0_i32, %c0_i32_0 : i32, i32
  }
  func.func @transform_39(%arg0: i32) -> (i32, i32) {
    %c0_i32 = arith.constant 0 : i32
    %c0_i32_0 = arith.constant 0 : i32
    %c0_i32_1 = arith.constant 0 : i32
    return %c0_i32, %c0_i32_0 : i32, i32
  }
  func.func @transform_40(%arg0: i32) -> (i32, i32) {
    %c0_i32 = arith.constant 0 : i32
    %c0_i32_0 = arith.constant 0 : i32
    %c0_i32_1 = arith.constant 0 : i32
    return %c0_i32, %c0_i32_0 : i32, i32
  }
  func.func @transform_41(%arg0: i32) -> (i32, i32, i32) {
    %c0_i32 = arith.constant 0 : i32
    %c0_i32_0 = arith.constant 0 : i32
    %c0_i32_1 = arith.constant 0 : i32
    return %arg0, %c0_i32, %c0_i32_0 : i32, i32, i32
  }
  func.func @transform_42(%arg0: i32) -> (i32, i32, i32) {
    %c0_i32 = arith.constant 0 : i32
    %c0_i32_0 = arith.constant 0 : i32
    %c0_i32_1 = arith.constant 0 : i32
    return %arg0, %c0_i32, %c0_i32_0 : i32, i32, i32
  }
}

</mosaic_0001>

<bundles_post_ra>
// kernel: attention_block_a.1
= control target key start
LH: loop header
LB: loop body
LE: loop exit
PB: predicated region body
PF: predicated region fallthrough
CT: control target
= control target key end

     0   :  { %s4408_s6 = smov 1   ;;  %s4409_s10 = smov 2   ;;  %s5971_s0 = inlined_call_operand.smem [shape: u32[43], index: -1, kind: input, shape index: {}] }
   0x1   :  { %s4470_s5 = sld [smem:[%s5971_s0]]   ;;  %s4410_s14 = smov 3  }
   0x2   :  { %s4475_s9 = sld [smem:[%s5971_s0 + %s4408_s6]]   ;;  %s4411_s18 = smov 4  }
   0x3   :  { %s4480_s13 = sld [smem:[%s5971_s0 + %s4409_s10]]   ;;  %s4412_s22 = smov 5  }
   0x4   :  { %s4485_s17 = sld [smem:[%s5971_s0 + %s4410_s14]]   ;;  %s4413_s26 = smov 6  }
   0x5   :  { %s4490_s21 = sld [smem:[%s5971_s0 + %s4411_s18]]   ;;  %s4414_s30 = smov 7  }
   0x6   :  { %s4495_s25 = sld [smem:[%s5971_s0 + %s4412_s22]]   ;;  %s4415_s4 = smov 8  }
   0x7   :  { %5994 = sst [smem:[#allocation5_spill]] %s4470_s5  ;;  %s4416_s10 = smov 9  }
   0x8   :  { %5995 = sst [smem:[#allocation6_spill]] %s4475_s9  ;;  %s4417_s15 = smov 10  }
   0x9   :  { %5996 = sst [smem:[#allocation7_spill]] %s4480_s13  ;;  %s4418_s20 = smov 11  }
   0xa   :  { %5997 = sst [smem:[#allocation8_spill]] %s4485_s17  ;;  %s4420_s1 = smov 13  }
   0xb   :  { %5998 = sst [smem:[#allocation9_spill]] %s4490_s21  ;;  %s4421_s7 = smov 14  }
   0xc   :  { %s4500_s29 = sld [smem:[%s5971_s0 + %s4413_s26]]   ;;  %s4419_s26 = smov 12  }
   0xd   :  { %s4505_s3 = sld [smem:[%s5971_s0 + %s4414_s30]]   ;;  %s4423_s22 = smov 16  }
   0xe   :  { %s4510_s8 = sld [smem:[%s5971_s0 + %s4415_s4]]   ;;  %s4424_s28 = smov 17  }
   0xf   :  { %s4515_s14 = sld [smem:[%s5971_s0 + %s4416_s10]]  }
  0x10   :  { %s4520_s19 = sld [smem:[%s5971_s0 + %s4417_s15]]   ;;  %s4422_s15 = smov 15  }
  0x11   :  { %s4525_s24 = sld [smem:[%s5971_s0 + %s4418_s20]]  }
  0x12   :  { %s4530_s30 = sld [smem:[%s5971_s0 + %s4419_s26]]  }
  0x13   :  { %5999 = sst [smem:[#allocation10_spill]] %s4505_s3 }
  0x14   :  { %6000 = sst [smem:[#allocation11_spill]] %s4510_s8 }
  0x15   :  { %6001 = sst [smem:[#allocation12_spill]] %s4515_s14 }
  0x16   :  { %6002 = sst [smem:[#allocation13_spill]] %s4520_s19 }
  0x17   :  { %s4535_s6 = sld [smem:[%s5971_s0 + %s4420_s1]]  }
  0x18   :  { %s4540_s12 = sld [smem:[%s5971_s0 + %s4421_s7]]   ;;  %s4425_s7 = smov 18  }
  0x19   :  { %s4545_s20 = sld [smem:[%s5971_s0 + %s4422_s15]]   ;;  %s4426_s15 = smov 19  }
  0x1a   :  { %s4550_s27 = sld [smem:[%s5971_s0 + %s4423_s22]]   ;;  %s4427_s22 = smov 20  }
  0x1b   :  { %s4555_s4 = sld [smem:[%s5971_s0 + %s4424_s28]]   ;;  %s4428_s28 = smov 21  }
  0x1d   :  { %6003 = sst [smem:[#allocation14_spill]] %s4535_s6 }
  0x1e   :  { %6004 = sst [smem:[#allocation15_spill]] %s4540_s12 }
  0x1f   :  { %6005 = sst [smem:[#allocation16_spill]] %s4545_s20 }
  0x20   :  { %s4560_s12 = sld [smem:[%s5971_s0 + %s4425_s7]]   ;;  %s4429_s7 = smov 22  }
  0x21   :  { %6006 = sst [smem:[#allocation17_spill]] %s4555_s4 }
  0x22   :  { %s4565_s6 = sld [smem:[%s5971_s0 + %s4426_s15]]   ;;  %s4430_s15 = smov 23  }
  0x23   :  { %s4570_s20 = sld [smem:[%s5971_s0 + %s4427_s22]]   ;;  %s4431_s22 = smov 24  }
  0x24   :  { %s4575_s4 = sld [smem:[%s5971_s0 + %s4428_s28]]   ;;  %s4432_s28 = smov 25  }
  0x26   :  { %6007 = sst [smem:[#allocation18_spill]] %s4560_s12 }
  0x27   :  { %s4580_s12 = sld [smem:[%s5971_s0 + %s4429_s7]]   ;;  %s4433_s7 = smov 26  }
  0x28   :  { %6008 = sst [smem:[#allocation19_spill]] %s4565_s6 }
  0x29   :  { %6009 = sst [smem:[#allocation20_spill]] %s4570_s20 }
  0x2a   :  { %6010 = sst [smem:[#allocation21_spill]] %s4575_s4 }
  0x2b   :  { %s4585_s6 = sld [smem:[%s5971_s0 + %s4430_s15]]   ;;  %s4434_s15 = smov 27  }
  0x2c   :  { %s4590_s20 = sld [smem:[%s5971_s0 + %s4431_s22]]   ;;  %s4435_s22 = smov 28  }
  0x2d   :  { %6011 = sst [smem:[#allocation22_spill]] %s4580_s12 }
  0x2e   :  { %s4595_s4 = sld [smem:[%s5971_s0 + %s4432_s28]]   ;;  %s4436_s28 = smov 29  }
  0x2f   :  { %s4600_s12 = sld [smem:[%s5971_s0 + %s4433_s7]]   ;;  %s4437_s7 = smov 30  }
  0x31   :  { %6012 = sst [smem:[#allocation23_spill]] %s4585_s6 }
  0x32   :  { %6013 = sst [smem:[#allocation24_spill]] %s4590_s20 }
  0x33   :  { %s4605_s6 = sld [smem:[%s5971_s0 + %s4434_s15]]   ;;  %s4438_s15 = smov 31  }
  0x34   :  { %6014 = sst [smem:[#allocation25_spill]] %s4595_s4 }
  0x35   :  { %6015 = sst [smem:[#allocation26_spill]] %s4600_s12 }
  0x36   :  { %s4610_s20 = sld [smem:[%s5971_s0 + %s4435_s22]]   ;;  %s4439_s22 = smov 32  }
  0x37   :  { %s4615_s4 = sld [smem:[%s5971_s0 + %s4436_s28]]   ;;  %s4440_s28 = smov 33  }
  0x38   :  { %s4620_s12 = sld [smem:[%s5971_s0 + %s4437_s7]]   ;;  %s4441_s7 = smov 34  }
  0x39   :  { %6016 = sst [smem:[#allocation27_spill]] %s4605_s6 }
  0x3a   :  { %s4625_s6 = sld [smem:[%s5971_s0 + %s4438_s15]]   ;;  %s4442_s15 = smov 35  }
  0x3c   :  { %6017 = sst [smem:[#allocation28_spill]] %s4610_s20 }
  0x3d   :  { %6018 = sst [smem:[#allocation29_spill]] %s4615_s4 }
  0x3e   :  { %6019 = sst [smem:[#allocation30_spill]] %s4620_s12 }
  0x3f   :  { %s4630_s20 = sld [smem:[%s5971_s0 + %s4439_s22]]   ;;  %s4443_s22 = smov 36  }
  0x40   :  { %6020 = sst [smem:[#allocation31_spill]] %s4625_s6 }
  0x41   :  { %s4635_s4 = sld [smem:[%s5971_s0 + %s4440_s28]]   ;;  %s4444_s28 = smov 37  }
  0x42   :  { %s4640_s12 = sld [smem:[%s5971_s0 + %s4441_s7]]   ;;  %s4445_s7 = smov 38  }
  0x43   :  { %s4645_s6 = sld [smem:[%s5971_s0 + %s4442_s15]]   ;;  %s4446_s15 = smov 39  }
  0x45   :  { %6021 = sst [smem:[#allocation32_spill]] %s4630_s20 }
  0x46   :  { %s4650_s20 = sld [smem:[%s5971_s0 + %s4443_s22]]   ;;  %s4447_s22 = smov 40  }
  0x47   :  { %6022 = sst [smem:[#allocation33_spill]] %s4635_s4 }
  0x48   :  { %6023 = sst [smem:[#allocation34_spill]] %s4640_s12 }
  0x49   :  { %6024 = sst [smem:[#allocation35_spill]] %s4645_s6 }
  0x4a   :  { %s4655_s4 = sld [smem:[%s5971_s0 + %s4444_s28]]   ;;  %s4448_s28 = smov 41  }
  0x4b   :  { %s4660_s12 = sld [smem:[%s5971_s0 + %s4445_s7]]   ;;  %s4449_s7 = smov 42  }
  0x4c   :  { %6025 = sst [smem:[#allocation36_spill]] %s4650_s20 }
  0x4d   :  { %s4665_s6 = sld [smem:[%s5971_s0 + %s4446_s15]]  }
  0x4e   :  { %s4670_s20 = sld [smem:[%s5971_s0 + %s4447_s22]]  }
  0x50   :  { %6026 = sst [smem:[#allocation37_spill]] %s4655_s4 }
  0x51   :  { %6027 = sst [smem:[#allocation38_spill]] %s4660_s12 }
  0x52   :  { %s4675_s4 = sld [smem:[%s5971_s0 + %s4448_s28]]  }
  0x53   :  { %s4680_s12 = sld [smem:[%s5971_s0 + %s4449_s7]]  }
  0x54   :  { %91 = vsyncpa [#allocation3], 0 }
  0x55   :  { %93 = vsyncpa [#allocation3 + $0x1], 0  ;;  %s4682_s15 = smov 0   ;;  %s4684_s16 = smov 0  }
  0x56   :  { %s4686_s18 = smov 0   ;;  %s4688_s22 = smov 0  }
  0x57 LB: > { %s6028_s19 = sld [smem:[#allocation13_spill]]  ;;  %s4703_s0 = sadd.s32 4294967295, %s4406_s22   ;;  %s4394_s15 = sphi %s4682_s15, %s6076_s15   ;;  %s4406_s22 = sphi %s4688_s22, %s6079_s22   ;;  %s4402_s18 = sphi %s4686_s18, %s6078_s18   ;;  %s4398_s16 = sphi %s4684_s16, %s6077_s16  }
  0x58   : > { %s4085_s23 = sadd.s32 4294967294, %s4406_s22   ;;  %s4707_s26 = sadd.s32 1, %s4406_s22  }
  0x59   : > { %s972_s28 = sadd.s32 1, %s4402_s18  ;;  %s969_s1 = ssub.s32 %s4406_s22, %s4707_s26 }
  0x5a   : > { %p982_p0 = scmp.ne.s32.totalorder %s4402_s18, %s4398_s16  ;;  %p970_p1 = scmp.eq.s32.totalorder %s969_s1, 0 }
  0x5b   : > { %p983_p2 = scmp.eq.s32.totalorder %s4703_s0, 1  ;;  %p988_p3 = scmp.ne.s32.totalorder %s4398_s16, %s4394_s15 }
  0x5c   : > { %p989_p4 = scmp.eq.s32.totalorder %s4085_s23, 1  ;;  %p4088_p7 = scmp.ge.s32.totalorder %s4406_s22, 1 }
  0x5d   : > { %s4718_s2 = scalar_select %p970_p1, %s4402_s18, %s972_s28  }
  0x5e   : > { %p4720_p5 = por %p983_p2, %p982_p0  ;;  %p4724_p6 = por %p989_p4, %p988_p3 }
  0x5f   : > { %6029 = sst [smem:[#allocation39_spill]] %s4718_s2  ;;  %p1161_p8 = scmp.lt.s32.totalorder %s4406_s22, 3 }
  0x61   : > { %p1162_p9 = pnand %p4088_p7, %p1161_p8 }
  0x62   : > { %s6032_s13 = sld [smem:[#allocation7_spill]] (!%p1162_p9)  ;;  %s6033_s5 = sld [smem:[#allocation5_spill]] (!%p1162_p9)  ;;  %v4450_v0 = vmov (!%p1162_p9), 0   ;;  %vm1331_vm0 = vcmask (!%p1162_p9), 130048   ;;  %v1649_v22 = vld [vmem:[%s4500_s29] sm:$0x3] (!%p1162_p9)  ;;  %v1279_v24 = vlaneseq (!%p1162_p9) }
  0x63   : > { %1165 = sbr.rel (%p1162_p9) target bundleno = 4865 (0x1301), region = 184  ;;  %p1268_p10 = scmp.lt.s32.totalorder (!%p1162_p9), %s4703_s0, 1  ;;  %1367 = vmatprep.mubr.bf16.mxu0 (!%p1162_p9), %v4450_v0  ;;  %4238 = vset.pattern.permute.xlu0 (!%p1162_p9), %v4450_v0  ;;  %vm1424_vm2 = vcmask (!%p1162_p9), 1039360   ;;  %v4459_v33 = vmov (!%p1162_p9), 0.0   ;;  %vm1402_vm4 = vcmask (!%p1162_p9), 121856   ;;  %vm1384_vm6 = vcmask (!%p1162_p9), 138240  }
  0x64   : > { %s6034_s9 = sld [smem:[#allocation6_spill]] (!%p1162_p9)  ;;  %4249 = vset.pattern.permute.xlu1 (!%p1162_p9), %v4450_v0  ;;  %1548 = vmatprep.mubr.bf16.mxu1 (!%p1162_p9), %v4450_v0  ;;  %s5975_s1 = smov (!%p1162_p9), 127   ;;  %v1280_v25 = vand.u32 (!%p1162_p9), 127, %v1279_v24  ;;  %vm1413_vm8 = vcmask (!%p1162_p9), 7168   ;;  %vm1435_vm9 = vcmask (!%p1162_p9), 924672   ;;  %vm1509_vm10 = vcmask (!%p1162_p9), 1041408  }
  0x65   : > { %s5983_s2 = smov (!%p1162_p9), 111   ;;  %vm1483_vm11 = vcmask (!%p1162_p9), 1043456   ;;  %vm1635_vm12 = vcmask (!%p1162_p9), 1045504   ;;  %vm1446_vm13 = vcmask (!%p1162_p9), 916480   ;;  %vm1454_vm14 = vcmask (!%p1162_p9), 908288   ;;  %s6036_s17 = sld [smem:[#allocation8_spill]] (!%p1162_p9) }
  0x66   : > { %v1281_v26 = vadd.s32 (!%p1162_p9), 128, %v1280_v25  ;;  %v1286_v31 = vand.u32 (!%p1162_p9), 15, %v1280_v25  ;;  %vm1659_vm15 = vcmask (!%p1162_p9), 1040384   ;;  %s6037_s8 = sld [smem:[#allocation11_spill]] (!%p1162_p9)  ;;  %s6039_s21 = sld [smem:[#allocation9_spill]] (!%p1162_p9) }
  0x67   : > { %s6041_s3 = sld [smem:[#allocation10_spill]] (!%p1162_p9)  ;;  %s6042_s14 = sld [smem:[#allocation12_spill]] (!%p1162_p9) }
  0x68   : > { %v1325_v1 = vld [vmem:[%s6032_s13] sm:$0x3f] (!%p1162_p9)  ;;  %s5979_s13 = smov (!%p1162_p9), 112   ;;  %v1293_v28 = vand.u32 (!%p1162_p9), 15, %v1281_v26  ;;  %vm1312_vm3 = vcmp.le.s32.totalorder (!%p1162_p9), %v1286_v31, 14  ;;  %vm1306_vm5 = vcmp.ge.s32.totalorder (!%p1162_p9), %v1286_v31, 1 }
  0x69   : > { %1328 = vperm.xlu0 (!%p1162_p9), %4238, %v1325_v1   ;;  %v4820_v39 = vsel (!%p1162_p9), %vm1312_vm3, 1.0, %v4459_v33  ;;  %v4824_v42 = vsel (!%p1162_p9), %vm1306_vm5, 1.0, %v4459_v33  ;;  %vm1505_vm3 = vcmask (!%p1162_p9), 293888   ;;  %vm1927_vm5 = vcmask (!%p1162_p9), 1042432  }
  0x6a   : > { %s4735_s11 = scalar_select %p1268_p10, %s4703_s0, 1  ;;  %v1324_v8 = vld [vmem:[%s6034_s9] sm:$0x7]  ;;  %vm1313_vm1 = vcmp.le.s32.totalorder %v1293_v28, 14  ;;  %vm1307_vm7 = vcmp.ge.s32.totalorder %v1293_v28, 1 }
  0x6b   : > { %s6035_s9 = smov 15   ;;  %v4814_v34 = vsel %vm1313_vm1, 1.0, %v4459_v33  ;;  %v4827_v48 = vsel %vm1307_vm7, 1.0, %v4459_v33  ;;  %vm1655_vm1 = vcmask 146432   ;;  %vm1923_vm7 = vcmask 48128  }
  0x6c   : > { %s5974_s23 = sshll.u32 %s4735_s11, 5 }
  0x6d   : > { %s1272_s28 = scalar_lea.vmem %s6033_s5, %s5974_s23  ;;  %s5988_s23 = smov 113  }
  0x6e   : > { %v4743_v2 = vld [vmem:[%s1272_s28 + $0x8] sm:$0xff]  ;;  %v4745_v3 = vld [vmem:[%s1272_s28 + $0x18] sm:$0xff]  ;;  %v4747_v4 = vld [vmem:[%s1272_s28] sm:$0xff]  ;;  %s5981_s5 = smov 17  }
  0x6f   : > { %v1323_v5 = vpack.c.bf16 %v4745_v3, %v4743_v2  ;;  %v4751_v6 = vld [vmem:[%s1272_s28 + $0x10] sm:$0xff]  ;;  %s5977_s28 = smov 15  }
  0x70   : > { %v1322_v7 = vpack.c.bf16 %v4751_v6, %v4747_v4 }
  0x71   : > { %1335 = vmatprep.subr.bf16.mxu0 %v1323_v5 }
  0x72   : > { %1336 = vmatpush1.bf16.msra.mxu0 %v1322_v7 }
  0x75   : > { %4098 = vmatmul.mubr.msk.bf16.vlgmr.msra.gmra.mrb[0].mxu0 %vm1331_vm0, %v1324_v8 }
  0x76   : > { %1698 = vmatprep.mubr.bf16.mxu0 %v4450_v0 }
  0xe8   : > { %v1329_v9 = vpop.permute.xlu0 %1328 }
 0x148   : > { %v1369_v10 = vpop.f32.mrb[0].mxu0 }
 0x149   : > { %v1370_v11 = vadd.f32 %v1369_v10, %v1329_v9  ;;  %v1371_v12 = vpop.f32.mrb[1].mxu0 }
 0x14a   : > { %v1372_v13 = vadd.f32 %v1371_v12, %v1329_v9  ;;  %v1373_v14 = vpop.f32.mrb[2].mxu0 }
 0x14b   : > { %v4758_v15 = vmax.f32 %v1370_v11, 0.0  ;;  %v1374_v16 = vpop.f32.mrb[3].mxu0 }
 0x14c   : > { %v4760_v17 = vmax.f32 %v1372_v13, 0.0 }
 0x14d   : > { %1420 = vrot.lane.b32.xlu1 %v4758_v15, %s5975_s1  ;;  %v4767_v18 = vrot.slane %v4758_v15, 4 }
 0x14e   : > { %1422 = vrot.lane.b32.xlu0 %v4760_v17, %s5975_s1  ;;  %v4774_v19 = vrot.slane %v4760_v17, 4  ;;  %s5990_s1 = smov 1   ;;  %v4244_v21 = vpack.i.bf16 %v4758_v15, %v4760_v17  ;;  %v4250_v23 = vpack.i.bf16 %v4760_v17, %v4758_v15 }
 0x150   : > { %v4239_v20 = vpack.i.bf16 %v4774_v19, %v4767_v18 }
 0x151   : > { %1578 = vrot.lane.b32.xlu1 %v4767_v18, %s5977_s28  ;;  %s5985_s28 = smov 16  }
 0x152   : > { %1433 = vrot.lane.b32.xlu0 %v4760_v17, %s5988_s23 }
 0x155   : > { %1561 = vrot.lane.b32.xlu1 %v4767_v18, %s5981_s5 }
 0x156   : > { %1588 = vrot.lane.b32.xlu0 %v4767_v18, %s5990_s1 }
 0x159   : > { %4240 = vrot.lane.b32.xlu1 %v4239_v20, %s5985_s28 }
 0x15a   : > { %1580 = vrot.lane.b32.xlu0 %v4774_v19, %s6035_s9 }
 0x15d   : > { %1590 = vrot.lane.b32.xlu1 %v4774_v19, %s5990_s1 }
 0x15e   : > { %1563 = vrot.lane.b32.xlu0 %v4774_v19, %s5981_s5 }
 0x161   : > { %1431 = vrot.lane.b32.xlu1 %v4758_v15, %s5988_s23 }
 0x162   : > { %4245 = vrot.lane.b32.xlu0 %v4244_v21, %s5979_s13  ;;  %s6038_s13 = smov 127  }
 0x165   : > { %1450 = vrot.lane.b32.xlu1 %v4758_v15, %s5983_s2 }
 0x166   : > { %1452 = vrot.lane.b32.xlu0 %v4760_v17, %s5983_s2 }
 0x169   : > { %1652 = vperm.xlu1 %4249, %v1649_v22  }
 0x16a   : > { %1409 = vrot.lane.b32.xlu0 %v4758_v15, %s5990_s1 }
 0x16d   : > { %1411 = vrot.lane.b32.xlu1 %v4760_v17, %s5990_s1 }
 0x16e   : > { %1382 = vrot.lane.b32.xlu0 %v4760_v17, %s5981_s5 }
 0x171   : > { %1380 = vrot.lane.b32.xlu1 %v4758_v15, %s5981_s5 }
 0x172   : > { %1398 = vrot.lane.b32.xlu0 %v4758_v15, %s6035_s9 }
 0x175   : > { %4251 = vrot.lane.b32.xlu1 %v4250_v23, %s5985_s28 }
 0x179   : > { %1400 = vrot.lane.b32.xlu1 %v4760_v17, %s6035_s9 }
 0x1bf   : > { %v1421_v27 = vpop.permute.xlu1 %1420 }
 0x1c0   : > { %v1423_v29 = vpop.permute.xlu0 %1422 }
 0x1c1   : > { %v1428_v35 = vsel %vm1424_vm2, %v1423_v29, 0.0  ;;  %v1425_v40 = vsel %vm1424_vm2, %v1421_v27, %v1423_v29 }
 0x1c2   : > { %v4818_v38 = vmul.f32 %v4814_v34, %v1428_v35  ;;  %v4831_v50 = vmul.f32 %v4820_v39, %v1425_v40 }
 0x1c3   : > { %v1579_v30 = vpop.permute.xlu1 %1578 }
 0x1c4   : > { %v1434_v32 = vpop.permute.xlu0 %1433  ;;  %v1585_v41 = vsel %vm1402_vm4, 0.0, %v1579_v30  ;;  %v1618_v51 = vrot.slane %v4818_v38, 2  ;;  %v1617_v11 = vrot.slane %v4831_v50, 2 }
 0x1c5   : > { %v1586_v52 = vmul.f32 %v4820_v39, %v1585_v41  ;;  %v1439_v59 = vsel %vm1435_vm9, %v1434_v32, 0.0 }
 0x1c6   : > { %v4849_v12 = vmul.f32 %v4827_v48, %v1439_v59  ;;  %v1639_v14 = vsel %vm1509_vm10, %v4774_v19, %v1618_v51  ;;  %v1638_v19 = vsel %vm1509_vm10, %v4767_v18, %v1617_v11 }
 0x1c7   : > { %v1562_v36 = vpop.permute.xlu1 %1561  ;;  %v1605_v7 = vrot.slane %v1586_v52, 4 }
 0x1c8   : > { %v1589_v37 = vpop.permute.xlu0 %1588  ;;  %v1568_v44 = vsel %vm1384_vm6, 0.0, %v1562_v36 }
 0x1c9   : > { %v1569_v54 = vmul.f32 %v4824_v42, %v1568_v44  ;;  %v1595_v55 = vsel %vm1413_vm8, 0.0, %v1589_v37 }
 0x1ca   : > { %v1596_v8 = vmul.f32 %v4824_v42, %v1595_v55 }
 0x1cb   : > { %v4241_v43 = vpop.permute.xlu1 %4240 }
 0x1cc   : > { %v4243_v45 = vunpack.i.h.bf16 %v4241_v43  ;;  %v4242_v46 = vunpack.i.l.bf16 %v4241_v43  ;;  %v1581_v47 = vpop.permute.xlu0 %1580  ;;  %v1611_v28 = vrot.slane %v1596_v8, 2 }
 0x1cd   : > { %v1582_v49 = vsel %vm1402_vm4, %v1579_v30, %v1581_v47 }
 0x1ce   : > { %v1577_v53 = vsel %vm1331_vm0, 0.0, %v4242_v46  ;;  %v1575_v56 = vsel %vm1331_vm0, %v4242_v46, %v4243_v45  ;;  %v1587_v60 = vmul.f32 %v4814_v34, %v1582_v49 }
 0x1cf   : > { %v1599_v57 = vrot.slane %v1577_v53, 6  ;;  %v1591_v58 = vpop.permute.xlu1 %1590  ;;  %v1600_v9 = vrot.slane %v1575_v56, 6 }
 0x1d0   : > { %v1592_v61 = vsel %vm1413_vm8, %v1589_v37, %v1591_v58  ;;  %v1564_v62 = vpop.permute.xlu0 %1563  ;;  %v1606_v16 = vrot.slane %v1587_v60, 4  ;;  %v1641_v37 = vsel %vm1483_vm11, %v1639_v14, %v4849_v12  ;;  %v1648_v58 = vld [vmem:[%s4495_s25] sm:$0x1] }
 0x1d1   : > { %v1631_v63 = vsel %vm1509_vm10, %v1569_v54, %v1599_v57  ;;  %v1597_v1 = vmul.f32 %v4827_v48, %v1592_v61  ;;  %v1565_v5 = vsel %vm1384_vm6, %v1562_v36, %v1564_v62 }
 0x1d2   : > { %v1570_v10 = vmul.f32 %v4827_v48, %v1565_v5  ;;  %v1633_v23 = vsel %vm1483_vm11, %v1631_v63, %v1605_v7 }
 0x1d3   : > { %v1432_v13 = vpop.permute.xlu1 %1431  ;;  %v1612_v24 = vrot.slane %v1597_v1, 2  ;;  %v1636_v40 = vsel %vm1635_vm12, %v1633_v23, %v1611_v28 }
 0x1d4   : > { %v1632_v20 = vsel %vm1509_vm10, %v1570_v10, %v1600_v9  ;;  %v1436_v21 = vsel %vm1435_vm9, %v1432_v13, %v1434_v32  ;;  %v4246_v22 = vpop.permute.xlu0 %4245 }
 0x1d5   : > { %v4857_v25 = vmul.f32 %v4824_v42, %v1436_v21  ;;  %v4248_v26 = vunpack.i.h.bf16 %v4246_v22  ;;  %v4247_v27 = vunpack.i.l.bf16 %v4246_v22  ;;  %v1634_v29 = vsel %vm1483_vm11, %v1632_v20, %v1606_v16 }
 0x1d6   : > { %v1637_v44 = vsel %vm1635_vm12, %v1634_v29, %v1612_v24 }
 0x1d7   : > { %v4863_v30 = vsel %vm1446_vm13, %v4248_v26, %v4247_v27  ;;  %v4866_v31 = vsel %vm1446_vm13, %v4247_v27, 0.0  ;;  %v1451_v32 = vpop.permute.xlu1 %1450  ;;  %v1640_v18 = vsel %vm1483_vm11, %v1638_v19, %v4857_v25 }
 0x1d8   : > { %v1621_v33 = vrot.slane %v4863_v30, 6  ;;  %v1622_v35 = vrot.slane %v4866_v31, 6  ;;  %v1453_v36 = vpop.permute.xlu0 %1452  ;;  %v1480_v23 = vrot.slane %v4866_v31, 4 }
 0x1d9   : > { %v1455_v41 = vsel %vm1454_vm14, %v1451_v32, %v1453_v36  ;;  %v1458_v43 = vsel %vm1454_vm14, %v1453_v36, 0.0  ;;  %v1475_v32 = vrot.slane %v4818_v38, 4 }
 0x1da   : > { %v4879_v45 = vmul.f32 %v4820_v39, %v1455_v41  ;;  %v4882_v46 = vmul.f32 %v4814_v34, %v1458_v43  ;;  %v1643_v47 = vsel %vm1635_vm12, %v1641_v37, %v1622_v35  ;;  %v1642_v49 = vsel %vm1635_vm12, %v1640_v18, %v1621_v33 }
 0x1db   : > { %v1645_v51 = vpack.c.bf16 %v1643_v47, %v1637_v44  ;;  %v1644_v52 = vpack.c.bf16 %v1642_v49, %v1636_v40  ;;  %v1479_v37 = vrot.slane %v4863_v30, 4  ;;  %v1491_v43 = vsel %vm1483_vm11, %v4849_v12, %v1480_v23 }
 0x1dc   : > { %v1628_v53 = vrot.slane %v4882_v46, 4  ;;  %v1627_v54 = vrot.slane %v4879_v45, 4  ;;  %v1410_v59 = vpop.permute.xlu0 %1409  ;;  %v1474_v44 = vrot.slane %v4831_v50, 4  ;;  %v1489_v30 = vsel %vm1483_vm11, %v4760_v17, %v1475_v32 }
 0x1dd   : > { %1666 = vmatprep.subr.bf16.mxu0 %v1645_v51  ;;  %v1417_v7 = vsel %vm1413_vm8, 0.0, %v1410_v59  ;;  %v1495_v51 = vpack.c.bf16 %v1491_v43, %v1489_v30  ;;  %v1497_v50 = vpack.c.bf16 %v4882_v46, %v4882_v46 }
 0x1de   : > { %v1647_v55 = vpack.c.bf16 %v1628_v53, %v1628_v53  ;;  %1667 = vmatpush1.bf16.msra.mxu0 %v1644_v52  ;;  %v1646_v56 = vpack.c.bf16 %v1627_v54, %v1627_v54  ;;  %v1418_v16 = vmul.f32 %v4824_v42, %v1417_v7  ;;  %v1490_v52 = vsel %vm1483_vm11, %v4857_v25, %v1479_v37  ;;  %v1907_v7 = vld [vmem:[%s6028_s19 + $0x8] sm:$0xff] }
 0x1df   : > { %v1488_v12 = vsel %vm1483_vm11, %v4758_v15, %v1474_v44  ;;  %v1496_v54 = vpack.c.bf16 %v4879_v45, %v4879_v45 }
 0x1e0   : > { %4101 = vmatprep.subr.msk.bf16.mxu0 %vm1659_vm15, %v1647_v55  ;;  %v1661_v57 = vsel %vm1659_vm15, %v1646_v56, 0  ;;  %v1383_v62 = vpop.permute.xlu0 %1382  ;;  %v1468_v40 = vrot.slane %v1418_v16, 4  ;;  %v1494_v53 = vpack.c.bf16 %v1490_v52, %v1488_v12  ;;  %v1498_v55 = vld [vmem:[%s6036_s17] sm:$0x3]  ;;  %s6050_s17 = sld [smem:[#allocation20_spill]] }
 0x1e1   : > { %v1511_v17 = vsel %vm1509_vm10, %v1496_v54, 0 }
 0x1e2   : > { %1669 = vmatpush1.bf16.msra.mxu0 %v1661_v57 }
 0x1e4   : > { %v1399_v1 = vpop.permute.xlu0 %1398 }
 0x1e5   : > { %4102 = vmatmul.mubr.msk.bf16.vlgmr.msra.gmra.mrb[4].mxu0 %vm1655_vm1, %v1648_v58  ;;  %v1406_v11 = vsel %vm1402_vm4, 0.0, %v1399_v1 }
 0x1e6   : > { %1883 = vmatprep.mubr.bf16.mxu0 %v4450_v0  ;;  %v1407_v28 = vmul.f32 %v4820_v39, %v1406_v11 }
 0x1e8   : > { %v1653_v60 = vpop.permute.xlu1 %1652  ;;  %v1486_v47 = vsel %vm1483_vm11, %v1407_v28, %v1468_v40 }
 0x1ec   : > { %v1412_v61 = vpop.permute.xlu1 %1411 }
 0x1ed   : > { %v1414_v5 = vsel %vm1413_vm8, %v1410_v59, %v1412_v61  ;;  %v1836_v61 = vld [vmem:[%s6037_s8] sm:$0x3]  ;;  %s6045_s8 = smov 111  }
 0x1ee   : > { %v1419_v13 = vmul.f32 %v4827_v48, %v1414_v5  ;;  %v1992_v5 = vld [vmem:[%s4530_s30] sm:$0x3f] }
 0x1f0   : > { %v1381_v63 = vpop.permute.xlu1 %1380  ;;  %v1469_v33 = vrot.slane %v1419_v13, 4 }
 0x1f1   : > { %v1388_v14 = vsel %vm1384_vm6, 0.0, %v1381_v63  ;;  %v1385_v20 = vsel %vm1384_vm6, %v1381_v63, %v1383_v62  ;;  %v1906_v63 = vld [vmem:[%s6028_s19] sm:$0xff]  ;;  %s6052_s19 = smov 1  }
 0x1f2   : > { %v1389_v29 = vmul.f32 %v4824_v42, %v1388_v14  ;;  %v1390_v35 = vmul.f32 %v4827_v48, %v1385_v20 }
 0x1f4   : > { %v4252_v8 = vpop.permute.xlu1 %4251 }
 0x1f5   : > { %v4254_v9 = vunpack.i.h.bf16 %v4252_v8  ;;  %v4253_v10 = vunpack.i.l.bf16 %v4252_v8 }
 0x1f7   : > { %v1397_v21 = vsel %vm1331_vm0, 0.0, %v4253_v10  ;;  %v1395_v22 = vsel %vm1331_vm0, %v4253_v10, %v4254_v9 }
 0x1f8   : > { %v1462_v24 = vrot.slane %v1397_v21, 4  ;;  %v1401_v26 = vpop.permute.xlu1 %1400  ;;  %v1463_v27 = vrot.slane %v1395_v22, 4 }
 0x1f9   : > { %v1403_v19 = vsel %vm1402_vm4, %v1399_v1, %v1401_v26  ;;  %v1499_v1 = vld [vmem:[%s6039_s21] sm:$0xf]  ;;  %s6053_s21 = sld [smem:[#allocation22_spill]] }
 0x1fa   : > { %v1408_v36 = vmul.f32 %v4814_v34, %v1403_v19  ;;  %v1484_v31 = vsel %vm1483_vm11, %v1389_v29, %v1462_v24  ;;  %v1485_v18 = vsel %vm1483_vm11, %v1390_v35, %v1463_v27 }
 0x1fb   : > { %v1492_v49 = vpack.c.bf16 %v1486_v47, %v1484_v31 }
 0x1fc   : > { %v1487_v41 = vsel %vm1483_vm11, %v1408_v36, %v1469_v33 }
 0x1fd   : > { %v1493_v38 = vpack.c.bf16 %v1487_v41, %v1485_v18 }
 0x1ff   : > { %1516 = vmatprep.subr.bf16.mxu1 %v1493_v38 }
 0x200   : > { %1517 = vmatpush1.bf16.msra.mxu1 %v1492_v49 }
 0x201   : > { %1518 = vmatprep.subr.bf16.mxu1 %v1495_v51 }
 0x204   : > { %1519 = vmatpush1.bf16.msra.mxu1 %v1494_v53 }
 0x205   : > { %4099 = vmatprep.subr.msk.bf16.mxu1 %vm1509_vm10, %v1497_v50 }
 0x208   : > { %1521 = vmatpush1.bf16.msra.mxu1 %v1511_v17 }
 0x20b   : > { %4100 = vmatmul.mubr.msk.bf16.vlgmr.msra.gmra.mrb[0].mxu1 %vm1505_vm3, %v1498_v55 }
 0x20c   : > { %1966 = vmatprep.mubr.bf16.mxu1 %v4450_v0 }
 0x2b8   : > { %v1700_v15 = vpop.f32.mrb[4].mxu0 }
 0x2b9   : > { %v1701_v25 = vadd.f32 %v1700_v15, %v1653_v60  ;;  %v1702_v56 = vpop.f32.mrb[5].mxu0 }
 0x2ba   : > { %v1704_v57 = vpop.f32.mrb[6].mxu0  ;;  %v1703_v58 = vadd.f32 %v1702_v56, %v1653_v60 }
 0x2bb   : > { %v4932_v46 = vmax.f32 %v1701_v25, 0.0  ;;  %v1705_v45 = vpop.f32.mrb[7].mxu0 }
 0x2bc   : > { %v4938_v59 = vmax.f32 %v1703_v58, 0.0 }
 0x2bd   : > { %1711 = vrot.lane.b32.xlu0 %v4932_v46, %s5981_s5  ;;  %1728 = vrot.lane.b32.xlu1 %v4932_v46, %s6035_s9 }
 0x2be   : > { %v4255_v60 = vpack.i.bf16 %v4938_v59, %v4932_v46  ;;  %v4260_v62 = vpack.i.bf16 %v4932_v46, %v4938_v59 }
 0x2c1   : > { %1750 = vrot.lane.b32.xlu0 %v4938_v59, %s6038_s13  ;;  %1748 = vrot.lane.b32.xlu1 %v4932_v46, %s6038_s13 }
 0x2c5   : > { %1730 = vrot.lane.b32.xlu0 %v4938_v59, %s6035_s9  ;;  %1738 = vrot.lane.b32.xlu1 %v4932_v46, %s5990_s1 }
 0x2c9   : > { %1760 = vrot.lane.b32.xlu0 %v4938_v59, %s5988_s23  ;;  %1713 = vrot.lane.b32.xlu1 %v4938_v59, %s5981_s5  ;;  %s6040_s5 = smov 112  }
 0x2cd   : > { %4256 = vrot.lane.b32.xlu0 %v4255_v60, %s5985_s28  ;;  %1758 = vrot.lane.b32.xlu1 %v4932_v46, %s5988_s23 }
 0x2d1   : > { %1740 = vrot.lane.b32.xlu0 %v4938_v59, %s5990_s1  ;;  %1775 = vrot.lane.b32.xlu1 %v4932_v46, %s5983_s2 }
 0x2d5   : > { %4261 = vrot.lane.b32.xlu0 %v4260_v62, %s6040_s5  ;;  %1839 = vperm.xlu1 %4249, %v1836_v61  }
 0x2d9   : > { %1777 = vrot.lane.b32.xlu0 %v4938_v59, %s5983_s2  ;;  %1910 = vperm.xlu1 %4249, %v1906_v63   ;;  %s5987_s2 = sand.u32 1, %s4398_s16  }
 0x2da   : > { %s4089_s28 = sshll.u32 %s5987_s2, 5 }
 0x2db   : > { %s5042_s2 = scalar_lea.vmem [#allocation2], %s4089_s28  ;;  %s6043_s28 = smov 17  }
 0x2dd   : > { %1502 = vperm.xlu0 %4238, %v1499_v1   ;;  %1995 = vperm.xlu1 %4249, %v1992_v5  }
 0x2de   : > { %v4971_v8 = vpop.f32.mrb[0].mxu1 }
 0x2df   : > { %v4973_v9 = vpop.f32.mrb[1].mxu1 }
 0x2e0   : > { %v1554_v10 = vpop.f32.mrb[2].mxu1 }
 0x2e1   : > { %1915 = vperm.xlu0 %4238, %v1907_v7   ;;  %v1555_v11 = vpop.f32.mrb[3].mxu1 }
 0x32f   : > { %v1712_v13 = vpop.permute.xlu0 %1711  ;;  %v1729_v14 = vpop.permute.xlu1 %1728 }
 0x330   : > { %v1735_v26 = vsel %vm1402_vm4, 0.0, %v1729_v14  ;;  %v1718_v37 = vsel %vm1384_vm6, 0.0, %v1712_v13 }
 0x331   : > { %v1736_v40 = vmul.f32 %v4820_v39, %v1735_v26  ;;  %v1719_v12 = vmul.f32 %v4824_v42, %v1718_v37 }
 0x333   : > { %v1751_v16 = vpop.permute.xlu0 %1750  ;;  %v1749_v20 = vpop.permute.xlu1 %1748  ;;  %v1792_v45 = vrot.slane %v1736_v40, 4 }
 0x334   : > { %v1755_v27 = vsel %vm1424_vm2, %v1751_v16, 0.0  ;;  %v1752_v28 = vsel %vm1424_vm2, %v1749_v20, %v1751_v16 }
 0x335   : > { %v1757_v31 = vmul.f32 %v4814_v34, %v1755_v27  ;;  %v1756_v18 = vmul.f32 %v4820_v39, %v1752_v28 }
 0x337   : > { %v1731_v21 = vpop.permute.xlu0 %1730  ;;  %v1739_v22 = vpop.permute.xlu1 %1738  ;;  %v1805_v54 = vrot.slane %v1757_v31, 6  ;;  %v1804_v17 = vrot.slane %v1756_v18, 6 }
 0x338   : > { %v1732_v41 = vsel %vm1402_vm4, %v1729_v14, %v1731_v21  ;;  %v1745_v47 = vsel %vm1413_vm8, 0.0, %v1739_v22 }
 0x339   : > { %v1737_v55 = vmul.f32 %v4814_v34, %v1732_v41  ;;  %v1746_v25 = vmul.f32 %v4824_v42, %v1745_v47  ;;  %v1825_v7 = vsel %vm1509_vm10, %v4932_v46, %v1804_v17  ;;  %v1826_v11 = vsel %vm1509_vm10, %v4938_v59, %v1805_v54 }
 0x33b   : > { %v1761_v23 = vpop.permute.xlu0 %1760  ;;  %v1714_v24 = vpop.permute.xlu1 %1713  ;;  %v1793_v10 = vrot.slane %v1737_v55, 4  ;;  %v1798_v14 = vrot.slane %v1746_v25, 2 }
 0x33c   : > { %v1765_v29 = vsel %vm1435_vm9, %v1761_v23, 0.0  ;;  %v1715_v49 = vsel %vm1384_vm6, %v1712_v13, %v1714_v24 }
 0x33d   : > { %v1767_v43 = vmul.f32 %v4827_v48, %v1765_v29  ;;  %v1720_v57 = vmul.f32 %v4827_v48, %v1715_v49 }
 0x33f   : > { %v4257_v19 = vpop.permute.xlu0 %4256  ;;  %v1759_v32 = vpop.permute.xlu1 %1758  ;;  %v1811_v56 = vrot.slane %v1767_v43, 4  ;;  %v1835_v43 = vld [vmem:[%s6041_s3] sm:$0x1]  ;;  %s6044_s3 = smov 16  }
 0x340   : > { %v4259_v33 = vunpack.i.h.bf16 %v4257_v19  ;;  %v4258_v35 = vunpack.i.l.bf16 %v4257_v19  ;;  %v1762_v36 = vsel %vm1435_vm9, %v1759_v32, %v1761_v23 }
 0x341   : > { %v1766_v51 = vmul.f32 %v4824_v42, %v1762_v36  ;;  %v1828_v21 = vsel %vm1483_vm11, %v1826_v11, %v1811_v56 }
 0x342   : > { %v1725_v44 = vsel %vm1331_vm0, %v4258_v35, %v4259_v33  ;;  %v1727_v38 = vsel %vm1331_vm0, 0.0, %v4258_v35 }
 0x343   : > { %v1786_v30 = vrot.slane %v1727_v38, 6  ;;  %v1741_v52 = vpop.permute.xlu0 %1740  ;;  %v1787_v53 = vrot.slane %v1725_v44, 6  ;;  %v1810_v60 = vrot.slane %v1766_v51, 4  ;;  %v1776_v23 = vpop.permute.xlu1 %1775 }
 0x344   : > { %v1742_v50 = vsel %vm1413_vm8, %v1739_v22, %v1741_v52 }
 0x345   : > { %v1747_v15 = vmul.f32 %v4827_v48, %v1742_v50  ;;  %v1819_v58 = vsel %vm1509_vm10, %v1719_v12, %v1786_v30  ;;  %v1820_v5 = vsel %vm1509_vm10, %v1720_v57, %v1787_v53  ;;  %v1827_v22 = vsel %vm1483_vm11, %v1825_v7, %v1810_v60  ;;  %v4340_v60 = vld [vmem:[%s6042_s14] sm:$0xff]   ;;  %s6048_s14 = sld [smem:[#allocation18_spill]] }
 0x346   : > { %v1821_v13 = vsel %vm1483_vm11, %v1819_v58, %v1792_v45  ;;  %v1822_v46 = vsel %vm1483_vm11, %v1820_v5, %v1793_v10 }
 0x347   : > { %v4262_v61 = vpop.permute.xlu0 %4261  ;;  %v1799_v62 = vrot.slane %v1747_v15, 2  ;;  %v1823_v19 = vsel %vm1635_vm12, %v1821_v13, %v1798_v14 }
 0x348   : > { %v4264_v63 = vunpack.i.h.bf16 %v4262_v61  ;;  %v4263_v1 = vunpack.i.l.bf16 %v4262_v61 }
 0x349   : > { %v1824_v29 = vsel %vm1635_vm12, %v1822_v46, %v1799_v62 }
 0x34a   : > { %v1772_v16 = vsel %vm1446_vm13, %v4264_v63, %v4263_v1  ;;  %v1774_v20 = vsel %vm1446_vm13, %v4263_v1, 0.0 }
 0x34b   : > { %v1815_v24 = vrot.slane %v1772_v16, 2  ;;  %v1816_v26 = vrot.slane %v1774_v20, 2  ;;  %v1778_v27 = vpop.permute.xlu0 %1777 }
 0x34c   : > { %v1779_v28 = vsel %vm1454_vm14, %v1776_v23, %v1778_v27  ;;  %v1782_v59 = vsel %vm1454_vm14, %v1778_v27, 0.0 }
 0x34d   : > { %v1783_v32 = vmul.f32 %v4820_v39, %v1779_v28  ;;  %v1784_v33 = vmul.f32 %v4814_v34, %v1782_v59  ;;  %v1830_v35 = vsel %vm1635_vm12, %v1828_v21, %v1816_v26  ;;  %v1829_v36 = vsel %vm1635_vm12, %v1827_v22, %v1815_v24  ;;  %v1991_v26 = vld [vmem:[%s4525_s24] sm:$0x7] }
 0x34e   : > { %v1832_v37 = vpack.c.bf16 %v1830_v35, %v1824_v29  ;;  %v1831_v40 = vpack.c.bf16 %v1829_v36, %v1823_v19 }
 0x34f   : > { %v1834_v31 = vpack.c.bf16 %v1784_v33, %v1784_v33  ;;  %v1833_v18 = vpack.c.bf16 %v1783_v32, %v1783_v32 }
 0x350   : > { %1851 = vmatprep.subr.bf16.mxu0 %v1832_v37 }
 0x351   : > { %1852 = vmatpush1.bf16.msra.mxu0 %v1831_v40  ;;  %v1846_v41 = vsel %vm1659_vm15, %v1833_v18, 0  ;;  %v2304_v18 = vld [vmem:[%s4550_s27] sm:$0x3] }
 0x352   : > { %4103 = vmatprep.subr.msk.bf16.mxu0 %vm1659_vm15, %v1834_v31 }
 0x354   : > { %v1840_v38 = vpop.permute.xlu1 %1839 }
 0x355   : > { %1854 = vmatpush1.bf16.msra.mxu0 %v1846_v41 }
 0x358   : > { %4104 = vmatmul.mubr.msk.bf16.vlgmr.msra.gmra.mrb[8].mxu0 %vm1655_vm1, %v1835_v43  ;;  %v1911_v61 = vpop.permute.xlu1 %1910 }
 0x359   : > { %2033 = vmatprep.mubr.bf16.mxu0 %v4450_v0 }
 0x35c   : > { %v1503_v44 = vpop.permute.xlu0 %1502  ;;  %v1996_v27 = vpop.permute.xlu1 %1995 }
 0x35d   : > { %v1551_v49 = vadd.f32 %v4971_v8, %v1503_v44  ;;  %v1553_v52 = vadd.f32 %v4973_v9, %v1503_v44 }
 0x35f   : > { %v1557_v55 = vmax.f32 %v1551_v49, 0.0  ;;  %v1558_v25 = vmax.f32 %v1553_v52, 0.0 }
 0x360   : > { %v1916_v5 = vpop.permute.xlu0 %1915 }
 0x42b   : > { %v1885_v47 = vpop.f32.mrb[8].mxu0 }
 0x42c   : > { %v1886_v30 = vadd.f32 %v1885_v47, %v1840_v38  ;;  %v1887_v51 = vpop.f32.mrb[9].mxu0 }
 0x42d   : > { %v1888_v12 = vadd.f32 %v1887_v51, %v1840_v38  ;;  %v1889_v53 = vpop.f32.mrb[10].mxu0 }
 0x42e   : > { %v1892_v50 = vmax.f32 %v1886_v30, 0.0  ;;  %v1890_v54 = vpop.f32.mrb[11].mxu0 }
 0x42f   : > { %v1893_v17 = vmax.f32 %v1888_v12, 0.0 }
 0x430   : > { %v1896_v15 = vrot.slane %v1892_v50, 4 }
 0x431   : > { %v1897_v56 = vrot.slane %v1893_v17, 4 }
 0x432   : > { %v1900_v57 = vsel %vm1483_vm11, %v1557_v55, %v1896_v15 }
 0x433   : > { %v1901_v8 = vsel %vm1483_vm11, %v1558_v25, %v1897_v56  ;;  %v1902_v58 = vpack.c.bf16 %v1900_v57, %v1900_v57 }
 0x434   : > { %v1903_v45 = vpack.c.bf16 %v1901_v8, %v1901_v8 }
 0x435   : > { %v1929_v9 = vsel %vm1927_vm5, %v1902_v58, 0 }
 0x436   : > { %4106 = vmatprep.subr.msk.bf16.mxu1 %vm1927_vm5, %v1903_v45 }
 0x437   : > { %1935 = vmatpush1.bf16.msra.mxu1 %v1929_v9 }
 0x43a   : > { %4107 = vmatmul.mubr.msk.bf16.vlgmr.msra.gmra.mrb[4].mxu1 %vm1923_vm7, %v4340_v60 }
 0x43b   : > { %2204 = vmatprep.mubr.bf16.mxu1 %v4450_v0 }
 0x50d   : > { %v1968_v62 = vpop.f32.mrb[4].mxu1 }
 0x50e   : > { %v1969_v63 = vadd.f32 %v1968_v62, %v1911_v61  ;;  %v1970_v1 = vpop.f32.mrb[5].mxu1 }
 0x50f   : > { %v1971_v7 = vadd.f32 %v1970_v1, %v1911_v61  ;;  %v1972_v10 = vpop.f32.mrb[6].mxu1 }
 0x510   : > { %v1977_v11 = vadd.f32 %v1969_v63, %v4747_v4  ;;  %v1973_v13 = vadd.f32 %v1972_v10, %v1916_v5  ;;  %v1974_v14 = vpop.f32.mrb[7].mxu1 }
 0x511   : > { %v1978_v16 = vadd.f32 %v1971_v7, %v4743_v2  ;;  %v1975_v20 = vadd.f32 %v1974_v14, %v1916_v5 }
 0x512   : > { %v5036_v21 = vmax.f32 %v1977_v11, 0.0  ;;  %v1979_v22 = vadd.f32 %v1973_v13, %v4751_v6 }
 0x513   : > { %v5039_v23 = vmax.f32 %v1978_v16, 0.0  ;;  %v1980_v24 = vadd.f32 %v1975_v20, %v4745_v3 }
 0x514   : > { %1985 = vst [vmem:[%s5042_s2] sm:$0xff] %v5036_v21  ;;  %v5046_v4 = vmax.f32 %v1979_v22, 0.0 }
 0x515   : > { %1986 = vst [vmem:[%s5042_s2 + $0x8] sm:$0xff] %v5039_v23  ;;  %v5050_v2 = vmax.f32 %v1980_v24, 0.0 }
 0x516   : > { %1987 = vst [vmem:[%s5042_s2 + $0x10] sm:$0xff] %v5046_v4  ;;  %v1989_v6 = vpack.c.bf16 %v5046_v4, %v5036_v21 }
 0x517   : > { %1988 = vst [vmem:[%s5042_s2 + $0x18] sm:$0xff] %v5050_v2  ;;  %v1990_v3 = vpack.c.bf16 %v5050_v2, %v5039_v23 }
 0x519   : > { %2001 = vmatprep.subr.bf16.mxu0 %v1990_v3 }
 0x51a   : > { %2002 = vmatpush1.bf16.msra.mxu0 %v1989_v6 }
 0x51d   : > { %4108 = vmatmul.mubr.msk.bf16.vlgmr.msra.gmra.mrb[12].mxu0 %vm1331_vm0, %v1991_v26 }
 0x51e   : > { %2351 = vmatprep.mubr.bf16.mxu0 %v4450_v0 }
 0x5f0   : > { %v2035_v46 = vpop.f32.mrb[12].mxu0 }
 0x5f1   : > { %v2036_v28 = vadd.f32 %v2035_v46, %v1996_v27  ;;  %v2037_v59 = vpop.f32.mrb[13].mxu0 }
 0x5f2   : > { %v2038_v29 = vadd.f32 %v2037_v59, %v1996_v27  ;;  %v2039_v19 = vpop.f32.mrb[14].mxu0 }
 0x5f3   : > { %v5063_v32 = vmax.f32 %v2036_v28, 0.0  ;;  %v2040_v33 = vpop.f32.mrb[15].mxu0 }
 0x5f4   : > { %v5065_v35 = vmax.f32 %v2038_v29, 0.0 }
 0x5f5   : > { %2083 = vrot.lane.b32.xlu1 %v5063_v32, %s6038_s13  ;;  %v5072_v36 = vrot.slane %v5063_v32, 4 }
 0x5f6   : > { %2085 = vrot.lane.b32.xlu0 %v5065_v35, %s6038_s13  ;;  %v5079_v37 = vrot.slane %v5065_v35, 4  ;;  %v4270_v31 = vpack.i.bf16 %v5063_v32, %v5065_v35  ;;  %v4275_v41 = vpack.i.bf16 %v5065_v35, %v5063_v32 }
 0x5f8   : > { %v4265_v40 = vpack.i.bf16 %v5079_v37, %v5072_v36 }
 0x5f9   : > { %2095 = vrot.lane.b32.xlu1 %v5065_v35, %s5988_s23 }
 0x5fa   : > { %2234 = vrot.lane.b32.xlu0 %v5072_v36, %s6035_s9 }
 0x5fd   : > { %2244 = vrot.lane.b32.xlu1 %v5072_v36, %s5990_s1 }
 0x5fe   : > { %2217 = vrot.lane.b32.xlu0 %v5072_v36, %s6043_s28 }
 0x601   : > { %2236 = vrot.lane.b32.xlu1 %v5079_v37, %s6035_s9 }
 0x602   : > { %4266 = vrot.lane.b32.xlu0 %v4265_v40, %s6044_s3 }
 0x605   : > { %2219 = vrot.lane.b32.xlu1 %v5079_v37, %s6043_s28 }
 0x606   : > { %2246 = vrot.lane.b32.xlu0 %v5079_v37, %s5990_s1 }
 0x609   : > { %4271 = vrot.lane.b32.xlu1 %v4270_v31, %s6040_s5 }
 0x60a   : > { %2093 = vrot.lane.b32.xlu0 %v5063_v32, %s5988_s23  ;;  %s6046_s23 = sld [smem:[#allocation16_spill]] }
 0x60d   : > { %2112 = vrot.lane.b32.xlu1 %v5065_v35, %s6045_s8 }
 0x60e   : > { %2110 = vrot.lane.b32.xlu0 %v5063_v32, %s6045_s8 }
 0x611   : > { %2073 = vrot.lane.b32.xlu1 %v5063_v32, %s5990_s1 }
 0x612   : > { %2307 = vperm.xlu0 %4238, %v2304_v18  }
 0x615   : > { %2046 = vrot.lane.b32.xlu1 %v5063_v32, %s6043_s28 }
 0x616   : > { %2075 = vrot.lane.b32.xlu0 %v5065_v35, %s5990_s1 }
 0x619   : > { %4276 = vrot.lane.b32.xlu1 %v4275_v41, %s6044_s3 }
 0x61a   : > { %2048 = vrot.lane.b32.xlu0 %v5065_v35, %s6043_s28 }
 0x61d   : > { %2065 = vrot.lane.b32.xlu1 %v5065_v35, %s6035_s9 }
 0x61e   : > { %2063 = vrot.lane.b32.xlu0 %v5063_v32, %s6035_s9 }
 0x667   : > { %v2084_v43 = vpop.permute.xlu1 %2083 }
 0x668   : > { %v2086_v44 = vpop.permute.xlu0 %2085 }
 0x669   : > { %v2090_v51 = vsel %vm1424_vm2, %v2086_v44, 0.0  ;;  %v2087_v52 = vsel %vm1424_vm2, %v2084_v43, %v2086_v44 }
 0x66a   : > { %v5122_v50 = vmul.f32 %v4814_v34, %v2090_v51  ;;  %v5126_v15 = vmul.f32 %v4820_v39, %v2087_v52 }
 0x66b   : > { %v2096_v38 = vpop.permute.xlu1 %2095 }
 0x66c   : > { %v2235_v47 = vpop.permute.xlu0 %2234  ;;  %v2100_v25 = vsel %vm1435_vm9, %v2096_v38, 0.0  ;;  %v2274_v5 = vrot.slane %v5122_v50, 2  ;;  %v2273_v16 = vrot.slane %v5126_v15, 2 }
 0x66d   : > { %v2241_v56 = vsel %vm1402_vm4, 0.0, %v2235_v47  ;;  %v5144_v20 = vmul.f32 %v4827_v48, %v2100_v25 }
 0x66e   : > { %v2242_v7 = vmul.f32 %v4820_v39, %v2241_v56  ;;  %v2294_v33 = vsel %vm1509_vm10, %v5079_v37, %v2274_v5 }
 0x66f   : > { %v2245_v49 = vpop.permute.xlu1 %2244 }
 0x670   : > { %v2218_v30 = vpop.permute.xlu0 %2217  ;;  %v2251_v57 = vsel %vm1413_vm8, 0.0, %v2245_v49  ;;  %v2261_v59 = vrot.slane %v2242_v7, 4 }
 0x671   : > { %v2224_v8 = vsel %vm1384_vm6, 0.0, %v2218_v30  ;;  %v2252_v22 = vmul.f32 %v4824_v42, %v2251_v57 }
 0x672   : > { %v2225_v13 = vmul.f32 %v4824_v42, %v2224_v8 }
 0x673   : > { %v2237_v12 = vpop.permute.xlu1 %2236 }
 0x674   : > { %v4267_v53 = vpop.permute.xlu0 %4266  ;;  %v2238_v54 = vsel %vm1402_vm4, %v2235_v47, %v2237_v12  ;;  %v2296_v12 = vsel %vm1483_vm11, %v2294_v33, %v5144_v20 }
 0x675   : > { %v4269_v17 = vunpack.i.h.bf16 %v4267_v53  ;;  %v4268_v55 = vunpack.i.l.bf16 %v4267_v53  ;;  %v2243_v60 = vmul.f32 %v4814_v34, %v2238_v54 }
 0x677   : > { %v2231_v58 = vsel %vm1331_vm0, %v4268_v55, %v4269_v17  ;;  %v2233_v45 = vsel %vm1331_vm0, 0.0, %v4268_v55  ;;  %v2220_v9 = vpop.permute.xlu1 %2219  ;;  %v2262_v6 = vrot.slane %v2243_v60, 4 }
 0x678   : > { %v2255_v61 = vrot.slane %v2233_v45, 6  ;;  %v2256_v62 = vrot.slane %v2231_v58, 6  ;;  %v2221_v63 = vsel %vm1384_vm6, %v2218_v30, %v2220_v9  ;;  %v2247_v1 = vpop.permute.xlu0 %2246 }
 0x679   : > { %v2226_v10 = vmul.f32 %v4827_v48, %v2221_v63  ;;  %v2248_v11 = vsel %vm1413_vm8, %v2245_v49, %v2247_v1  ;;  %v2267_v49 = vrot.slane %v2252_v22, 2  ;;  %v2303_v63 = vld [vmem:[%s6046_s23] sm:$0x1]  ;;  %s6047_s23 = sld [smem:[#allocation14_spill]] }
 0x67a   : > { %v2253_v14 = vmul.f32 %v4827_v48, %v2248_v11  ;;  %v2287_v26 = vsel %vm1509_vm10, %v2225_v13, %v2255_v61 }
 0x67b   : > { %v2288_v24 = vsel %vm1509_vm10, %v2226_v10, %v2256_v62  ;;  %v4272_v3 = vpop.permute.xlu1 %4271  ;;  %v2289_v37 = vsel %vm1483_vm11, %v2287_v26, %v2261_v59  ;;  %v2134_v59 = vrot.slane %v5122_v50, 4 }
 0x67c   : > { %v4274_v27 = vunpack.i.h.bf16 %v4272_v3  ;;  %v4273_v46 = vunpack.i.l.bf16 %v4272_v3  ;;  %v2094_v28 = vpop.permute.xlu0 %2093  ;;  %v2268_v29 = vrot.slane %v2253_v14, 2  ;;  %v2290_v41 = vsel %vm1483_vm11, %v2288_v24, %v2262_v6 }
 0x67d   : > { %v2097_v19 = vsel %vm1435_vm9, %v2094_v28, %v2096_v38  ;;  %v2293_v38 = vsel %vm1509_vm10, %v5072_v36, %v2273_v16  ;;  %v2291_v56 = vsel %vm1635_vm12, %v2289_v37, %v2267_v49 }
 0x67e   : > { %v5153_v40 = vsel %vm1446_vm13, %v4274_v27, %v4273_v46  ;;  %v5156_v31 = vsel %vm1446_vm13, %v4273_v46, 0.0  ;;  %v5159_v18 = vmul.f32 %v4824_v42, %v2097_v19  ;;  %v2292_v36 = vsel %vm1635_vm12, %v2290_v41, %v2268_v29 }
 0x67f   : > { %v2277_v43 = vrot.slane %v5153_v40, 6  ;;  %v2278_v44 = vrot.slane %v5156_v31, 6  ;;  %v2113_v47 = vpop.permute.xlu1 %2112  ;;  %v2139_v46 = vrot.slane %v5156_v31, 4  ;;  %v2138_v50 = vrot.slane %v5153_v40, 4 }
 0x680   : > { %v2295_v30 = vsel %vm1483_vm11, %v2293_v38, %v5159_v18  ;;  %v2117_v51 = vsel %vm1454_vm14, %v2113_v47, 0.0  ;;  %v2111_v52 = vpop.permute.xlu0 %2110 }
 0x681   : > { %v5173_v53 = vmul.f32 %v4814_v34, %v2117_v51  ;;  %v2114_v54 = vsel %vm1454_vm14, %v2111_v52, %v2113_v47  ;;  %v2298_v17 = vsel %vm1635_vm12, %v2296_v12, %v2278_v44  ;;  %v2297_v57 = vsel %vm1635_vm12, %v2295_v30, %v2277_v43 }
 0x682   : > { %v5179_v55 = vmul.f32 %v4820_v39, %v2114_v54  ;;  %v2300_v25 = vpack.c.bf16 %v2298_v17, %v2292_v36  ;;  %v2299_v58 = vpack.c.bf16 %v2297_v57, %v2291_v56  ;;  %v2149_v51 = vsel %vm1483_vm11, %v5144_v20, %v2139_v46 }
 0x683   : > { %v2284_v8 = vrot.slane %v5173_v53, 4  ;;  %v2074_v61 = vpop.permute.xlu1 %2073  ;;  %v2133_v17 = vrot.slane %v5126_v15, 4  ;;  %v2147_v57 = vsel %vm1483_vm11, %v5065_v35, %v2134_v59  ;;  %v2148_v40 = vsel %vm1483_vm11, %v5159_v18, %v2138_v50  ;;  %v2156_v18 = vld [vmem:[%s6047_s23] sm:$0x3]  ;;  %s6049_s23 = sld [smem:[#allocation15_spill]] }
 0x684   : > { %v2283_v45 = vrot.slane %v5179_v55, 4  ;;  %2319 = vmatprep.subr.bf16.mxu0 %v2300_v25  ;;  %v2080_v13 = vsel %vm1413_vm8, 0.0, %v2074_v61  ;;  %v2153_v20 = vpack.c.bf16 %v2149_v51, %v2147_v57  ;;  %v2155_v15 = vpack.c.bf16 %v5173_v53, %v5173_v53 }
 0x685   : > { %v2302_v9 = vpack.c.bf16 %v2284_v8, %v2284_v8  ;;  %2320 = vmatpush1.bf16.msra.mxu0 %v2299_v58  ;;  %v2081_v24 = vmul.f32 %v4824_v42, %v2080_v13  ;;  %v2146_v8 = vsel %vm1483_vm11, %v5063_v32, %v2133_v17  ;;  %v2560_v13 = vld [vmem:[%s6050_s17 + $0x8] sm:$0xff] }
 0x686   : > { %v2301_v60 = vpack.c.bf16 %v2283_v45, %v2283_v45  ;;  %v2152_v58 = vpack.c.bf16 %v2148_v40, %v2146_v8  ;;  %v2154_v45 = vpack.c.bf16 %v5179_v55, %v5179_v55 }
 0x687   : > { %4111 = vmatprep.subr.msk.bf16.mxu0 %vm1659_vm15, %v2302_v9  ;;  %v2047_v1 = vpop.permute.xlu1 %2046  ;;  %v2127_v43 = vrot.slane %v2081_v24, 4 }
 0x688   : > { %v2314_v62 = vsel %vm1659_vm15, %v2301_v60, 0  ;;  %v2053_v26 = vsel %vm1384_vm6, 0.0, %v2047_v1  ;;  %v2167_v35 = vsel %vm1509_vm10, %v2154_v45, 0 }
 0x689   : > { %2322 = vmatpush1.bf16.msra.mxu0 %v2314_v62  ;;  %v2054_v44 = vmul.f32 %v4824_v42, %v2053_v26 }
 0x68b   : > { %v4277_v7 = vpop.permute.xlu1 %4276 }
 0x68c   : > { %4112 = vmatmul.mubr.msk.bf16.vlgmr.msra.gmra.mrb[16].mxu0 %vm1655_vm1, %v2303_v63  ;;  %v4278_v11 = vunpack.i.l.bf16 %v4277_v7  ;;  %v4279_v14 = vunpack.i.h.bf16 %v4277_v7  ;;  %v2489_v7 = vld [vmem:[%s6048_s14] sm:$0x3]  ;;  %s6055_s14 = sld [smem:[#allocation19_spill]] }
 0x68d   : > { %2617 = vmatprep.mubr.bf16.mxu0 %v4450_v0 }
 0x68e   : > { %v2062_v3 = vsel %vm1331_vm0, 0.0, %v4278_v11  ;;  %v2060_v28 = vsel %vm1331_vm0, %v4278_v11, %v4279_v14  ;;  %v2559_v11 = vld [vmem:[%s6050_s17] sm:$0xff]  ;;  %s6063_s17 = sld [smem:[#allocation32_spill]] }
 0x68f   : > { %v2121_v29 = vrot.slane %v2062_v3, 4  ;;  %v2066_v19 = vpop.permute.xlu1 %2065  ;;  %v2122_v37 = vrot.slane %v2060_v28, 4 }
 0x691   : > { %v2308_v5 = vpop.permute.xlu0 %2307  ;;  %v2142_v54 = vsel %vm1483_vm11, %v2054_v44, %v2121_v29 }
 0x695   : > { %v2076_v10 = vpop.permute.xlu0 %2075 }
 0x696   : > { %v2077_v16 = vsel %vm1413_vm8, %v2074_v61, %v2076_v10  ;;  %v2157_v10 = vld [vmem:[%s6049_s23] sm:$0xf]  ;;  %s6056_s23 = sld [smem:[#allocation21_spill]] }
 0x697   : > { %v2082_v27 = vmul.f32 %v4827_v48, %v2077_v16 }
 0x699   : > { %v2049_v22 = vpop.permute.xlu0 %2048  ;;  %v2128_v49 = vrot.slane %v2082_v27, 4 }
 0x69a   : > { %v2050_v6 = vsel %vm1384_vm6, %v2047_v1, %v2049_v22  ;;  %v2639_v22 = vld [vmem:[%s6053_s21] sm:$0x3f]  ;;  %s6054_s21 = sld [smem:[#allocation17_spill]] }
 0x69b   : > { %v2055_v33 = vmul.f32 %v4827_v48, %v2050_v6 }
 0x69d   : > { %v2064_v41 = vpop.permute.xlu0 %2063  ;;  %v2143_v52 = vsel %vm1483_vm11, %v2055_v33, %v2122_v37 }
 0x69e   : > { %v2067_v38 = vsel %vm1402_vm4, %v2064_v41, %v2066_v19  ;;  %v2070_v47 = vsel %vm1402_vm4, 0.0, %v2064_v41 }
 0x69f   : > { %v2071_v31 = vmul.f32 %v4820_v39, %v2070_v47  ;;  %v2072_v30 = vmul.f32 %v4814_v34, %v2067_v38 }
 0x6a1   : > { %v2145_v12 = vsel %vm1483_vm11, %v2072_v30, %v2128_v49  ;;  %v2144_v36 = vsel %vm1483_vm11, %v2071_v31, %v2127_v43 }
 0x6a2   : > { %v2151_v25 = vpack.c.bf16 %v2145_v12, %v2143_v52  ;;  %v2150_v56 = vpack.c.bf16 %v2144_v36, %v2142_v54 }
 0x6a4   : > { %2172 = vmatprep.subr.bf16.mxu1 %v2151_v25 }
 0x6a5   : > { %2173 = vmatpush1.bf16.msra.mxu1 %v2150_v56 }
 0x6a6   : > { %2174 = vmatprep.subr.bf16.mxu1 %v2153_v20 }
 0x6a9   : > { %2175 = vmatpush1.bf16.msra.mxu1 %v2152_v58 }
 0x6aa   : > { %4109 = vmatprep.subr.msk.bf16.mxu1 %vm1509_vm10, %v2155_v15 }
 0x6ad   : > { %2177 = vmatpush1.bf16.msra.mxu1 %v2167_v35 }
 0x6b0   : > { %4110 = vmatmul.mubr.msk.bf16.vlgmr.msra.gmra.mrb[8].mxu1 %vm1505_vm3, %v2156_v18 }
 0x6b1   : > { %2536 = vmatprep.mubr.bf16.mxu1 %v4450_v0 }
 0x75f   : > { %v2353_v9 = vpop.f32.mrb[16].mxu0 }
 0x760   : > { %v2354_v32 = vadd.f32 %v2353_v9, %v2308_v5  ;;  %v2355_v60 = vpop.f32.mrb[17].mxu0 }
 0x761   : > { %v2357_v61 = vpop.f32.mrb[18].mxu0  ;;  %v2356_v53 = vadd.f32 %v2355_v60, %v2308_v5 }
 0x762   : > { %v5229_v62 = vmax.f32 %v2354_v32, 0.0  ;;  %v2358_v63 = vpop.f32.mrb[19].mxu0 }
 0x763   : > { %v5235_v55 = vmax.f32 %v2356_v53, 0.0 }
 0x764   : > { %2391 = vrot.lane.b32.xlu0 %v5229_v62, %s5990_s1  ;;  %2381 = vrot.lane.b32.xlu1 %v5229_v62, %s6035_s9  ;;  %s6051_s1 = smov 113  }
 0x765   : > { %v4280_v1 = vpack.i.bf16 %v5235_v55, %v5229_v62  ;;  %v4285_v5 = vpack.i.bf16 %v5229_v62, %v5235_v55 }
 0x768   : > { %2403 = vrot.lane.b32.xlu0 %v5235_v55, %s6038_s13  ;;  %2401 = vrot.lane.b32.xlu1 %v5229_v62, %s6038_s13 }
 0x76c   : > { %2383 = vrot.lane.b32.xlu0 %v5235_v55, %s6035_s9  ;;  %2364 = vrot.lane.b32.xlu1 %v5229_v62, %s6043_s28 }
 0x770   : > { %2413 = vrot.lane.b32.xlu0 %v5235_v55, %s6051_s1  ;;  %4281 = vrot.lane.b32.xlu1 %v4280_v1, %s6044_s3 }
 0x774   : > { %2366 = vrot.lane.b32.xlu0 %v5235_v55, %s6043_s28  ;;  %2393 = vrot.lane.b32.xlu1 %v5235_v55, %s6052_s19 }
 0x778   : > { %2411 = vrot.lane.b32.xlu0 %v5229_v62, %s6051_s1  ;;  %4286 = vrot.lane.b32.xlu1 %v4285_v5, %s6040_s5 }
 0x77c   : > { %2428 = vrot.lane.b32.xlu0 %v5229_v62, %s6045_s8  ;;  %2430 = vrot.lane.b32.xlu1 %v5235_v55, %s6045_s8 }
 0x780   : > { %2492 = vperm.xlu0 %4238, %v2489_v7   ;;  %2160 = vperm.xlu1 %4249, %v2157_v10  }
 0x783   : > { %v5267_v14 = vpop.f32.mrb[8].mxu1 }
 0x784   : > { %2563 = vperm.xlu0 %4238, %v2559_v11   ;;  %2568 = vperm.xlu1 %4249, %v2560_v13   ;;  %v5269_v16 = vpop.f32.mrb[9].mxu1 }
 0x785   : > { %v2210_v24 = vpop.f32.mrb[10].mxu1 }
 0x786   : > { %v2211_v3 = vpop.f32.mrb[11].mxu1 }
 0x788   : > { %2642 = vperm.xlu0 %4238, %v2639_v22  }
 0x7d6   : > { %v2392_v6 = vpop.permute.xlu0 %2391  ;;  %v2382_v26 = vpop.permute.xlu1 %2381 }
 0x7d7   : > { %v2398_v37 = vsel %vm1413_vm8, 0.0, %v2392_v6  ;;  %v2388_v49 = vsel %vm1402_vm4, 0.0, %v2382_v26 }
 0x7d8   : > { %v2399_v56 = vmul.f32 %v4824_v42, %v2398_v37  ;;  %v2389_v57 = vmul.f32 %v4820_v39, %v2388_v49 }
 0x7da   : > { %v2404_v27 = vpop.permute.xlu0 %2403  ;;  %v2402_v46 = vpop.permute.xlu1 %2401  ;;  %v2451_v11 = vrot.slane %v2399_v56, 2  ;;  %v2445_v13 = vrot.slane %v2389_v57, 4 }
 0x7db   : > { %v2408_v29 = vsel %vm1424_vm2, %v2404_v27, 0.0  ;;  %v2405_v19 = vsel %vm1424_vm2, %v2402_v46, %v2404_v27 }
 0x7dc   : > { %v2410_v31 = vmul.f32 %v4814_v34, %v2408_v29  ;;  %v2409_v30 = vmul.f32 %v4820_v39, %v2405_v19 }
 0x7de   : > { %v2384_v28 = vpop.permute.xlu0 %2383  ;;  %v2365_v59 = vpop.permute.xlu1 %2364  ;;  %v2458_v35 = vrot.slane %v2410_v31, 6  ;;  %v2457_v18 = vrot.slane %v2409_v30, 6 }
 0x7df   : > { %v2385_v43 = vsel %vm1402_vm4, %v2382_v26, %v2384_v28  ;;  %v2371_v50 = vsel %vm1384_vm6, 0.0, %v2365_v59 }
 0x7e0   : > { %v2390_v12 = vmul.f32 %v4814_v34, %v2385_v43  ;;  %v2372_v8 = vmul.f32 %v4824_v42, %v2371_v50  ;;  %v2479_v3 = vsel %vm1509_vm10, %v5235_v55, %v2458_v35 }
 0x7e2   : > { %v2414_v33 = vpop.permute.xlu0 %2413  ;;  %v4282_v41 = vpop.permute.xlu1 %4281  ;;  %v2446_v9 = vrot.slane %v2390_v12, 4 }
 0x7e3   : > { %v2418_v44 = vsel %vm1435_vm9, %v2414_v33, 0.0  ;;  %v4284_v38 = vunpack.i.h.bf16 %v4282_v41  ;;  %v4283_v47 = vunpack.i.l.bf16 %v4282_v41 }
 0x7e4   : > { %v2420_v54 = vmul.f32 %v4827_v48, %v2418_v44 }
 0x7e5   : > { %v2378_v51 = vsel %vm1331_vm0, %v4283_v47, %v4284_v38  ;;  %v2380_v52 = vsel %vm1331_vm0, 0.0, %v4283_v47 }
 0x7e6   : > { %v2439_v36 = vrot.slane %v2380_v52, 6  ;;  %v2367_v17 = vpop.permute.xlu0 %2366  ;;  %v2394_v25 = vpop.permute.xlu1 %2393  ;;  %v2440_v58 = vrot.slane %v2378_v51, 6  ;;  %v2464_v32 = vrot.slane %v2420_v54, 4  ;;  %v2488_v54 = vld [vmem:[%s6054_s21] sm:$0x1]  ;;  %s6057_s21 = sld [smem:[#allocation26_spill]] }
 0x7e7   : > { %v2368_v40 = vsel %vm1384_vm6, %v2365_v59, %v2367_v17  ;;  %v2395_v20 = vsel %vm1413_vm8, %v2392_v6, %v2394_v25  ;;  %v2478_v6 = vsel %vm1509_vm10, %v5229_v62, %v2457_v18 }
 0x7e8   : > { %v2373_v15 = vmul.f32 %v4827_v48, %v2368_v40  ;;  %v2400_v45 = vmul.f32 %v4827_v48, %v2395_v20  ;;  %v2472_v60 = vsel %vm1509_vm10, %v2372_v8, %v2439_v36  ;;  %v2481_v44 = vsel %vm1483_vm11, %v2479_v3, %v2464_v32 }
 0x7ea   : > { %v2473_v61 = vsel %vm1509_vm10, %v2373_v15, %v2440_v58  ;;  %v2412_v53 = vpop.permute.xlu0 %2411  ;;  %v4287_v63 = vpop.permute.xlu1 %4286  ;;  %v2452_v1 = vrot.slane %v2400_v45, 2 }
 0x7eb   : > { %v2415_v5 = vsel %vm1435_vm9, %v2412_v53, %v2414_v33  ;;  %v4289_v7 = vunpack.i.h.bf16 %v4287_v63  ;;  %v4288_v10 = vunpack.i.l.bf16 %v4287_v63  ;;  %v2475_v24 = vsel %vm1483_vm11, %v2473_v61, %v2446_v9 }
 0x7ec   : > { %v2419_v22 = vmul.f32 %v4824_v42, %v2415_v5  ;;  %v2474_v33 = vsel %vm1483_vm11, %v2472_v60, %v2445_v13  ;;  %v2477_v55 = vsel %vm1635_vm12, %v2475_v24, %v2452_v1 }
 0x7ed   : > { %v2425_v26 = vsel %vm1446_vm13, %v4289_v7, %v4288_v10  ;;  %v2427_v27 = vsel %vm1446_vm13, %v4288_v10, 0.0  ;;  %v2476_v31 = vsel %vm1635_vm12, %v2474_v33, %v2451_v11 }
 0x7ee   : > { %v2463_v46 = vrot.slane %v2419_v22, 4  ;;  %v2468_v28 = vrot.slane %v2425_v26, 2  ;;  %v2469_v59 = vrot.slane %v2427_v27, 2  ;;  %v2429_v29 = vpop.permute.xlu0 %2428  ;;  %v2431_v19 = vpop.permute.xlu1 %2430 }
 0x7ef   : > { %v2432_v41 = vsel %vm1454_vm14, %v2429_v29, %v2431_v19  ;;  %v2435_v43 = vsel %vm1454_vm14, %v2431_v19, 0.0 }
 0x7f0   : > { %v2480_v62 = vsel %vm1483_vm11, %v2478_v6, %v2463_v46  ;;  %v2436_v38 = vmul.f32 %v4820_v39, %v2432_v41  ;;  %v2437_v47 = vmul.f32 %v4814_v34, %v2435_v43  ;;  %v2483_v37 = vsel %vm1635_vm12, %v2481_v44, %v2469_v59 }
 0x7f1   : > { %v2485_v49 = vpack.c.bf16 %v2483_v37, %v2477_v55  ;;  %v2482_v30 = vsel %vm1635_vm12, %v2480_v62, %v2468_v28 }
 0x7f2   : > { %v2487_v50 = vpack.c.bf16 %v2437_v47, %v2437_v47  ;;  %v2484_v51 = vpack.c.bf16 %v2482_v30, %v2476_v31  ;;  %v2486_v52 = vpack.c.bf16 %v2436_v38, %v2436_v38 }
 0x7f3   : > { %2504 = vmatprep.subr.bf16.mxu1 %v2485_v49 }
 0x7f4   : > { %2505 = vmatpush1.bf16.msra.mxu1 %v2484_v51  ;;  %v2499_v12 = vsel %vm1659_vm15, %v2486_v52, 0  ;;  %v2951_v52 = vld [vmem:[%s6057_s21] sm:$0x3]  ;;  %s6060_s21 = sld [smem:[#allocation28_spill]] }
 0x7f5   : > { %4113 = vmatprep.subr.msk.bf16.mxu1 %vm1659_vm15, %v2487_v50 }
 0x7f8   : > { %2507 = vmatpush1.bf16.msra.mxu1 %v2499_v12 }
 0x7fb   : > { %4114 = vmatmul.mubr.msk.bf16.vlgmr.msra.gmra.mrb[12].mxu1 %vm1655_vm1, %v2488_v54 }
 0x7fc   : > { %2680 = vmatprep.mubr.bf16.mxu1 %v4450_v0 }
 0x7ff   : > { %v2161_v36 = vpop.permute.xlu1 %2160  ;;  %v2493_v17 = vpop.permute.xlu0 %2492 }
 0x800   : > { %v2207_v56 = vadd.f32 %v5267_v14, %v2161_v36  ;;  %v2209_v20 = vadd.f32 %v5269_v16, %v2161_v36  ;;  %v4341_v16 = vld [vmem:[%s6055_s14] sm:$0xff]   ;;  %s6058_s14 = sld [smem:[#allocation25_spill]] }
 0x802   : > { %v2213_v18 = vmax.f32 %v2207_v56, 0.0  ;;  %v2214_v32 = vmax.f32 %v2209_v20, 0.0 }
 0x803   : > { %v2564_v5 = vpop.permute.xlu0 %2563  ;;  %v2569_v13 = vpop.permute.xlu1 %2568 }
 0x8ce   : > { %v2538_v25 = vpop.f32.mrb[12].mxu1 }
 0x8cf   : > { %v2539_v57 = vadd.f32 %v2538_v25, %v2493_v17  ;;  %v2540_v40 = vpop.f32.mrb[13].mxu1 }
 0x8d0   : > { %v2541_v8 = vadd.f32 %v2540_v40, %v2493_v17  ;;  %v2542_v58 = vpop.f32.mrb[14].mxu1 }
 0x8d1   : > { %v2545_v15 = vmax.f32 %v2539_v57, 0.0  ;;  %v2543_v45 = vpop.f32.mrb[15].mxu1 }
 0x8d2   : > { %v2546_v35 = vmax.f32 %v2541_v8, 0.0 }
 0x8d3   : > { %v2549_v9 = vrot.slane %v2545_v15, 4 }
 0x8d4   : > { %v2550_v60 = vrot.slane %v2546_v35, 4 }
 0x8d5   : > { %v2553_v61 = vsel %vm1483_vm11, %v2213_v18, %v2549_v9 }
 0x8d6   : > { %v2554_v53 = vsel %vm1483_vm11, %v2214_v32, %v2550_v60  ;;  %v2555_v63 = vpack.c.bf16 %v2553_v61, %v2553_v61 }
 0x8d7   : > { %v2556_v14 = vpack.c.bf16 %v2554_v53, %v2554_v53 }
 0x8d8   : > { %v2580_v1 = vsel %vm1927_vm5, %v2555_v63, 0 }
 0x8d9   : > { %4116 = vmatprep.subr.msk.bf16.mxu0 %vm1927_vm5, %v2556_v14 }
 0x8da   : > { %2586 = vmatpush1.bf16.msra.mxu0 %v2580_v1 }
 0x8dd   : > { %4117 = vmatmul.mubr.msk.bf16.vlgmr.msra.gmra.mrb[20].mxu0 %vm1923_vm7, %v4341_v16 }
 0x8de   : > { %2851 = vmatprep.mubr.bf16.mxu0 %v4450_v0 }
 0x9b0   : > { %v2619_v7 = vpop.f32.mrb[20].mxu0 }
 0x9b1   : > { %v2620_v10 = vadd.f32 %v2619_v7, %v2564_v5  ;;  %v2621_v11 = vpop.f32.mrb[21].mxu0 }
 0x9b2   : > { %v2622_v22 = vadd.f32 %v2621_v11, %v2564_v5  ;;  %v2623_v24 = vpop.f32.mrb[22].mxu0 }
 0x9b3   : > { %v2624_v3 = vadd.f32 %v2623_v24, %v2569_v13  ;;  %v2625_v6 = vpop.f32.mrb[23].mxu0  ;;  %v5332_v46 = vadd.f32 %v2620_v10, %v5036_v21 }
 0x9b4   : > { %v5329_v26 = vadd.f32 %v2622_v22, %v5039_v23  ;;  %v2626_v27 = vadd.f32 %v2625_v6, %v2569_v13 }
 0x9b5   : > { %v5335_v28 = vadd.f32 %v2624_v3, %v5046_v4  ;;  %v2632_v41 = vmax.f32 %v5332_v46, 0.0  ;;  %v2638_v4 = vld [vmem:[%s6056_s23] sm:$0x7]  ;;  %s6059_s23 = sld [smem:[#allocation23_spill]] }
 0x9b6   : > { %v5338_v59 = vadd.f32 %v2626_v27, %v5050_v2  ;;  %v2633_v19 = vmax.f32 %v5329_v26, 0.0  ;;  %v2643_v2 = vpop.permute.xlu0 %2642 }
 0x9b7   : > { %v2634_v29 = vmax.f32 %v5335_v28, 0.0 }
 0x9b8   : > { %v2635_v33 = vmax.f32 %v5338_v59, 0.0 }
 0x9b9   : > { %v2636_v23 = vpack.c.bf16 %v2634_v29, %v2632_v41 }
 0x9ba   : > { %v2637_v21 = vpack.c.bf16 %v2635_v33, %v2633_v19 }
 0x9bc   : > { %2648 = vmatprep.subr.bf16.mxu1 %v2637_v21 }
 0x9bd   : > { %2649 = vmatpush1.bf16.msra.mxu1 %v2636_v23 }
 0x9c0   : > { %4118 = vmatmul.mubr.msk.bf16.vlgmr.msra.gmra.mrb[16].mxu1 %vm1331_vm0, %v2638_v4 }
 0x9c1   : > { %2998 = vmatprep.mubr.bf16.mxu1 %v4450_v0 }
 0xa93   : > { %v2682_v43 = vpop.f32.mrb[16].mxu1 }
 0xa94   : > { %v2683_v55 = vadd.f32 %v2682_v43, %v2643_v2  ;;  %v2684_v44 = vpop.f32.mrb[17].mxu1 }
 0xa95   : > { %v2685_v62 = vadd.f32 %v2684_v44, %v2643_v2  ;;  %v2686_v38 = vpop.f32.mrb[18].mxu1 }
 0xa96   : > { %v5355_v47 = vmax.f32 %v2683_v55, 0.0  ;;  %v2687_v37 = vpop.f32.mrb[19].mxu1 }
 0xa97   : > { %v5357_v49 = vmax.f32 %v2685_v62, 0.0 }
 0xa98   : > { %2730 = vrot.lane.b32.xlu0 %v5355_v47, %s6038_s13  ;;  %v5364_v31 = vrot.slane %v5355_v47, 4 }
 0xa99   : > { %2732 = vrot.lane.b32.xlu1 %v5357_v49, %s6038_s13  ;;  %v5371_v30 = vrot.slane %v5357_v49, 4  ;;  %v4295_v51 = vpack.i.bf16 %v5355_v47, %v5357_v49  ;;  %v4300_v12 = vpack.i.bf16 %v5357_v49, %v5355_v47 }
 0xa9b   : > { %v4290_v50 = vpack.i.bf16 %v5371_v30, %v5364_v31 }
 0xa9c   : > { %2742 = vrot.lane.b32.xlu0 %v5357_v49, %s6051_s1 }
 0xa9d   : > { %2881 = vrot.lane.b32.xlu1 %v5364_v31, %s6035_s9 }
 0xaa0   : > { %2891 = vrot.lane.b32.xlu0 %v5364_v31, %s6052_s19 }
 0xaa1   : > { %2864 = vrot.lane.b32.xlu1 %v5364_v31, %s6043_s28 }
 0xaa4   : > { %2883 = vrot.lane.b32.xlu0 %v5371_v30, %s6035_s9 }
 0xaa5   : > { %4291 = vrot.lane.b32.xlu1 %v4290_v50, %s6044_s3 }
 0xaa8   : > { %2866 = vrot.lane.b32.xlu0 %v5371_v30, %s6043_s28 }
 0xaa9   : > { %2893 = vrot.lane.b32.xlu1 %v5371_v30, %s6052_s19 }
 0xaac   : > { %4296 = vrot.lane.b32.xlu0 %v4295_v51, %s6040_s5 }
 0xaad   : > { %2740 = vrot.lane.b32.xlu1 %v5355_v47, %s6051_s1 }
 0xab0   : > { %2759 = vrot.lane.b32.xlu0 %v5357_v49, %s6045_s8 }
 0xab1   : > { %2757 = vrot.lane.b32.xlu1 %v5355_v47, %s6045_s8 }
 0xab4   : > { %2720 = vrot.lane.b32.xlu0 %v5355_v47, %s6052_s19 }
 0xab5   : > { %2954 = vperm.xlu1 %4249, %v2951_v52  }
 0xab8   : > { %2693 = vrot.lane.b32.xlu0 %v5355_v47, %s6043_s28 }
 0xab9   : > { %2722 = vrot.lane.b32.xlu1 %v5357_v49, %s6052_s19 }
 0xabc   : > { %4301 = vrot.lane.b32.xlu0 %v4300_v12, %s6044_s3 }
 0xabd   : > { %2695 = vrot.lane.b32.xlu1 %v5357_v49, %s6043_s28 }
 0xac0   : > { %2712 = vrot.lane.b32.xlu0 %v5357_v49, %s6035_s9 }
 0xac1   : > { %2710 = vrot.lane.b32.xlu1 %v5355_v47, %s6035_s9 }
 0xb0a   : > { %v2731_v54 = vpop.permute.xlu0 %2730 }
 0xb0b   : > { %v2733_v36 = vpop.permute.xlu1 %2732 }
 0xb0c   : > { %v2737_v40 = vsel %vm1424_vm2, %v2733_v36, 0.0  ;;  %v2734_v20 = vsel %vm1424_vm2, %v2731_v54, %v2733_v36 }
 0xb0d   : > { %v5414_v15 = vmul.f32 %v4814_v34, %v2737_v40  ;;  %v5418_v9 = vmul.f32 %v4820_v39, %v2734_v20 }
 0xb0e   : > { %v2743_v17 = vpop.permute.xlu0 %2742 }
 0xb0f   : > { %v2882_v25 = vpop.permute.xlu1 %2881  ;;  %v2747_v32 = vsel %vm1435_vm9, %v2743_v17, 0.0  ;;  %v2921_v13 = vrot.slane %v5414_v15, 2  ;;  %v2920_v21 = vrot.slane %v5418_v9, 2 }
 0xb10   : > { %v2888_v60 = vsel %vm1402_vm4, 0.0, %v2882_v25  ;;  %v5436_v23 = vmul.f32 %v4827_v48, %v2747_v32 }
 0xb11   : > { %v2889_v22 = vmul.f32 %v4820_v39, %v2888_v60  ;;  %v2941_v50 = vsel %vm1509_vm10, %v5371_v30, %v2921_v13 }
 0xb12   : > { %v2892_v56 = vpop.permute.xlu0 %2891 }
 0xb13   : > { %v2865_v57 = vpop.permute.xlu1 %2864  ;;  %v2898_v61 = vsel %vm1413_vm8, 0.0, %v2892_v56  ;;  %v2908_v51 = vrot.slane %v2889_v22, 4 }
 0xb14   : > { %v2871_v53 = vsel %vm1384_vm6, 0.0, %v2865_v57  ;;  %v2899_v4 = vmul.f32 %v4824_v42, %v2898_v61 }
 0xb15   : > { %v2872_v6 = vmul.f32 %v4824_v42, %v2871_v53 }
 0xb16   : > { %v2884_v8 = vpop.permute.xlu0 %2883 }
 0xb17   : > { %v4292_v58 = vpop.permute.xlu1 %4291  ;;  %v2885_v45 = vsel %vm1402_vm4, %v2882_v25, %v2884_v8  ;;  %v2914_v8 = vrot.slane %v2899_v4, 2 }
 0xb18   : > { %v4294_v35 = vunpack.i.h.bf16 %v4292_v58  ;;  %v4293_v18 = vunpack.i.l.bf16 %v4292_v58  ;;  %v2890_v16 = vmul.f32 %v4814_v34, %v2885_v45 }
 0xb1a   : > { %v2878_v63 = vsel %vm1331_vm0, %v4293_v18, %v4294_v35  ;;  %v2880_v14 = vsel %vm1331_vm0, 0.0, %v4293_v18  ;;  %v2867_v1 = vpop.permute.xlu0 %2866  ;;  %v2909_v55 = vrot.slane %v2890_v16, 4  ;;  %v2943_v18 = vsel %vm1483_vm11, %v2941_v50, %v5436_v23 }
 0xb1b   : > { %v2902_v5 = vrot.slane %v2880_v14, 6  ;;  %v2903_v7 = vrot.slane %v2878_v63, 6  ;;  %v2868_v10 = vsel %vm1384_vm6, %v2865_v57, %v2867_v1  ;;  %v2894_v11 = vpop.permute.xlu1 %2893  ;;  %v2940_v57 = vsel %vm1509_vm10, %v5364_v31, %v2920_v21 }
 0xb1c   : > { %v2873_v24 = vmul.f32 %v4827_v48, %v2868_v10  ;;  %v2895_v3 = vsel %vm1413_vm8, %v2892_v56, %v2894_v11 }
 0xb1d   : > { %v2900_v27 = vmul.f32 %v4827_v48, %v2895_v3  ;;  %v2934_v44 = vsel %vm1509_vm10, %v2872_v6, %v2902_v5 }
 0xb1e   : > { %v2935_v2 = vsel %vm1509_vm10, %v2873_v24, %v2903_v7  ;;  %v4297_v43 = vpop.permute.xlu0 %4296  ;;  %v2950_v24 = vld [vmem:[%s6058_s14] sm:$0x1]  ;;  %s6061_s14 = sld [smem:[#allocation24_spill]] }
 0xb1f   : > { %v4299_v62 = vunpack.i.h.bf16 %v4297_v43  ;;  %v4298_v38 = vunpack.i.l.bf16 %v4297_v43  ;;  %v2741_v37 = vpop.permute.xlu1 %2740  ;;  %v2915_v52 = vrot.slane %v2900_v27, 2  ;;  %v2937_v56 = vsel %vm1483_vm11, %v2935_v2, %v2909_v55 }
 0xb20   : > { %v2744_v12 = vsel %vm1435_vm9, %v2741_v37, %v2743_v17  ;;  %v2936_v17 = vsel %vm1483_vm11, %v2934_v44, %v2908_v51 }
 0xb21   : > { %v5445_v54 = vsel %vm1446_vm13, %v4299_v62, %v4298_v38  ;;  %v5448_v36 = vsel %vm1446_vm13, %v4298_v38, 0.0  ;;  %v5451_v25 = vmul.f32 %v4824_v42, %v2744_v12  ;;  %v2939_v60 = vsel %vm1635_vm12, %v2937_v56, %v2915_v52 }
 0xb22   : > { %v2924_v30 = vrot.slane %v5445_v54, 6  ;;  %v2925_v40 = vrot.slane %v5448_v36, 6  ;;  %v2760_v20 = vpop.permute.xlu0 %2759  ;;  %v2938_v14 = vsel %vm1635_vm12, %v2936_v17, %v2914_v8  ;;  %v2786_v52 = vrot.slane %v5448_v36, 4 }
 0xb23   : > { %v2942_v58 = vsel %vm1483_vm11, %v2940_v57, %v5451_v25  ;;  %v2764_v45 = vsel %vm1454_vm14, %v2760_v20, 0.0  ;;  %v2758_v35 = vpop.permute.xlu1 %2757  ;;  %v2781_v56 = vrot.slane %v5414_v15, 4  ;;  %v2785_v15 = vrot.slane %v5445_v54, 4 }
 0xb24   : > { %v5465_v32 = vmul.f32 %v4814_v34, %v2764_v45  ;;  %v2761_v31 = vsel %vm1454_vm14, %v2758_v35, %v2760_v20  ;;  %v2945_v61 = vsel %vm1635_vm12, %v2943_v18, %v2925_v40  ;;  %v2944_v1 = vsel %vm1635_vm12, %v2942_v58, %v2924_v30 }
 0xb25   : > { %v5471_v53 = vmul.f32 %v4820_v39, %v2761_v31  ;;  %v2947_v63 = vpack.c.bf16 %v2945_v61, %v2939_v60  ;;  %v2946_v5 = vpack.c.bf16 %v2944_v1, %v2938_v14  ;;  %v2796_v60 = vsel %vm1483_vm11, %v5436_v23, %v2786_v52 }
 0xb26   : > { %v2931_v16 = vrot.slane %v5465_v32, 4  ;;  %v2721_v13 = vpop.permute.xlu0 %2720  ;;  %v2795_v54 = vsel %vm1483_vm11, %v5451_v25, %v2785_v15  ;;  %v2803_v25 = vld [vmem:[%s6059_s23] sm:$0x3]  ;;  %s6062_s23 = sld [smem:[#allocation30_spill]] }
 0xb27   : > { %v2930_v7 = vrot.slane %v5471_v53, 4  ;;  %2966 = vmatprep.subr.bf16.mxu1 %v2947_v63  ;;  %v2727_v2 = vsel %vm1413_vm8, 0.0, %v2721_v13 }
 0xb28   : > { %v2949_v10 = vpack.c.bf16 %v2931_v16, %v2931_v16  ;;  %2967 = vmatpush1.bf16.msra.mxu1 %v2946_v5  ;;  %v2728_v62 = vmul.f32 %v4824_v42, %v2727_v2  ;;  %v2780_v16 = vrot.slane %v5418_v9, 4  ;;  %v2802_v9 = vpack.c.bf16 %v5465_v32, %v5465_v32 }
 0xb29   : > { %v2948_v11 = vpack.c.bf16 %v2930_v7, %v2930_v7 }
 0xb2a   : > { %4121 = vmatprep.subr.msk.bf16.mxu1 %vm1659_vm15, %v2949_v10  ;;  %v2694_v3 = vpop.permute.xlu0 %2693  ;;  %v2774_v17 = vrot.slane %v2728_v62, 4  ;;  %v2794_v10 = vsel %vm1483_vm11, %v5357_v49, %v2781_v56 }
 0xb2b   : > { %v2961_v22 = vsel %vm1659_vm15, %v2948_v11, 0  ;;  %v2700_v50 = vsel %vm1384_vm6, 0.0, %v2694_v3  ;;  %v2800_v23 = vpack.c.bf16 %v2796_v60, %v2794_v10  ;;  %v2793_v11 = vsel %vm1483_vm11, %v5355_v47, %v2780_v16 }
 0xb2c   : > { %2969 = vmatpush1.bf16.msra.mxu1 %v2961_v22  ;;  %v2701_v8 = vmul.f32 %v4824_v42, %v2700_v50  ;;  %v2801_v22 = vpack.c.bf16 %v5471_v53, %v5471_v53  ;;  %v3207_v62 = vld [vmem:[%s6062_s23 + $0x8] sm:$0xff]  ;;  %v3286_v50 = vld [vmem:[%s6063_s17] sm:$0x3f]  ;;  %s6064_s17 = sld [smem:[#allocation27_spill]] }
 0xb2e   : > { %v4302_v27 = vpop.permute.xlu0 %4301  ;;  %v2814_v49 = vsel %vm1509_vm10, %v2801_v22, 0 }
 0xb2f   : > { %4122 = vmatmul.mubr.msk.bf16.vlgmr.msra.gmra.mrb[20].mxu1 %vm1655_vm1, %v2950_v24  ;;  %v4303_v4 = vunpack.i.l.bf16 %v4302_v27  ;;  %v4304_v43 = vunpack.i.h.bf16 %v4302_v27 }
 0xb30   : > { %3264 = vmatprep.mubr.bf16.mxu1 %v4450_v0 }
 0xb31   : > { %v2709_v38 = vsel %vm1331_vm0, 0.0, %v4303_v4  ;;  %v2707_v12 = vsel %vm1331_vm0, %v4303_v4, %v4304_v43  ;;  %v3136_v43 = vld [vmem:[%s6060_s21] sm:$0x3]  ;;  %s6065_s21 = sld [smem:[#allocation29_spill]] }
 0xb32   : > { %v2768_v57 = vrot.slane %v2709_v38, 4  ;;  %v2713_v30 = vpop.permute.xlu0 %2712  ;;  %v2769_v35 = vrot.slane %v2707_v12, 4 }
 0xb34   : > { %v2955_v6 = vpop.permute.xlu1 %2954  ;;  %v2789_v1 = vsel %vm1483_vm11, %v2701_v8, %v2768_v57 }
 0xb38   : > { %v2723_v21 = vpop.permute.xlu1 %2722 }
 0xb39   : > { %v2724_v55 = vsel %vm1413_vm8, %v2721_v13, %v2723_v21  ;;  %v2799_v13 = vpack.c.bf16 %v2795_v54, %v2793_v11 }
 0xb3a   : > { %v2729_v51 = vmul.f32 %v4827_v48, %v2724_v55  ;;  %v2804_v55 = vld [vmem:[%s6061_s14] sm:$0xf]  ;;  %s6066_s14 = sld [smem:[#allocation31_spill]] }
 0xb3c   : > { %v2696_v44 = vpop.permute.xlu1 %2695  ;;  %v2775_v18 = vrot.slane %v2729_v51, 4 }
 0xb3d   : > { %v2697_v37 = vsel %vm1384_vm6, %v2694_v3, %v2696_v44  ;;  %v3206_v44 = vld [vmem:[%s6062_s23] sm:$0xff] }
 0xb3e   : > { %v2702_v40 = vmul.f32 %v4827_v48, %v2697_v37 }
 0xb40   : > { %v2711_v20 = vpop.permute.xlu1 %2710  ;;  %v2790_v63 = vsel %vm1483_vm11, %v2702_v40, %v2769_v35  ;;  %v3285_v59 = vld [vmem:[%s6066_s14] sm:$0x7]  ;;  %s6069_s14 = sld [smem:[#allocation33_spill]] }
 0xb41   : > { %v2714_v58 = vsel %vm1402_vm4, %v2711_v20, %v2713_v30  ;;  %v2717_v45 = vsel %vm1402_vm4, 0.0, %v2711_v20 }
 0xb42   : > { %v2718_v36 = vmul.f32 %v4820_v39, %v2717_v45  ;;  %v2719_v31 = vmul.f32 %v4814_v34, %v2714_v58 }
 0xb44   : > { %v2791_v61 = vsel %vm1483_vm11, %v2718_v36, %v2774_v17  ;;  %v2792_v14 = vsel %vm1483_vm11, %v2719_v31, %v2775_v18 }
 0xb45   : > { %v2798_v5 = vpack.c.bf16 %v2792_v14, %v2790_v63  ;;  %v2797_v7 = vpack.c.bf16 %v2791_v61, %v2789_v1 }
 0xb47   : > { %2819 = vmatprep.subr.bf16.mxu0 %v2798_v5 }
 0xb48   : > { %2820 = vmatpush1.bf16.msra.mxu0 %v2797_v7 }
 0xb49   : > { %2821 = vmatprep.subr.bf16.mxu0 %v2800_v23 }
 0xb4c   : > { %2822 = vmatpush1.bf16.msra.mxu0 %v2799_v13 }
 0xb4d   : > { %4119 = vmatprep.subr.msk.bf16.mxu0 %vm1509_vm10, %v2802_v9 }
 0xb50   : > { %2824 = vmatpush1.bf16.msra.mxu0 %v2814_v49 }
 0xb53   : > { %4120 = vmatmul.mubr.msk.bf16.vlgmr.msra.gmra.mrb[24].mxu0 %vm1505_vm3, %v2803_v25 }
 0xb54   : > { %3183 = vmatprep.mubr.bf16.mxu0 %v4450_v0 }
 0xc02   : > { %v3000_v24 = vpop.f32.mrb[20].mxu1 }
 0xc03   : > { %v3001_v47 = vadd.f32 %v3000_v24, %v2955_v6  ;;  %v3002_v3 = vpop.f32.mrb[21].mxu1 }
 0xc04   : > { %v3004_v27 = vpop.f32.mrb[22].mxu1  ;;  %v3003_v32 = vadd.f32 %v3002_v3, %v2955_v6 }
 0xc05   : > { %v5521_v21 = vmax.f32 %v3001_v47, 0.0  ;;  %v3005_v4 = vpop.f32.mrb[23].mxu1 }
 0xc06   : > { %v5527_v53 = vmax.f32 %v3003_v32, 0.0 }
 0xc07   : > { %3038 = vrot.lane.b32.xlu1 %v5521_v21, %s6052_s19  ;;  %3028 = vrot.lane.b32.xlu0 %v5521_v21, %s6035_s9 }
 0xc08   : > { %v4305_v6 = vpack.i.bf16 %v5527_v53, %v5521_v21  ;;  %v4310_v2 = vpack.i.bf16 %v5521_v21, %v5527_v53 }
 0xc0b   : > { %3050 = vrot.lane.b32.xlu1 %v5527_v53, %s6038_s13  ;;  %3048 = vrot.lane.b32.xlu0 %v5521_v21, %s6038_s13 }
 0xc0f   : > { %3030 = vrot.lane.b32.xlu1 %v5527_v53, %s6035_s9  ;;  %3011 = vrot.lane.b32.xlu0 %v5521_v21, %s6043_s28 }
 0xc13   : > { %3060 = vrot.lane.b32.xlu1 %v5527_v53, %s6051_s1  ;;  %4306 = vrot.lane.b32.xlu0 %v4305_v6, %s6044_s3 }
 0xc17   : > { %3013 = vrot.lane.b32.xlu1 %v5527_v53, %s6043_s28  ;;  %3040 = vrot.lane.b32.xlu0 %v5527_v53, %s6052_s19 }
 0xc1b   : > { %3058 = vrot.lane.b32.xlu1 %v5521_v21, %s6051_s1  ;;  %4311 = vrot.lane.b32.xlu0 %v4310_v2, %s6040_s5 }
 0xc1f   : > { %3075 = vrot.lane.b32.xlu1 %v5521_v21, %s6045_s8  ;;  %3077 = vrot.lane.b32.xlu0 %v5527_v53, %s6045_s8 }
 0xc23   : > { %3139 = vperm.xlu1 %4249, %v3136_v43   ;;  %2807 = vperm.xlu0 %4238, %v2804_v55  }
 0xc26   : > { %v5559_v38 = vpop.f32.mrb[24].mxu0 }
 0xc27   : > { %3210 = vperm.xlu1 %4249, %v3206_v44   ;;  %3215 = vperm.xlu0 %4238, %v3207_v62   ;;  %v5561_v37 = vpop.f32.mrb[25].mxu0 }
 0xc28   : > { %v2857_v51 = vpop.f32.mrb[26].mxu0 }
 0xc29   : > { %v2858_v52 = vpop.f32.mrb[27].mxu0 }
 0xc2b   : > { %3289 = vperm.xlu1 %4249, %v3286_v50  }
 0xc79   : > { %v3039_v12 = vpop.permute.xlu1 %3038  ;;  %v3029_v56 = vpop.permute.xlu0 %3028 }
 0xc7a   : > { %v3045_v15 = vsel %vm1413_vm8, 0.0, %v3039_v12  ;;  %v3035_v60 = vsel %vm1402_vm4, 0.0, %v3029_v56 }
 0xc7b   : > { %v3046_v11 = vmul.f32 %v4824_v42, %v3045_v15  ;;  %v3036_v13 = vmul.f32 %v4820_v39, %v3035_v60 }
 0xc7d   : > { %v3051_v57 = vpop.permute.xlu1 %3050  ;;  %v3049_v30 = vpop.permute.xlu0 %3048  ;;  %v3098_v52 = vrot.slane %v3046_v11, 2  ;;  %v3135_v11 = vld [vmem:[%s6064_s17] sm:$0x1]  ;;  %s6067_s17 = sld [smem:[#allocation36_spill]] }
 0xc7e   : > { %v3055_v17 = vsel %vm1424_vm2, %v3051_v57, 0.0  ;;  %v3052_v8 = vsel %vm1424_vm2, %v3049_v30, %v3051_v57 }
 0xc7f   : > { %v3057_v61 = vmul.f32 %v4814_v34, %v3055_v17  ;;  %v3056_v63 = vmul.f32 %v4820_v39, %v3052_v8 }
 0xc81   : > { %v3031_v40 = vpop.permute.xlu1 %3030  ;;  %v3012_v20 = vpop.permute.xlu0 %3011  ;;  %v3105_v3 = vrot.slane %v3057_v61, 6  ;;  %v3104_v27 = vrot.slane %v3056_v63, 6 }
 0xc82   : > { %v3032_v35 = vsel %vm1402_vm4, %v3029_v56, %v3031_v40  ;;  %v3018_v14 = vsel %vm1384_vm6, 0.0, %v3012_v20 }
 0xc83   : > { %v3037_v5 = vmul.f32 %v4814_v34, %v3032_v35  ;;  %v3019_v49 = vmul.f32 %v4824_v42, %v3018_v14  ;;  %v3126_v30 = vsel %vm1509_vm10, %v5527_v53, %v3105_v3  ;;  %v3125_v40 = vsel %vm1509_vm10, %v5521_v21, %v3104_v27 }
 0xc85   : > { %v3061_v58 = vpop.permute.xlu1 %3060  ;;  %v4307_v45 = vpop.permute.xlu0 %4306  ;;  %v3093_v32 = vrot.slane %v3037_v5, 4 }
 0xc86   : > { %v3065_v18 = vsel %vm1435_vm9, %v3061_v58, 0.0  ;;  %v4309_v36 = vunpack.i.h.bf16 %v4307_v45  ;;  %v4308_v31 = vunpack.i.l.bf16 %v4307_v45 }
 0xc87   : > { %v3067_v7 = vmul.f32 %v4827_v48, %v3065_v18 }
 0xc88   : > { %v3025_v1 = vsel %vm1331_vm0, %v4308_v31, %v4309_v36  ;;  %v3027_v16 = vsel %vm1331_vm0, 0.0, %v4308_v31 }
 0xc89   : > { %v3086_v10 = vrot.slane %v3027_v16, 6  ;;  %v3014_v54 = vpop.permute.xlu1 %3013  ;;  %v3041_v23 = vpop.permute.xlu0 %3040  ;;  %v3087_v25 = vrot.slane %v3025_v1, 6  ;;  %v3111_v4 = vrot.slane %v3067_v7, 4 }
 0xc8a   : > { %v3015_v9 = vsel %vm1384_vm6, %v3012_v20, %v3014_v54  ;;  %v3042_v22 = vsel %vm1413_vm8, %v3039_v12, %v3041_v23  ;;  %v3092_v12 = vrot.slane %v3036_v13, 4 }
 0xc8b   : > { %v3020_v24 = vmul.f32 %v4827_v48, %v3015_v9  ;;  %v3047_v47 = vmul.f32 %v4827_v48, %v3042_v22  ;;  %v3119_v6 = vsel %vm1509_vm10, %v3019_v49, %v3086_v10  ;;  %v3128_v60 = vsel %vm1483_vm11, %v3126_v30, %v3111_v4 }
 0xc8c   : > { %v3121_v36 = vsel %vm1483_vm11, %v3119_v6, %v3092_v12 }
 0xc8d   : > { %v3120_v2 = vsel %vm1509_vm10, %v3020_v24, %v3087_v25  ;;  %v3059_v43 = vpop.permute.xlu1 %3058  ;;  %v4312_v55 = vpop.permute.xlu0 %4311  ;;  %v3099_v44 = vrot.slane %v3047_v47, 2  ;;  %v3123_v16 = vsel %vm1635_vm12, %v3121_v36, %v3098_v52 }
 0xc8e   : > { %v3062_v62 = vsel %vm1435_vm9, %v3059_v43, %v3061_v58  ;;  %v4314_v50 = vunpack.i.h.bf16 %v4312_v55  ;;  %v4313_v51 = vunpack.i.l.bf16 %v4312_v55  ;;  %v3122_v57 = vsel %vm1483_vm11, %v3120_v2, %v3093_v32 }
 0xc8f   : > { %v3066_v56 = vmul.f32 %v4824_v42, %v3062_v62  ;;  %v3124_v53 = vsel %vm1635_vm12, %v3122_v57, %v3099_v44 }
 0xc90   : > { %v3072_v20 = vsel %vm1446_vm13, %v4314_v50, %v4313_v51  ;;  %v3074_v17 = vsel %vm1446_vm13, %v4313_v51, 0.0 }
 0xc91   : > { %v3110_v8 = vrot.slane %v3066_v56, 4  ;;  %v3115_v58 = vrot.slane %v3072_v20, 2  ;;  %v3116_v45 = vrot.slane %v3074_v17, 2  ;;  %v3076_v35 = vpop.permute.xlu1 %3075  ;;  %v3078_v18 = vpop.permute.xlu0 %3077 }
 0xc92   : > { %v3079_v31 = vsel %vm1454_vm14, %v3076_v35, %v3078_v18  ;;  %v3082_v15 = vsel %vm1454_vm14, %v3078_v18, 0.0 }
 0xc93   : > { %v3127_v21 = vsel %vm1483_vm11, %v3125_v40, %v3110_v8  ;;  %v3083_v61 = vmul.f32 %v4820_v39, %v3079_v31  ;;  %v3084_v63 = vmul.f32 %v4814_v34, %v3082_v15  ;;  %v3130_v14 = vsel %vm1635_vm12, %v3128_v60, %v3116_v45 }
 0xc94   : > { %v3132_v1 = vpack.c.bf16 %v3130_v14, %v3124_v53  ;;  %v3129_v5 = vsel %vm1635_vm12, %v3127_v21, %v3115_v58 }
 0xc95   : > { %v3134_v7 = vpack.c.bf16 %v3084_v63, %v3084_v63  ;;  %v3131_v10 = vpack.c.bf16 %v3129_v5, %v3123_v16  ;;  %v3133_v54 = vpack.c.bf16 %v3083_v61, %v3083_v61 }
 0xc96   : > { %3151 = vmatprep.subr.bf16.mxu0 %v3132_v1 }
 0xc97   : > { %3152 = vmatpush1.bf16.msra.mxu0 %v3131_v10  ;;  %v3146_v23 = vsel %vm1659_vm15, %v3133_v54, 0  ;;  %v3598_v54 = vld [vmem:[%s6067_s17] sm:$0x3]  ;;  %s6070_s17 = sld [smem:[#allocation38_spill]] }
 0xc98   : > { %4123 = vmatprep.subr.msk.bf16.mxu0 %vm1659_vm15, %v3134_v7 }
 0xc9b   : > { %3154 = vmatpush1.bf16.msra.mxu0 %v3146_v23 }
 0xc9e   : > { %4124 = vmatmul.mubr.msk.bf16.vlgmr.msra.gmra.mrb[28].mxu0 %vm1655_vm1, %v3135_v11 }
 0xc9f   : > { %3327 = vmatprep.mubr.bf16.mxu0 %v4450_v0 }
 0xca2   : > { %v2808_v13 = vpop.permute.xlu0 %2807  ;;  %v3140_v9 = vpop.permute.xlu1 %3139 }
 0xca3   : > { %v2854_v49 = vadd.f32 %v5559_v38, %v2808_v13  ;;  %v2856_v47 = vadd.f32 %v5561_v37, %v2808_v13  ;;  %v4342_v37 = vld [vmem:[%s6065_s21] sm:$0xff]   ;;  %s6068_s21 = sld [smem:[#allocation35_spill]] }
 0xca5   : > { %v2860_v2 = vmax.f32 %v2854_v49, 0.0  ;;  %v2861_v55 = vmax.f32 %v2856_v47, 0.0 }
 0xca6   : > { %v3211_v12 = vpop.permute.xlu1 %3210  ;;  %v3216_v40 = vpop.permute.xlu0 %3215 }
 0xd71   : > { %v3185_v22 = vpop.f32.mrb[28].mxu0 }
 0xd72   : > { %v3186_v25 = vadd.f32 %v3185_v22, %v3140_v9  ;;  %v3187_v24 = vpop.f32.mrb[29].mxu0 }
 0xd73   : > { %v3188_v3 = vadd.f32 %v3187_v24, %v3140_v9  ;;  %v3189_v27 = vpop.f32.mrb[30].mxu0 }
 0xd74   : > { %v3192_v32 = vmax.f32 %v3186_v25, 0.0  ;;  %v3190_v4 = vpop.f32.mrb[31].mxu0 }
 0xd75   : > { %v3193_v6 = vmax.f32 %v3188_v3, 0.0 }
 0xd76   : > { %v3196_v43 = vrot.slane %v3192_v32, 4 }
 0xd77   : > { %v3197_v44 = vrot.slane %v3193_v6, 4 }
 0xd78   : > { %v3200_v62 = vsel %vm1483_vm11, %v2860_v2, %v3196_v43 }
 0xd79   : > { %v3201_v50 = vsel %vm1483_vm11, %v2861_v55, %v3197_v44  ;;  %v3202_v51 = vpack.c.bf16 %v3200_v62, %v3200_v62 }
 0xd7a   : > { %v3203_v38 = vpack.c.bf16 %v3201_v50, %v3201_v50 }
 0xd7b   : > { %v3227_v52 = vsel %vm1927_vm5, %v3202_v51, 0 }
 0xd7c   : > { %4126 = vmatprep.subr.msk.bf16.mxu1 %vm1927_vm5, %v3203_v38 }
 0xd7d   : > { %3233 = vmatpush1.bf16.msra.mxu1 %v3227_v52 }
 0xd80   : > { %4127 = vmatmul.mubr.msk.bf16.vlgmr.msra.gmra.mrb[24].mxu1 %vm1923_vm7, %v4342_v37 }
 0xd81   : > { %3498 = vmatprep.mubr.bf16.mxu1 %v4450_v0 }
 0xe53   : > { %v3266_v56 = vpop.f32.mrb[24].mxu1 }
 0xe54   : > { %v3267_v57 = vadd.f32 %v3266_v56, %v3211_v12  ;;  %v3268_v30 = vpop.f32.mrb[25].mxu1 }
 0xe55   : > { %v3269_v20 = vadd.f32 %v3268_v30, %v3211_v12  ;;  %v3270_v17 = vpop.f32.mrb[26].mxu1 }
 0xe56   : > { %v3271_v8 = vadd.f32 %v3270_v17, %v3216_v40  ;;  %v3272_v58 = vpop.f32.mrb[27].mxu1  ;;  %v5626_v18 = vadd.f32 %v3267_v57, %v2632_v41 }
 0xe57   : > { %v5622_v45 = vadd.f32 %v3269_v20, %v2633_v19  ;;  %v3273_v35 = vadd.f32 %v3272_v58, %v3216_v40 }
 0xe58   : > { %v5630_v36 = vadd.f32 %v3271_v8, %v2634_v29  ;;  %v3279_v19 = vmax.f32 %v5626_v18, 0.0  ;;  %v3290_v29 = vpop.permute.xlu1 %3289 }
 0xe59   : > { %v5634_v31 = vadd.f32 %v3273_v35, %v2635_v33  ;;  %v3280_v53 = vmax.f32 %v5622_v45, 0.0 }
 0xe5a   : > { %v3281_v15 = vmax.f32 %v5630_v36, 0.0 }
 0xe5b   : > { %v3282_v26 = vmax.f32 %v5634_v31, 0.0 }
 0xe5c   : > { %v3283_v28 = vpack.c.bf16 %v3281_v15, %v3279_v19 }
 0xe5d   : > { %v3284_v46 = vpack.c.bf16 %v3282_v26, %v3280_v53 }
 0xe5f   : > { %3295 = vmatprep.subr.bf16.mxu0 %v3284_v46 }
 0xe60   : > { %3296 = vmatpush1.bf16.msra.mxu0 %v3283_v28 }
 0xe63   : > { %4128 = vmatmul.mubr.msk.bf16.vlgmr.msra.gmra.mrb[32].mxu0 %vm1331_vm0, %v3285_v59 }
 0xe64   : > { %3645 = vmatprep.mubr.bf16.mxu0 %v4450_v0 }
 0xf36   : > { %v3329_v33 = vpop.f32.mrb[32].mxu0 }
 0xf37   : > { %v3330_v41 = vadd.f32 %v3329_v33, %v3290_v29  ;;  %v3331_v60 = vpop.f32.mrb[33].mxu0 }
 0xf38   : > { %v3332_v21 = vadd.f32 %v3331_v60, %v3290_v29  ;;  %v3333_v61 = vpop.f32.mrb[34].mxu0 }
 0xf39   : > { %v5651_v63 = vmax.f32 %v3330_v41, 0.0  ;;  %v3334_v14 = vpop.f32.mrb[35].mxu0 }
 0xf3a   : > { %v5653_v1 = vmax.f32 %v3332_v21, 0.0 }
 0xf3b   : > { %3377 = vrot.lane.b32.xlu1 %v5651_v63, %s6038_s13  ;;  %v5660_v16 = vrot.slane %v5651_v63, 4 }
 0xf3c   : > { %3379 = vrot.lane.b32.xlu0 %v5653_v1, %s6038_s13  ;;  %v5667_v5 = vrot.slane %v5653_v1, 4  ;;  %v4320_v10 = vpack.i.bf16 %v5651_v63, %v5653_v1  ;;  %v4325_v23 = vpack.i.bf16 %v5653_v1, %v5651_v63 }
 0xf3e   : > { %v4315_v7 = vpack.i.bf16 %v5667_v5, %v5660_v16 }
 0xf3f   : > { %3389 = vrot.lane.b32.xlu1 %v5653_v1, %s6051_s1 }
 0xf40   : > { %3528 = vrot.lane.b32.xlu0 %v5660_v16, %s6035_s9 }
 0xf43   : > { %3538 = vrot.lane.b32.xlu1 %v5660_v16, %s6052_s19 }
 0xf44   : > { %3511 = vrot.lane.b32.xlu0 %v5660_v16, %s6043_s28 }
 0xf47   : > { %3530 = vrot.lane.b32.xlu1 %v5667_v5, %s6035_s9 }
 0xf48   : > { %4316 = vrot.lane.b32.xlu0 %v4315_v7, %s6044_s3 }
 0xf4b   : > { %3513 = vrot.lane.b32.xlu1 %v5667_v5, %s6043_s28 }
 0xf4c   : > { %3540 = vrot.lane.b32.xlu0 %v5667_v5, %s6052_s19 }
 0xf4f   : > { %4321 = vrot.lane.b32.xlu1 %v4320_v10, %s6040_s5 }
 0xf50   : > { %3387 = vrot.lane.b32.xlu0 %v5651_v63, %s6051_s1 }
 0xf53   : > { %3406 = vrot.lane.b32.xlu1 %v5653_v1, %s6045_s8 }
 0xf54   : > { %3404 = vrot.lane.b32.xlu0 %v5651_v63, %s6045_s8 }
 0xf57   : > { %3367 = vrot.lane.b32.xlu1 %v5651_v63, %s6052_s19 }
 0xf58   : > { %3601 = vperm.xlu0 %4238, %v3598_v54  }
 0xf5b   : > { %3340 = vrot.lane.b32.xlu1 %v5651_v63, %s6043_s28 }
 0xf5c   : > { %3369 = vrot.lane.b32.xlu0 %v5653_v1, %s6052_s19 }
 0xf5f   : > { %4326 = vrot.lane.b32.xlu1 %v4325_v23, %s6044_s3 }
 0xf60   : > { %3342 = vrot.lane.b32.xlu0 %v5653_v1, %s6043_s28 }
 0xf63   : > { %3359 = vrot.lane.b32.xlu1 %v5653_v1, %s6035_s9 }
 0xf64   : > { %3357 = vrot.lane.b32.xlu0 %v5651_v63, %s6035_s9 }
 0xfad   : > { %v3378_v11 = vpop.permute.xlu1 %3377 }
 0xfae   : > { %v3380_v13 = vpop.permute.xlu0 %3379 }
 0xfaf   : > { %v3384_v24 = vsel %vm1424_vm2, %v3380_v13, 0.0  ;;  %v3381_v47 = vsel %vm1424_vm2, %v3378_v11, %v3380_v13 }
 0xfb0   : > { %v5710_v32 = vmul.f32 %v4814_v34, %v3384_v24  ;;  %v5714_v43 = vmul.f32 %v4820_v39, %v3381_v47 }
 0xfb1   : > { %v3390_v9 = vpop.permute.xlu1 %3389 }
 0xfb2   : > { %v3529_v22 = vpop.permute.xlu0 %3528  ;;  %v3394_v55 = vsel %vm1435_vm9, %v3390_v9, 0.0  ;;  %v3568_v40 = vrot.slane %v5710_v32, 2  ;;  %v3567_v46 = vrot.slane %v5714_v43, 2 }
 0xfb3   : > { %v3535_v44 = vsel %vm1402_vm4, 0.0, %v3529_v22  ;;  %v5732_v28 = vmul.f32 %v4827_v48, %v3394_v55 }
 0xfb4   : > { %v3536_v20 = vmul.f32 %v4820_v39, %v3535_v44  ;;  %v3588_v7 = vsel %vm1509_vm10, %v5667_v5, %v3568_v40 }
 0xfb5   : > { %v3539_v49 = vpop.permute.xlu1 %3538 }
 0xfb6   : > { %v3512_v25 = vpop.permute.xlu0 %3511  ;;  %v3545_v62 = vsel %vm1413_vm8, 0.0, %v3539_v49  ;;  %v3555_v10 = vrot.slane %v3536_v20, 4 }
 0xfb7   : > { %v3518_v50 = vsel %vm1384_vm6, 0.0, %v3512_v25  ;;  %v3546_v59 = vmul.f32 %v4824_v42, %v3545_v62 }
 0xfb8   : > { %v3519_v58 = vmul.f32 %v4824_v42, %v3518_v50 }
 0xfb9   : > { %v3531_v3 = vpop.permute.xlu1 %3530 }
 0xfba   : > { %v4317_v27 = vpop.permute.xlu0 %4316  ;;  %v3532_v4 = vsel %vm1402_vm4, %v3529_v22, %v3531_v3  ;;  %v3561_v3 = vrot.slane %v3546_v59, 2 }
 0xfbb   : > { %v4319_v6 = vunpack.i.h.bf16 %v4317_v27  ;;  %v4318_v2 = vunpack.i.l.bf16 %v4317_v27  ;;  %v3537_v37 = vmul.f32 %v4814_v34, %v3532_v4 }
 0xfbd   : > { %v3525_v51 = vsel %vm1331_vm0, %v4318_v2, %v4319_v6  ;;  %v3527_v38 = vsel %vm1331_vm0, 0.0, %v4318_v2  ;;  %v3514_v52 = vpop.permute.xlu1 %3513  ;;  %v3556_v41 = vrot.slane %v3537_v37, 4  ;;  %v3590_v2 = vsel %vm1483_vm11, %v3588_v7, %v5732_v28 }
 0xfbe   : > { %v3549_v12 = vrot.slane %v3527_v38, 6  ;;  %v3550_v56 = vrot.slane %v3525_v51, 6  ;;  %v3515_v57 = vsel %vm1384_vm6, %v3512_v25, %v3514_v52  ;;  %v3541_v30 = vpop.permute.xlu0 %3540  ;;  %v3587_v25 = vsel %vm1509_vm10, %v5660_v16, %v3567_v46 }
 0xfbf   : > { %v3520_v17 = vmul.f32 %v4827_v48, %v3515_v57  ;;  %v3542_v8 = vsel %vm1413_vm8, %v3539_v49, %v3541_v30 }
 0xfc0   : > { %v3547_v35 = vmul.f32 %v4827_v48, %v3542_v8  ;;  %v3581_v60 = vsel %vm1509_vm10, %v3519_v58, %v3549_v12 }
 0xfc1   : > { %v3582_v29 = vsel %vm1509_vm10, %v3520_v17, %v3550_v56  ;;  %v4322_v33 = vpop.permute.xlu1 %4321  ;;  %v3597_v17 = vld [vmem:[%s6068_s21] sm:$0x1]  ;;  %s6071_s21 = sld [smem:[#allocation34_spill]] }
 0xfc2   : > { %v4324_v21 = vunpack.i.h.bf16 %v4322_v33  ;;  %v4323_v61 = vunpack.i.l.bf16 %v4322_v33  ;;  %v3388_v14 = vpop.permute.xlu0 %3387  ;;  %v3562_v54 = vrot.slane %v3547_v35, 2  ;;  %v3584_v49 = vsel %vm1483_vm11, %v3582_v29, %v3556_v41 }
 0xfc3   : > { %v3391_v23 = vsel %vm1435_vm9, %v3388_v14, %v3390_v9  ;;  %v3583_v9 = vsel %vm1483_vm11, %v3581_v60, %v3555_v10 }
 0xfc4   : > { %v5741_v11 = vsel %vm1446_vm13, %v4324_v21, %v4323_v61  ;;  %v5744_v13 = vsel %vm1446_vm13, %v4323_v61, 0.0  ;;  %v5747_v22 = vmul.f32 %v4824_v42, %v3391_v23  ;;  %v3586_v44 = vsel %vm1635_vm12, %v3584_v49, %v3562_v54 }
 0xfc5   : > { %v3571_v5 = vrot.slane %v5741_v11, 6  ;;  %v3572_v24 = vrot.slane %v5744_v13, 6  ;;  %v3407_v47 = vpop.permute.xlu1 %3406  ;;  %v3585_v38 = vsel %vm1635_vm12, %v3583_v9, %v3561_v3  ;;  %v3433_v54 = vrot.slane %v5744_v13, 4 }
 0xfc6   : > { %v3589_v27 = vsel %vm1483_vm11, %v3587_v25, %v5747_v22  ;;  %v3411_v4 = vsel %vm1454_vm14, %v3407_v47, 0.0  ;;  %v3405_v6 = vpop.permute.xlu0 %3404  ;;  %v3428_v49 = vrot.slane %v5710_v32, 4  ;;  %v3432_v32 = vrot.slane %v5741_v11, 4 }
 0xfc7   : > { %v5761_v55 = vmul.f32 %v4814_v34, %v3411_v4  ;;  %v3408_v16 = vsel %vm1454_vm14, %v3405_v6, %v3407_v47  ;;  %v3592_v62 = vsel %vm1635_vm12, %v3590_v2, %v3572_v24  ;;  %v3591_v52 = vsel %vm1635_vm12, %v3589_v27, %v3571_v5 }
 0xfc8   : > { %v5767_v50 = vmul.f32 %v4820_v39, %v3408_v16  ;;  %v3594_v51 = vpack.c.bf16 %v3592_v62, %v3586_v44  ;;  %v3593_v12 = vpack.c.bf16 %v3591_v52, %v3585_v38  ;;  %v3443_v44 = vsel %vm1483_vm11, %v5732_v28, %v3433_v54 }
 0xfc9   : > { %v3578_v37 = vrot.slane %v5761_v55, 4  ;;  %v3368_v40 = vpop.permute.xlu1 %3367  ;;  %v3442_v11 = vsel %vm1483_vm11, %v5747_v22, %v3432_v32  ;;  %v3450_v22 = vld [vmem:[%s6069_s14] sm:$0x3]  ;;  %s4460_s14 = smov [#allocation2]  }
 0xfca   : > { %v3577_v56 = vrot.slane %v5767_v50, 4  ;;  %3613 = vmatprep.subr.bf16.mxu0 %v3594_v51  ;;  %v3374_v29 = vsel %vm1413_vm8, 0.0, %v3368_v40 }
 0xfcb   : > { %v3596_v57 = vpack.c.bf16 %v3578_v37, %v3578_v37  ;;  %3614 = vmatpush1.bf16.msra.mxu0 %v3593_v12  ;;  %v3375_v21 = vmul.f32 %v4824_v42, %v3374_v29  ;;  %v3427_v37 = vrot.slane %v5714_v43, 4  ;;  %v3449_v43 = vpack.c.bf16 %v5761_v55, %v5761_v55  ;;  %v3783_v29 = vld [vmem:[%s6070_s17] sm:$0x3]  ;;  %s4348_s17 = sshll.u32 %s4460_s14, 4  ;;  %s4349_s17 = int_to_ptr.vmem [resolvable:$false] %s4348_s17 }
 0xfcc   : > { %v3595_v30 = vpack.c.bf16 %v3577_v56, %v3577_v56 }
 0xfcd   : > { %4131 = vmatprep.subr.msk.bf16.mxu0 %vm1659_vm15, %v3596_v57  ;;  %v3341_v8 = vpop.permute.xlu1 %3340  ;;  %v3421_v9 = vrot.slane %v3375_v21, 4  ;;  %v3441_v57 = vsel %vm1483_vm11, %v5653_v1, %v3428_v49 }
 0xfce   : > { %v3608_v20 = vsel %vm1659_vm15, %v3595_v30, 0  ;;  %v3347_v7 = vsel %vm1384_vm6, 0.0, %v3341_v8  ;;  %v3447_v28 = vpack.c.bf16 %v3443_v44, %v3441_v57  ;;  %v3440_v30 = vsel %vm1483_vm11, %v5651_v63, %v3427_v37 }
 0xfcf   : > { %3616 = vmatpush1.bf16.msra.mxu0 %v3608_v20  ;;  %v3348_v3 = vmul.f32 %v4824_v42, %v3347_v7  ;;  %v3448_v20 = vpack.c.bf16 %v5767_v50, %v5767_v50 }
 0xfd1   : > { %v4327_v35 = vpop.permute.xlu1 %4326  ;;  %v3461_v1 = vsel %vm1509_vm10, %v3448_v20, 0 }
 0xfd2   : > { %4132 = vmatmul.mubr.msk.bf16.vlgmr.msra.gmra.mrb[36].mxu0 %vm1655_vm1, %v3597_v17  ;;  %v4328_v59 = vunpack.i.l.bf16 %v4327_v35  ;;  %v4329_v33 = vunpack.i.h.bf16 %v4327_v35 }
 0xfd3   : > { %3911 = vmatprep.mubr.bf16.mxu0 %v4450_v0 }
 0xfd4   : > { %v3356_v61 = vsel %vm1331_vm0, 0.0, %v4328_v59  ;;  %v3354_v23 = vsel %vm1331_vm0, %v4328_v59, %v4329_v33  ;;  %v3451_v33 = vld [vmem:[%s6071_s21] sm:$0xf] }
 0xfd5   : > { %v3415_v25 = vrot.slane %v3356_v61, 4  ;;  %v3360_v5 = vpop.permute.xlu1 %3359  ;;  %v3416_v6 = vrot.slane %v3354_v23, 4 }
 0xfd7   : > { %v3602_v58 = vpop.permute.xlu0 %3601  ;;  %v3436_v52 = vsel %vm1483_vm11, %v3348_v3, %v3415_v25 }
 0xfdb   : > { %v3370_v46 = vpop.permute.xlu0 %3369 }
 0xfdc   : > { %v3371_v41 = vsel %vm1413_vm8, %v3368_v40, %v3370_v46  ;;  %v3446_v40 = vpack.c.bf16 %v3442_v11, %v3440_v30 }
 0xfdd   : > { %v3376_v10 = vmul.f32 %v4827_v48, %v3371_v41  ;;  %v3853_v41 = vld [vmem:[%s4670_s20] sm:$0xff] }
 0xfdf   : > { %v3343_v60 = vpop.permute.xlu0 %3342  ;;  %v3422_v2 = vrot.slane %v3376_v10, 4 }
 0xfe0   : > { %v3344_v14 = vsel %vm1384_vm6, %v3341_v8, %v3343_v60  ;;  %v3854_v60 = vld [vmem:[%s4670_s20 + $0x8] sm:$0xff] }
 0xfe1   : > { %v3349_v24 = vmul.f32 %v4827_v48, %v3344_v14 }
 0xfe3   : > { %v3358_v47 = vpop.permute.xlu0 %3357  ;;  %v3437_v51 = vsel %vm1483_vm11, %v3349_v24, %v3416_v6 }
 0xfe4   : > { %v3361_v27 = vsel %vm1402_vm4, %v3358_v47, %v3360_v5  ;;  %v3364_v4 = vsel %vm1402_vm4, 0.0, %v3358_v47 }
 0xfe5   : > { %v3365_v13 = vmul.f32 %v4820_v39, %v3364_v4  ;;  %v3366_v16 = vmul.f32 %v4814_v34, %v3361_v27 }
 0xfe7   : > { %v3438_v62 = vsel %vm1483_vm11, %v3365_v13, %v3421_v9  ;;  %v3439_v38 = vsel %vm1483_vm11, %v3366_v16, %v3422_v2 }
 0xfe8   : > { %v3445_v12 = vpack.c.bf16 %v3439_v38, %v3437_v51  ;;  %v3444_v56 = vpack.c.bf16 %v3438_v62, %v3436_v52 }
 0xfea   : > { %3466 = vmatprep.subr.bf16.mxu1 %v3445_v12 }
 0xfeb   : > { %3467 = vmatpush1.bf16.msra.mxu1 %v3444_v56 }
 0xfec   : > { %3468 = vmatprep.subr.bf16.mxu1 %v3447_v28 }
 0xfef   : > { %3469 = vmatpush1.bf16.msra.mxu1 %v3446_v40 }
 0xff0   : > { %4129 = vmatprep.subr.msk.bf16.mxu1 %vm1509_vm10, %v3449_v43 }
 0xff3   : > { %3471 = vmatpush1.bf16.msra.mxu1 %v3461_v1 }
 0xff6   : > { %4130 = vmatmul.mubr.msk.bf16.vlgmr.msra.gmra.mrb[28].mxu1 %vm1505_vm3, %v3450_v22 }
 0xff7   : > { %3830 = vmatprep.mubr.bf16.mxu1 %v4450_v0 }
0x10a5   : > { %v3647_v17 = vpop.f32.mrb[36].mxu0 }
0x10a6   : > { %v3648_v63 = vadd.f32 %v3647_v17, %v3602_v58  ;;  %v3649_v8 = vpop.f32.mrb[37].mxu0 }
0x10a7   : > { %v3651_v35 = vpop.f32.mrb[38].mxu0  ;;  %v3650_v55 = vadd.f32 %v3649_v8, %v3602_v58 }
0x10a8   : > { %v5817_v46 = vmax.f32 %v3648_v63, 0.0  ;;  %v3652_v59 = vpop.f32.mrb[39].mxu0 }
0x10a9   : > { %v5823_v50 = vmax.f32 %v3650_v55, 0.0 }
0x10aa   : > { %3685 = vrot.lane.b32.xlu0 %v5817_v46, %s6052_s19  ;;  %3675 = vrot.lane.b32.xlu1 %v5817_v46, %s6035_s9 }
0x10ab   : > { %v4330_v0 = vpack.i.bf16 %v5823_v50, %v5817_v46  ;;  %v4335_v58 = vpack.i.bf16 %v5817_v46, %v5823_v50 }
0x10ae   : > { %3697 = vrot.lane.b32.xlu0 %v5823_v50, %s6038_s13  ;;  %3695 = vrot.lane.b32.xlu1 %v5817_v46, %s6038_s13  ;;  %s3953_s13 = sshll.u32 %s5042_s2, 4  ;;  %s5918_s13 = int_to_ptr.vmem [resolvable:$true] %s3953_s13 }
0x10af   : > { %p4351_p0 = scmp.lt.s32.totalorder %s5918_s13, %s4349_s17 }
0x10b2   : > { %3677 = vrot.lane.b32.xlu0 %v5823_v50, %s6035_s9  ;;  %3658 = vrot.lane.b32.xlu1 %v5817_v46, %s6043_s28  ;;  %s4145_s9 = sshll.u32 %s4703_s0, 9  ;;  %s4350_s0 = scalar_lea.vmem %s4349_s17, 1024 }
0x10b6   : > { %3707 = vrot.lane.b32.xlu0 %v5823_v50, %s6051_s1  ;;  %4331 = vrot.lane.b32.xlu1 %v4330_v0, %s6044_s3 }
0x10ba   : > { %3660 = vrot.lane.b32.xlu0 %v5823_v50, %s6043_s28  ;;  %3687 = vrot.lane.b32.xlu1 %v5823_v50, %s6052_s19  ;;  %s6073_s19 = sand.u32 1, %s4398_s16   ;;  %s4344_s28 = scalar_lea.vmem %s5918_s13, 512 }
0x10bb   : > { %p4345_p11 = scmp.ne.s32.totalorder %s5918_s13, %s4344_s28  ;;  %p4352_p1 = scmp.lt.s32.totalorder %s4350_s0, %s4344_s28 }
0x10bd   : > { %p4346_p12 = pnand %p4345_p11, %p4720_p5  ;;  %p4353_p2 = por %p4352_p1, %p4351_p0 }
0x10be   : > { %3705 = vrot.lane.b32.xlu0 %v5817_v46, %s6051_s1  ;;  %4336 = vrot.lane.b32.xlu1 %v4335_v58, %s6040_s5  ;;  %s6072_s5 = sld [smem:[#allocation37_spill]]  ;;  %s5922_s1 = scalar_lea.sflag [#allocation3], %s6073_s19 }
0x10bf   : > { %p4347_p13 = pneg %p4346_p12 }
0x10c1   : > { %p4354_p3 = pnand %p4353_p2, %p4347_p13 }
0x10c2   : > { %3722 = vrot.lane.b32.xlu0 %v5817_v46, %s6045_s8  ;;  %3724 = vrot.lane.b32.xlu1 %v5823_v50, %s6045_s8  ;;  %s5916_s8 = scalar_lea.hbm %s4675_s4, %s4145_s9 }
0x10c6   : > { %3786 = vperm.xlu0 %4238, %v3783_v29   ;;  %3454 = vperm.xlu1 %4249, %v3451_v33  }
0x10c9   : > { %v5855_v21 = vpop.f32.mrb[28].mxu1 }
0x10ca   : > { %3857 = vperm.xlu0 %4238, %v3853_v41   ;;  %3862 = vperm.xlu1 %4249, %v3854_v60   ;;  %v5857_v61 = vpop.f32.mrb[29].mxu1 }
0x10cb   : > { %v3504_v14 = vpop.f32.mrb[30].mxu1 }
0x10cc   : > { %v3505_v7 = vpop.f32.mrb[31].mxu1 }
0x111c   : > { %v3686_v10 = vpop.permute.xlu0 %3685  ;;  %v3676_v54 = vpop.permute.xlu1 %3675 }
0x111d   : > { %v3692_v13 = vsel %vm1413_vm8, 0.0, %v3686_v10  ;;  %v3682_v16 = vsel %vm1402_vm4, 0.0, %v3676_v54 }
0x111e   : > { %v3693_v11 = vmul.f32 %v4824_v42, %v3692_v13  ;;  %v3683_v28 = vmul.f32 %v4820_v39, %v3682_v16 }
0x1120   : > { %v3698_v23 = vpop.permute.xlu0 %3697  ;;  %v3696_v49 = vpop.permute.xlu1 %3695  ;;  %v3745_v14 = vrot.slane %v3693_v11, 2  ;;  %v3739_v7 = vrot.slane %v3683_v28, 4 }
0x1121   : > { %v3702_v24 = vsel %vm1424_vm2, %v3698_v23, 0.0  ;;  %v3699_v47 = vsel %vm1424_vm2, %v3696_v49, %v3698_v23 }
0x1122   : > { %v3704_v32 = vmul.f32 %v4814_v34, %v3702_v24  ;;  %v3703_v44 = vmul.f32 %v4820_v39, %v3699_v47 }
0x1124   : > { %v3678_v25 = vpop.permute.xlu0 %3677  ;;  %v3659_v5 = vpop.permute.xlu1 %3658  ;;  %v3752_v17 = vrot.slane %v3704_v32, 6  ;;  %v3751_v63 = vrot.slane %v3703_v44, 6 }
0x1125   : > { %v3679_v27 = vsel %vm1402_vm4, %v3676_v54, %v3678_v25  ;;  %v3665_v62 = vsel %vm1384_vm6, 0.0, %v3659_v5 }
0x1126   : > { %v3684_v52 = vmul.f32 %v4814_v34, %v3679_v27  ;;  %v3666_v43 = vmul.f32 %v4824_v42, %v3665_v62  ;;  %v3773_v54 = vsel %vm1509_vm10, %v5823_v50, %v3752_v17  ;;  %v3772_v23 = vsel %vm1509_vm10, %v5817_v46, %v3751_v63 }
0x1128   : > { %v3708_v9 = vpop.permute.xlu0 %3707  ;;  %v4332_v3 = vpop.permute.xlu1 %4331  ;;  %v3740_v8 = vrot.slane %v3684_v52, 4 }
0x1129   : > { %v3712_v4 = vsel %vm1435_vm9, %v3708_v9, 0.0  ;;  %v4334_v6 = vunpack.i.h.bf16 %v4332_v3  ;;  %v4333_v2 = vunpack.i.l.bf16 %v4332_v3 }
0x112a   : > { %v3714_v37 = vmul.f32 %v4827_v48, %v3712_v4 }
0x112b   : > { %v3672_v51 = vsel %vm1331_vm0, %v4333_v2, %v4334_v6  ;;  %v3674_v38 = vsel %vm1331_vm0, 0.0, %v4333_v2 }
0x112c   : > { %v3733_v12 = vrot.slane %v3674_v38, 6  ;;  %v3661_v56 = vpop.permute.xlu0 %3660  ;;  %v3688_v57 = vpop.permute.xlu1 %3687  ;;  %v3734_v20 = vrot.slane %v3672_v51, 6  ;;  %v3758_v35 = vrot.slane %v3714_v37, 4 }
0x112d   : > { %v3662_v30 = vsel %vm1384_vm6, %v3659_v5, %v3661_v56  ;;  %v3689_v40 = vsel %vm1413_vm8, %v3686_v10, %v3688_v57 }
0x112e   : > { %v3667_v1 = vmul.f32 %v4827_v48, %v3662_v30  ;;  %v3694_v22 = vmul.f32 %v4827_v48, %v3689_v40  ;;  %v3766_v55 = vsel %vm1509_vm10, %v3666_v43, %v3733_v12  ;;  %v3775_v6 = vsel %vm1483_vm11, %v3773_v54, %v3758_v35 }
0x112f   : > { %v3768_v27 = vsel %vm1483_vm11, %v3766_v55, %v3739_v7 }
0x1130   : > { %v3767_v59 = vsel %vm1509_vm10, %v3667_v1, %v3734_v20  ;;  %v3706_v0 = vpop.permute.xlu0 %3705  ;;  %v4337_v58 = vpop.permute.xlu1 %4336  ;;  %v3746_v29 = vrot.slane %v3694_v22, 2  ;;  %v3770_v44 = vsel %vm1635_vm12, %v3768_v27, %v3745_v14 }
0x1131   : > { %v3709_v33 = vsel %vm1435_vm9, %v3706_v0, %v3708_v9  ;;  %v4339_v41 = vunpack.i.h.bf16 %v4337_v58  ;;  %v4338_v60 = vunpack.i.l.bf16 %v4337_v58  ;;  %v3769_v48 = vsel %vm1483_vm11, %v3767_v59, %v3740_v8  ;;  %v4343_v58 = vld [vmem:[%s4665_s6] sm:$0xff]  }
0x1132   : > { %v3713_v10 = vmul.f32 %v4824_v42, %v3709_v33  ;;  %v3771_v50 = vsel %vm1635_vm12, %v3769_v48, %v3746_v29 }
0x1133   : > { %v3719_v49 = vsel %vm1446_vm13, %v4339_v41, %v4338_v60  ;;  %v3721_v25 = vsel %vm1446_vm13, %v4338_v60, 0.0 }
0x1134   : > { %v3757_v5 = vrot.slane %v3713_v10, 4  ;;  %v3762_v24 = vrot.slane %v3719_v49, 2  ;;  %v3763_v47 = vrot.slane %v3721_v25, 2  ;;  %v3723_v9 = vpop.permute.xlu0 %3722  ;;  %v3725_v3 = vpop.permute.xlu1 %3724 }
0x1135   : > { %v3726_v42 = vsel %vm1454_vm14, %v3723_v9, %v3725_v3  ;;  %v3729_v4 = vsel %vm1454_vm14, %v3725_v3, 0.0 }
0x1136   : > { %v3774_v46 = vsel %vm1483_vm11, %v3772_v23, %v3757_v5  ;;  %v3730_v2 = vmul.f32 %v4820_v39, %v3726_v42  ;;  %v3731_v13 = vmul.f32 %v4814_v34, %v3729_v4  ;;  %v3777_v16 = vsel %vm1635_vm12, %v3775_v6, %v3763_v47  ;;  %v3782_v39 = vld [vmem:[%s6072_s5] sm:$0x1] }
0x1137   : > { %v3779_v32 = vpack.c.bf16 %v3777_v16, %v3771_v50  ;;  %v3776_v62 = vsel %vm1635_vm12, %v3774_v46, %v3762_v24 }
0x1138   : > { %v3781_v51 = vpack.c.bf16 %v3731_v13, %v3731_v13  ;;  %v3778_v38 = vpack.c.bf16 %v3776_v62, %v3770_v44  ;;  %v3780_v52 = vpack.c.bf16 %v3730_v2, %v3730_v2 }
0x1139   : > { %3798 = vmatprep.subr.bf16.mxu1 %v3779_v32 }
0x113a   : > { %3799 = vmatpush1.bf16.msra.mxu1 %v3778_v38  ;;  %v3793_v37 = vsel %vm1659_vm15, %v3780_v52, 0 }
0x113b   : > { %4133 = vmatprep.subr.msk.bf16.mxu1 %vm1659_vm15, %v3781_v51 }
0x113e   : > { %3801 = vmatpush1.bf16.msra.mxu1 %v3793_v37 }
0x1141   : > { %4134 = vmatmul.mubr.msk.bf16.vlgmr.msra.gmra.mrb[32].mxu1 %vm1655_vm1, %v3782_v39 }
0x1145   : > { %v3455_v34 = vpop.permute.xlu1 %3454  ;;  %v3787_v12 = vpop.permute.xlu0 %3786 }
0x1146   : > { %v3501_v57 = vadd.f32 %v5855_v21, %v3455_v34  ;;  %v3503_v30 = vadd.f32 %v5857_v61, %v3455_v34 }
0x1148   : > { %v3507_v17 = vmax.f32 %v3501_v57, 0.0  ;;  %v3508_v8 = vmax.f32 %v3503_v30, 0.0 }
0x1214   : > { %v3832_v56 = vpop.f32.mrb[32].mxu1 }
0x1215   : > { %v3833_v11 = vadd.f32 %v3832_v56, %v3787_v12  ;;  %v3834_v28 = vpop.f32.mrb[33].mxu1 }
0x1216   : > { %v3835_v40 = vadd.f32 %v3834_v28, %v3787_v12  ;;  %v3836_v43 = vpop.f32.mrb[34].mxu1 }
0x1217   : > { %v3839_v20 = vmax.f32 %v3833_v11, 0.0  ;;  %v3837_v1 = vpop.f32.mrb[35].mxu1 }
0x1218   : > { %v3840_v22 = vmax.f32 %v3835_v40, 0.0 }
0x1219   : > { %v3843_v63 = vrot.slane %v3839_v20, 4 }
0x121a   : > { %v3844_v35 = vrot.slane %v3840_v22, 4 }
0x121b   : > { %v3847_v21 = vsel %vm1483_vm11, %v3507_v17, %v3843_v63 }
0x121c   : > { %v3848_v55 = vsel %vm1483_vm11, %v3508_v8, %v3844_v35  ;;  %v3849_v61 = vpack.c.bf16 %v3847_v21, %v3847_v21 }
0x121d   : > { %v3850_v59 = vpack.c.bf16 %v3848_v55, %v3848_v55 }
0x121e   : > { %v3874_v0 = vsel %vm1927_vm5, %v3849_v61, 0 }
0x121f   : > { %4136 = vmatprep.subr.msk.bf16.mxu0 %vm1927_vm5, %v3850_v59 }
0x1220   : > { %3880 = vmatpush1.bf16.msra.mxu0 %v3874_v0 }
0x1223   : > { %4137 = vmatmul.mubr.msk.bf16.vlgmr.msra.gmra.mrb[40].mxu0 %vm1923_vm7, %v4343_v58 }
0x1224   : > { %4357 = shalt.err (!%p4354_p3)
}
0x1225   : > { %s4358_s2 = scalar_lea.hbm %s5916_s8, 512  ;;  %s4362_s21 = scalar_lea.hbm %s4675_s4, 1024 }
0x1226   : > { %p4359_p4 = scmp.ne.s32.totalorder %s5916_s8, %s4358_s2  ;;  %p4363_p9 = scmp.lt.u32.totalorder %s5916_s8, %s4675_s4 }
0x1227   : > { %p4364_p10 = scmp.lt.u32.totalorder %s4362_s21, %s4358_s2  ;;  %p4366_p12 = scmp.lt.u32.totalorder %s4358_s2, %s5916_s8 }
0x1228   : > { %p4360_p7 = pnand %p4359_p4, %p4720_p5 }
0x1229   : > { %p4365_p11 = por %p4364_p10, %p4363_p9 }
0x122a   : > { %p4361_p8 = pneg %p4360_p7 }
0x122b   : > { %p4367_p0 = por %p4366_p12, %p4365_p11 }
0x122d   : > { %p4368_p13 = pnand %p4367_p0, %p4361_p8 }
0x122f   : > { %4371 = shalt.err (!%p4368_p13)
}
0x1230   : > { %s4461_s5 = smov 256   ;;  %v3858_v29 = vpop.permute.xlu0 %3857  ;;  %v3863_v14 = vpop.permute.xlu1 %3862  ;;  %s6074_s7 = sshll.u32 %s4735_s11, 5 }
0x1231   : > { %4146 = dma.vmem_to_hbm [thread:$0]  (%p4720_p5), %s5918_s13, 512, %s5916_s8, %s5922_s1, %s4461_s5, %s4461_s5, %s6044_s3  }
0x1232   : > { %s1277_s9 = scalar_lea.vmem %s4680_s12, %s6074_s7 }
0x12f6   : > { %v3913_v33 = vpop.f32.mrb[40].mxu0 }
0x12f7   : > { %v3914_v41 = vadd.f32 %v3913_v33, %v3858_v29  ;;  %v3915_v60 = vpop.f32.mrb[41].mxu0 }
0x12f8   : > { %v3916_v7 = vadd.f32 %v3915_v60, %v3858_v29  ;;  %v3917_v10 = vpop.f32.mrb[42].mxu0 }
0x12f9   : > { %v3922_v48 = vadd.f32 %v3914_v41, %v3279_v19  ;;  %v3918_v54 = vadd.f32 %v3917_v10, %v3863_v14  ;;  %v3919_v23 = vpop.f32.mrb[43].mxu0 }
0x12fa   : > { %v3923_v49 = vadd.f32 %v3916_v7, %v3280_v53  ;;  %v3920_v25 = vadd.f32 %v3919_v23, %v3863_v14 }
0x12fb   : > { %v3926_v5 = vmax.f32 %v3922_v48, 0.0  ;;  %v3924_v24 = vadd.f32 %v3918_v54, %v3281_v15 }
0x12fc   : > { %v3927_v47 = vmax.f32 %v3923_v49, 0.0  ;;  %v3925_v9 = vadd.f32 %v3920_v25, %v3282_v26 }
0x12fd   : > { %3930 = vst [vmem:[%s1277_s9] sm:$0xff] %v3926_v5  ;;  %v3928_v3 = vmax.f32 %v3924_v24, 0.0 }
0x12fe   : > { %3931 = vst [vmem:[%s1277_s9 + $0x8] sm:$0xff] %v3927_v47  ;;  %v3929_v18 = vmax.f32 %v3925_v9, 0.0 }
0x12ff   : > { %3932 = vst [vmem:[%s1277_s9 + $0x10] sm:$0xff] %v3928_v3 }
0x1300   : > { %3933 = vst [vmem:[%s1277_s9 + $0x18] sm:$0xff] %v3929_v18 }
0x1301 PF: > { %p4152_p5 = scmp.ge.s32.totalorder %s4406_s22, 2  ;;  %s3971_s3 = sand.u32 1, %s4394_s15  }
0x1302   : > { %s3972_s11 = scalar_lea.sflag [#allocation3], %s3971_s3 }
0x1303   : > { %p4149_p1 = pnand %p4152_p5, %p4724_p6 }
0x1305   : > { %4389 = dma.done.wait (!%p4149_p1), %s3972_s11, 512  }
0x1306   : > { %4391 = vsyncadd (!%p4149_p1), %s3972_s11, 4294966784  ;;  %s6075_s13 = sld [smem:[#allocation39_spill]]  ;;  %p96_p2 = scmp.ge.s32.totalorder %s4707_s26, 4  }
0x1307   : > { %s6076_s15 = smov %s4398_s16  ;;  %s6077_s16 = smov %s4402_s18 }
0x1308   : > { %s6079_s22 = smov %s4707_s26  ;;  %98 = sbr.rel (!%p96_p2) target bundleno = 87 (0x57), region = 273 }
0x130c   : > { %s6078_s18 = smov %s6075_s13 }
0x130f   :  { %3985 = vsyncpa [#allocation3], 1 }
0x1310   :  { %3987 = vsyncpa [#allocation3 + $0x1], 1 }

</bundles_post_ra>
